<compile_context>
chip_gen: v6e
topology: v6e:2x2x1
jax: 0.10.0
libtpu: 0.0.40
codegen_flags: <defaults>
</compile_context>

<pallas_src>
import functools

import jax
import jax.numpy as jnp
from jax import lax
from jax.experimental import pallas as pl
from jax.experimental.pallas import tpu as pltpu

LANE = 128


def _round_up(v, m):
    return (v + m - 1) // m * m


def _identity_block3_kernel(
    x_ref,      # (1, H, W, Cin_p)    bf16 (channel-padded)
    w1_ref,     # (Cin_p, C1_p)       bf16, BN-scale folded
    b1_ref,     # (1, C1_p)           f32
    w2_ref,     # (K, K*C1_p, C2_p)   bf16, BN-scale folded, rows ordered (kw, c1)
    b2_ref,     # (1, C2_p)           f32
    w3_ref,     # (C2_p, C3_p)        bf16, BN-scale folded
    b3_ref,     # (1, C3_p)           f32
    out_ref,    # (1, H, W, C3_p)     f32
    v_ref,      # scratch (H+2p, W, K*C1_p) bf16 -- kw-im2col of h1 (row-padded)
):
    _, H, W, Cin = x_ref.shape
    K, KC1, C2 = w2_ref.shape
    C1 = KC1 // K
    C3 = w3_ref.shape[1]
    pad = (K - 1) // 2

    x = x_ref[0]                                            # (H, W, Cin) bf16

    # ---- conv1 (1x1, scale folded) + bias + relu (bf16 matmul, f32 acc) ----
    h1 = jnp.dot(x.reshape(H * W, Cin), w1_ref[...],
                 preferred_element_type=jnp.float32)        # (H*W, C1) f32
    h1 = jnp.maximum(h1 + b1_ref[...], 0.0)
    h1 = h1.reshape(H, W, C1).astype(jnp.bfloat16)

    # ---- build kw-im2col of h1 in VMEM scratch -----------------------------
    # v[h', w, kw*C1 + c] = h1_zeropadded[h' - pad, w + kw - pad, c]
    # Superset halo zero (4 stores), interior overwritten by the kw copies.
    if pad > 0:
        zrow = jnp.zeros((pad, W, KC1), jnp.bfloat16)
        v_ref[0:pad, :, :] = zrow
        v_ref[pad + H:, :, :] = zrow
        zcol = jnp.zeros((H, pad, KC1), jnp.bfloat16)
        v_ref[pad:pad + H, 0:pad, :] = zcol
        v_ref[pad:pad + H, W - pad:W, :] = zcol
    for kw in range(K):                 # static python loop (K small & static)
        vs = max(0, pad - kw)
        ws = max(0, kw - pad)
        lw = W - abs(kw - pad)
        c0 = kw * C1
        v_ref[pad:pad + H, vs:vs + lw, c0:c0 + C1] = h1[:, ws:ws + lw, :]

    # ---- conv2 (KxK) as K matmuls with K*C1-wide contraction ---------------
    # Row-axis-only slices of the scratch; chained value accumulation (no
    # VMEM accumulator round-trips, MRB-friendly on v7x).
    acc = None
    for kh in range(K):
        slab = v_ref[kh:kh + H, :, :].reshape(H * W, KC1)   # bf16
        z = jnp.dot(slab, w2_ref[kh], preferred_element_type=jnp.float32)
        acc = z if acc is None else acc + z
    h2 = jnp.maximum(acc + b2_ref[...], 0.0)                # (H*W, C2) f32

    # ---- conv3 (1x1) + bias + residual (f32) + relu ------------------------
    h3 = jnp.dot(h2.astype(jnp.bfloat16), w3_ref[...],
                 preferred_element_type=jnp.float32)        # (H*W, C3)
    h3 = h3 + b3_ref[...]
    out = jnp.maximum(h3.reshape(H, W, C3) + x.astype(jnp.float32), 0.0)
    out_ref[0] = out.astype(out_ref.dtype)


def identity_block3_pallas(x_nchw, kparams, kernel_size):
    """x_nchw: (N, Cin, H, W) float32.  Returns (N, Cin, H, W) float32."""
    w1, b1, w2, b2, w3, b3 = kparams
    N, Cin, H, W = x_nchw.shape
    Cin_p, C1_p = w1.shape
    C2_p = w2.shape[2]
    C3_p = w3.shape[1]
    K = kernel_size
    pad = (K - 1) // 2
    assert w2.shape == (K, K * C1_p, C2_p)
    assert C3_p == Cin_p, "identity block requires plane3 == inplanes (padded)"

    # NCHW f32 -> NHWC bf16, channel-padded to a lane multiple.
    x_nhwc = jnp.transpose(x_nchw, (0, 2, 3, 1)).astype(jnp.bfloat16)
    if Cin_p != Cin:
        x_nhwc = jnp.pad(x_nhwc, ((0, 0), (0, 0), (0, 0), (0, Cin_p - Cin)))

    def full(*shape):
        return pl.BlockSpec(shape, lambda n: (0,) * len(shape))

    out_nhwc = pl.pallas_call(
        _identity_block3_kernel,
        out_shape=jax.ShapeDtypeStruct((N, H, W, C3_p), jnp.float32),
        grid_spec=pltpu.PrefetchScalarGridSpec(
            num_scalar_prefetch=0,
            grid=(N,),
            in_specs=[
                pl.BlockSpec((1, H, W, Cin_p), lambda n: (n, 0, 0, 0)),
                full(Cin_p, C1_p), full(1, C1_p),
                full(K, K * C1_p, C2_p), full(1, C2_p),
                full(C2_p, C3_p), full(1, C3_p),
            ],
            out_specs=pl.BlockSpec((1, H, W, C3_p), lambda n: (n, 0, 0, 0)),
            scratch_shapes=[
                pltpu.VMEM((H + 2 * pad, W, K * C1_p), jnp.bfloat16),
            ],
        ),
        compiler_params=pltpu.CompilerParams(
            dimension_semantics=("parallel",),
            vmem_limit_bytes=16 * 1024 * 1024),
    )(x_nhwc, w1, b1, w2, b2, w3, b3)

    # Padded output channels are exactly zero (zero weights/biases + relu),
    # so slicing back is lossless.
    out_nhwc = out_nhwc[:, :, :, :Cin]
    return jnp.transpose(out_nhwc, (0, 3, 1, 2))


# ----------------------- parameters & reference ------------------------------

def make_params(key, inplanes, planes, kernel_size):
    """Deterministic synthetic parameters in PyTorch shapes/semantics."""
    p1, p2, p3 = planes
    ks = jax.random.split(key, 6)

    def conv_w(k, cout, cin, kh, kw):
        return 0.1 * jax.random.normal(k, (cout, cin, kh, kw), jnp.float32)

    def bn_p(k, c):
        kg, kb, km, kv = jax.random.split(k, 4)
        gamma = 1.0 + 0.1 * jax.random.normal(kg, (c,), jnp.float32)
        beta = 0.1 * jax.random.normal(kb, (c,), jnp.float32)
        mean = 0.1 * jax.random.normal(km, (c,), jnp.float32)
        var = jnp.abs(1.0 + 0.1 * jax.random.normal(kv, (c,), jnp.float32))
        return gamma, beta, mean, var

    return {
        "w1": conv_w(ks[0], p1, inplanes, 1, 1),
        "bn1": bn_p(ks[1], p1),
        "w2": conv_w(ks[2], p2, p1, kernel_size, kernel_size),
        "bn2": bn_p(ks[3], p2),
        "w3": conv_w(ks[4], p3, p2, 1, 1),
        "bn3": bn_p(ks[5], p3),
    }


def _fold_bn(gamma, beta, mean, var, eps):
    scale = gamma / jnp.sqrt(var + eps)
    bias = beta - mean * scale
    return scale, bias


def prepare_kernel_params(params, eps=1e-5, lane=LANE):
    """Fold BN scale into conv weights, convert layouts, pad channels to a
    lane multiple, cast weights to bf16 (zero-padding is semantics-preserving)."""
    s1, b1 = _fold_bn(*params["bn1"], eps)
    s2, b2 = _fold_bn(*params["bn2"], eps)
    s3, b3 = _fold_bn(*params["bn3"], eps)

    w1_t, w2_t, w3_t = params["w1"], params["w2"], params["w3"]
    C1, Cin = w1_t.shape[0], w1_t.shape[1]
    C2 = w2_t.shape[0]
    C3 = w3_t.shape[0]
    K = w2_t.shape[2]

    Cin_p = _round_up(Cin, lane)
    C1_p = _round_up(C1, lane)
    C2_p = _round_up(C2, lane)
    C3_p = _round_up(C3, lane)

    def padv(v, n):
        return jnp.pad(v, (0, n - v.shape[0]))

    # conv1: (C1, Cin, 1, 1) -> (Cin, C1), scale on output channels, pad.
    w1 = jnp.transpose(w1_t[:, :, 0, 0], (1, 0)) * s1[None, :]
    w1 = jnp.pad(w1, ((0, Cin_p - Cin), (0, C1_p - C1)))
    # conv2: (C2, C1, K, K) -> HWIO (K, K, C1, C2), scale, pad, -> (kh, kw*C1_p, C2_p).
    w2 = jnp.transpose(w2_t, (2, 3, 1, 0)) * s2[None, None, None, :]
    w2 = jnp.pad(w2, ((0, 0), (0, 0), (0, C1_p - C1), (0, C2_p - C2)))
    w2 = w2.reshape(K, K * C1_p, C2_p)
    # conv3: (C3, C2, 1, 1) -> (C2, C3), scale, pad.
    w3 = jnp.transpose(w3_t[:, :, 0, 0], (1, 0)) * s3[None, :]
    w3 = jnp.pad(w3, ((0, C2_p - C2), (0, C3_p - C3)))

    return (w1.astype(jnp.bfloat16), padv(b1, C1_p).reshape(1, -1),
            w2.astype(jnp.bfloat16), padv(b2, C2_p).reshape(1, -1),
            w3.astype(jnp.bfloat16), padv(b3, C3_p).reshape(1, -1))


def reference_forward(x_nchw, params, eps=1e-5):
    """Pure-JAX (XLA, f32) reference with the module's eval-mode semantics."""
    x = jnp.transpose(x_nchw, (0, 2, 3, 1))                 # NHWC

    def bn(h, p):
        gamma, beta, mean, var = p
        return (h - mean) * (gamma / jnp.sqrt(var + eps)) + beta

    w1 = jnp.transpose(params["w1"][:, :, 0, 0], (1, 0))
    w2 = jnp.transpose(params["w2"], (2, 3, 1, 0))          # HWIO
    w3 = jnp.transpose(params["w3"][:, :, 0, 0], (1, 0))

    h = jnp.einsum("nhwc,cd->nhwd", x, w1)
    h = jnp.maximum(bn(h, params["bn1"]), 0.0)
    h = lax.conv_general_dilated(h, w2, (1, 1), "SAME",
                                 dimension_numbers=("NHWC", "HWIO", "NHWC"))
    h = jnp.maximum(bn(h, params["bn2"]), 0.0)
    h = jnp.einsum("nhwc,cd->nhwd", h, w3)
    h = bn(h, params["bn3"])
    h = jnp.maximum(h + x, 0.0)
    return jnp.transpose(h, (0, 3, 1, 2))


if __name__ == "__main__":
    # Small shapes consistent with the module: inplanes == plane3 (identity add).
    N, Cin, H, W = 2, 32, 16, 16
    planes = (16, 16, 32)
    kernel_size = 3

    key = jax.random.PRNGKey(0)
    kx, kp = jax.random.split(key)
    x = jax.random.normal(kx, (N, Cin, H, W), jnp.float32)
    params = make_params(kp, Cin, planes, kernel_size)
    kparams = prepare_kernel_params(params)

    fn = jax.jit(functools.partial(identity_block3_pallas,
                                   kernel_size=kernel_size))
    out = jax.block_until_ready(fn(x, kparams))

    ref = jax.block_until_ready(reference_forward(x, params))
    assert out.shape == (N, Cin, H, W)
    max_err = float(jnp.max(jnp.abs(out - ref)))
    # bf16 activations/weights (f32 accumulation) => relaxed tolerance vs f32 ref.
    assert jnp.allclose(out, ref, rtol=5e-2, atol=5e-2), f"max abs err {max_err}"

    print("KERNEL_OK")
</pallas_src>

<mosaic_0001>
module attributes {stable_mosaic.version = 11 : i64} {
  func.func @_identity_block3_kernel(%arg0: i32, %arg1: memref<1x16x16x128xbf16, #tpu.memory_space<vmem>>, %arg2: memref<128x128xbf16, #tpu.memory_space<vmem>>, %arg3: memref<1x128xf32, #tpu.memory_space<vmem>>, %arg4: memref<3x384x128xbf16, #tpu.memory_space<vmem>>, %arg5: memref<1x128xf32, #tpu.memory_space<vmem>>, %arg6: memref<128x128xbf16, #tpu.memory_space<vmem>>, %arg7: memref<1x128xf32, #tpu.memory_space<vmem>>, %arg8: memref<1x16x16x128xf32, #tpu.memory_space<vmem>>, %arg9: memref<18x16x384xbf16, #tpu.memory_space<vmem>>) attributes {dimension_semantics = [#tpu.dimension_semantics<parallel>], iteration_bounds = array<i64: 2>, scalar_prefetch = 0 : i64, scratch_operands = 1 : i64, tpu.core_type = #tpu.core_type<tc>, window_params = [{transform_indices = @transform_0, window_bounds = array<i64: 1, 16, 16, 128>}, {pipeline_mode = #tpu.pipeline_mode<synchronous>, transform_indices = @transform_1, window_bounds = array<i64: 128, 128>}, {pipeline_mode = #tpu.pipeline_mode<synchronous>, transform_indices = @transform_2, window_bounds = array<i64: 1, 128>}, {pipeline_mode = #tpu.pipeline_mode<synchronous>, transform_indices = @transform_3, window_bounds = array<i64: 3, 384, 128>}, {pipeline_mode = #tpu.pipeline_mode<synchronous>, transform_indices = @transform_4, window_bounds = array<i64: 1, 128>}, {pipeline_mode = #tpu.pipeline_mode<synchronous>, transform_indices = @transform_5, window_bounds = array<i64: 128, 128>}, {pipeline_mode = #tpu.pipeline_mode<synchronous>, transform_indices = @transform_6, window_bounds = array<i64: 1, 128>}, {transform_indices = @transform_7, window_bounds = array<i64: 1, 16, 16, 128>}]} {
    %c0 = arith.constant 0 : index
    %c0_0 = arith.constant 0 : index
    %c0_1 = arith.constant 0 : index
    %c0_2 = arith.constant 0 : index
    %0 = vector.load %arg1[%c0, %c0_0, %c0_1, %c0_2] : memref<1x16x16x128xbf16, #tpu.memory_space<vmem>>, vector<1x16x16x128xbf16>
    %1 = vector.shape_cast %0 : vector<1x16x16x128xbf16> to vector<16x16x128xbf16>
    %2 = vector.shape_cast %1 : vector<16x16x128xbf16> to vector<256x128xbf16>
    %c0_3 = arith.constant 0 : index
    %c0_4 = arith.constant 0 : index
    %3 = vector.load %arg2[%c0_3, %c0_4] : memref<128x128xbf16, #tpu.memory_space<vmem>>, vector<128x128xbf16>
    %cst = arith.constant dense<0.000000e+00> : vector<256x128xf32>
    %4 = tpu.matmul %2, %3, %cst {dimension_numbers = #tpu.dot_dimension_numbers<[1], [0], [0], [1], [0, 0, 1, 1], [], []>} : vector<256x128xbf16>, vector<128x128xbf16>, vector<256x128xf32> -> vector<256x128xf32>
    %c0_5 = arith.constant 0 : index
    %c0_6 = arith.constant 0 : index
    %5 = vector.load %arg3[%c0_5, %c0_6] : memref<1x128xf32, #tpu.memory_space<vmem>>, vector<1x128xf32>
    %6 = vector.broadcast %5 : vector<1x128xf32> to vector<256x128xf32>
    %7 = arith.addf %4, %6 : vector<256x128xf32>
    %cst_7 = arith.constant 0.000000e+00 : f32
    %8 = vector.broadcast %cst_7 : f32 to vector<256x128xf32>
    %9 = arith.maximumf %7, %8 : vector<256x128xf32>
    %10 = vector.shape_cast %9 : vector<256x128xf32> to vector<16x16x128xf32>
    %11 = arith.truncf %10 : vector<16x16x128xf32> to vector<16x16x128xbf16>
    %cst_8 = arith.constant 0.000000e+00 : bf16
    %12 = vector.broadcast %cst_8 : bf16 to vector<1x16x384xbf16>
    %c0_9 = arith.constant 0 : index
    %c0_10 = arith.constant 0 : index
    %c0_11 = arith.constant 0 : index
    %13 = vector.load %arg9[%c0_9, %c0_10, %c0_11] : memref<18x16x384xbf16, #tpu.memory_space<vmem>>, vector<1x16x384xbf16>
    tpu.vector_store %arg9[%c0_9, %c0_10, %c0_11], %12 {strides = array<i32>} : memref<18x16x384xbf16, #tpu.memory_space<vmem>>, vector<1x16x384xbf16>,
    %c17 = arith.constant 17 : index
    %c0_12 = arith.constant 0 : index
    %c0_13 = arith.constant 0 : index
    %14 = vector.load %arg9[%c17, %c0_12, %c0_13] : memref<18x16x384xbf16, #tpu.memory_space<vmem>>, vector<1x16x384xbf16>
    tpu.vector_store %arg9[%c17, %c0_12, %c0_13], %12 {strides = array<i32>} : memref<18x16x384xbf16, #tpu.memory_space<vmem>>, vector<1x16x384xbf16>,
    %cst_14 = arith.constant 0.000000e+00 : bf16
    %15 = vector.broadcast %cst_14 : bf16 to vector<16x1x384xbf16>
    %c1 = arith.constant 1 : index
    %c0_15 = arith.constant 0 : index
    %c0_16 = arith.constant 0 : index
    %16 = vector.load %arg9[%c1, %c0_15, %c0_16] : memref<18x16x384xbf16, #tpu.memory_space<vmem>>, vector<16x1x384xbf16>
    tpu.vector_store %arg9[%c1, %c0_15, %c0_16], %15 {strides = array<i32>} : memref<18x16x384xbf16, #tpu.memory_space<vmem>>, vector<16x1x384xbf16>,
    %c1_17 = arith.constant 1 : index
    %c15 = arith.constant 15 : index
    %c0_18 = arith.constant 0 : index
    %17 = vector.load %arg9[%c1_17, %c15, %c0_18] : memref<18x16x384xbf16, #tpu.memory_space<vmem>>, vector<16x1x384xbf16>
    tpu.vector_store %arg9[%c1_17, %c15, %c0_18], %15 {strides = array<i32>} : memref<18x16x384xbf16, #tpu.memory_space<vmem>>, vector<16x1x384xbf16>,
    %18 = vector.extract_strided_slice %11 {offsets = [0, 0, 0], sizes = [16, 15, 128], strides = [1, 1, 1]} : vector<16x16x128xbf16> to vector<16x15x128xbf16>
    %c1_19 = arith.constant 1 : index
    %c1_20 = arith.constant 1 : index
    %c0_21 = arith.constant 0 : index
    %19 = vector.load %arg9[%c1_19, %c1_20, %c0_21] : memref<18x16x384xbf16, #tpu.memory_space<vmem>>, vector<16x15x128xbf16>
    tpu.vector_store %arg9[%c1_19, %c1_20, %c0_21], %18 {strides = array<i32>} : memref<18x16x384xbf16, #tpu.memory_space<vmem>>, vector<16x15x128xbf16>,
    %c1_22 = arith.constant 1 : index
    %c0_23 = arith.constant 0 : index
    %c128 = arith.constant 128 : index
    %20 = vector.load %arg9[%c1_22, %c0_23, %c128] : memref<18x16x384xbf16, #tpu.memory_space<vmem>>, vector<16x16x128xbf16>
    tpu.vector_store %arg9[%c1_22, %c0_23, %c128], %11 {strides = array<i32>} : memref<18x16x384xbf16, #tpu.memory_space<vmem>>, vector<16x16x128xbf16>,
    %21 = vector.extract_strided_slice %11 {offsets = [0, 1, 0], sizes = [16, 15, 128], strides = [1, 1, 1]} : vector<16x16x128xbf16> to vector<16x15x128xbf16>
    %c1_24 = arith.constant 1 : index
    %c0_25 = arith.constant 0 : index
    %c256 = arith.constant 256 : index
    %22 = vector.load %arg9[%c1_24, %c0_25, %c256] : memref<18x16x384xbf16, #tpu.memory_space<vmem>>, vector<16x15x128xbf16>
    tpu.vector_store %arg9[%c1_24, %c0_25, %c256], %21 {strides = array<i32>} : memref<18x16x384xbf16, #tpu.memory_space<vmem>>, vector<16x15x128xbf16>,
    %c0_26 = arith.constant 0 : index
    %c0_27 = arith.constant 0 : index
    %c0_28 = arith.constant 0 : index
    %23 = vector.load %arg9[%c0_26, %c0_27, %c0_28] : memref<18x16x384xbf16, #tpu.memory_space<vmem>>, vector<16x16x384xbf16>
    %24 = vector.shape_cast %23 : vector<16x16x384xbf16> to vector<256x384xbf16>
    %c0_29 = arith.constant 0 : index
    %c0_30 = arith.constant 0 : index
    %c0_31 = arith.constant 0 : index
    %25 = vector.load %arg4[%c0_29, %c0_30, %c0_31] : memref<3x384x128xbf16, #tpu.memory_space<vmem>>, vector<1x384x128xbf16>
    %26 = vector.shape_cast %25 : vector<1x384x128xbf16> to vector<384x128xbf16>
    %cst_32 = arith.constant dense<0.000000e+00> : vector<256x128xf32>
    %27 = tpu.matmul %24, %26, %cst_32 {dimension_numbers = #tpu.dot_dimension_numbers<[1], [0], [0], [1], [0, 0, 1, 1], [], []>} : vector<256x384xbf16>, vector<384x128xbf16>, vector<256x128xf32> -> vector<256x128xf32>
    %c1_33 = arith.constant 1 : index
    %c0_34 = arith.constant 0 : index
    %c0_35 = arith.constant 0 : index
    %28 = vector.load %arg9[%c1_33, %c0_34, %c0_35] : memref<18x16x384xbf16, #tpu.memory_space<vmem>>, vector<16x16x384xbf16>
    %29 = vector.shape_cast %28 : vector<16x16x384xbf16> to vector<256x384xbf16>
    %c1_36 = arith.constant 1 : index
    %c0_37 = arith.constant 0 : index
    %c0_38 = arith.constant 0 : index
    %30 = vector.load %arg4[%c1_36, %c0_37, %c0_38] : memref<3x384x128xbf16, #tpu.memory_space<vmem>>, vector<1x384x128xbf16>
    %31 = vector.shape_cast %30 : vector<1x384x128xbf16> to vector<384x128xbf16>
    %cst_39 = arith.constant dense<0.000000e+00> : vector<256x128xf32>
    %32 = tpu.matmul %29, %31, %cst_39 {dimension_numbers = #tpu.dot_dimension_numbers<[1], [0], [0], [1], [0, 0, 1, 1], [], []>} : vector<256x384xbf16>, vector<384x128xbf16>, vector<256x128xf32> -> vector<256x128xf32>
    %33 = arith.addf %27, %32 : vector<256x128xf32>
    %c2 = arith.constant 2 : index
    %c0_40 = arith.constant 0 : index
    %c0_41 = arith.constant 0 : index
    %34 = vector.load %arg9[%c2, %c0_40, %c0_41] : memref<18x16x384xbf16, #tpu.memory_space<vmem>>, vector<16x16x384xbf16>
    %35 = vector.shape_cast %34 : vector<16x16x384xbf16> to vector<256x384xbf16>
    %c2_42 = arith.constant 2 : index
    %c0_43 = arith.constant 0 : index
    %c0_44 = arith.constant 0 : index
    %36 = vector.load %arg4[%c2_42, %c0_43, %c0_44] : memref<3x384x128xbf16, #tpu.memory_space<vmem>>, vector<1x384x128xbf16>
    %37 = vector.shape_cast %36 : vector<1x384x128xbf16> to vector<384x128xbf16>
    %cst_45 = arith.constant dense<0.000000e+00> : vector<256x128xf32>
    %38 = tpu.matmul %35, %37, %cst_45 {dimension_numbers = #tpu.dot_dimension_numbers<[1], [0], [0], [1], [0, 0, 1, 1], [], []>} : vector<256x384xbf16>, vector<384x128xbf16>, vector<256x128xf32> -> vector<256x128xf32>
    %39 = arith.addf %33, %38 : vector<256x128xf32>
    %c0_46 = arith.constant 0 : index
    %c0_47 = arith.constant 0 : index
    %40 = vector.load %arg5[%c0_46, %c0_47] : memref<1x128xf32, #tpu.memory_space<vmem>>, vector<1x128xf32>
    %41 = vector.broadcast %40 : vector<1x128xf32> to vector<256x128xf32>
    %42 = arith.addf %39, %41 : vector<256x128xf32>
    %cst_48 = arith.constant 0.000000e+00 : f32
    %43 = vector.broadcast %cst_48 : f32 to vector<256x128xf32>
    %44 = arith.maximumf %42, %43 : vector<256x128xf32>
    %45 = arith.truncf %44 : vector<256x128xf32> to vector<256x128xbf16>
    %c0_49 = arith.constant 0 : index
    %c0_50 = arith.constant 0 : index
    %46 = vector.load %arg6[%c0_49, %c0_50] : memref<128x128xbf16, #tpu.memory_space<vmem>>, vector<128x128xbf16>
    %cst_51 = arith.constant dense<0.000000e+00> : vector<256x128xf32>
    %47 = tpu.matmul %45, %46, %cst_51 {dimension_numbers = #tpu.dot_dimension_numbers<[1], [0], [0], [1], [0, 0, 1, 1], [], []>} : vector<256x128xbf16>, vector<128x128xbf16>, vector<256x128xf32> -> vector<256x128xf32>
    %c0_52 = arith.constant 0 : index
    %c0_53 = arith.constant 0 : index
    %48 = vector.load %arg7[%c0_52, %c0_53] : memref<1x128xf32, #tpu.memory_space<vmem>>, vector<1x128xf32>
    %49 = vector.broadcast %48 : vector<1x128xf32> to vector<256x128xf32>
    %50 = arith.addf %47, %49 : vector<256x128xf32>
    %51 = vector.shape_cast %50 : vector<256x128xf32> to vector<16x16x128xf32>
    %52 = arith.extf %1 : vector<16x16x128xbf16> to vector<16x16x128xf32>
    %53 = arith.addf %51, %52 : vector<16x16x128xf32>
    %cst_54 = arith.constant 0.000000e+00 : f32
    %54 = vector.broadcast %cst_54 : f32 to vector<16x16x128xf32>
    %55 = arith.maximumf %53, %54 : vector<16x16x128xf32>
    %c0_55 = arith.constant 0 : index
    %c0_56 = arith.constant 0 : index
    %c0_57 = arith.constant 0 : index
    %c0_58 = arith.constant 0 : index
    %56 = vector.load %arg8[%c0_55, %c0_56, %c0_57, %c0_58] : memref<1x16x16x128xf32, #tpu.memory_space<vmem>>, vector<1x16x16x128xf32>
    %57 = vector.shape_cast %56 : vector<1x16x16x128xf32> to vector<16x16x128xf32>
    %58 = vector.shape_cast %55 : vector<16x16x128xf32> to vector<1x16x16x128xf32>
    tpu.vector_store %arg8[%c0_55, %c0_56, %c0_57, %c0_58], %58 {strides = array<i32>} : memref<1x16x16x128xf32, #tpu.memory_space<vmem>>, vector<1x16x16x128xf32>,
    return
  }
  func.func @transform_0(%arg0: i32) -> (i32, i32, i32, i32) {
    %c0_i32 = arith.constant 0 : i32
    %c0_i32_0 = arith.constant 0 : i32
    %c0_i32_1 = arith.constant 0 : i32
    %c0_i32_2 = arith.constant 0 : i32
    return %arg0, %c0_i32, %c0_i32_0, %c0_i32_1 : i32, i32, i32, i32
  }
  func.func @transform_1(%arg0: i32) -> (i32, i32) {
    %c0_i32 = arith.constant 0 : i32
    %c0_i32_0 = arith.constant 0 : i32
    %c0_i32_1 = arith.constant 0 : i32
    return %c0_i32, %c0_i32_0 : i32, i32
  }
  func.func @transform_2(%arg0: i32) -> (i32, i32) {
    %c0_i32 = arith.constant 0 : i32
    %c0_i32_0 = arith.constant 0 : i32
    %c0_i32_1 = arith.constant 0 : i32
    return %c0_i32, %c0_i32_0 : i32, i32
  }
  func.func @transform_3(%arg0: i32) -> (i32, i32, i32) {
    %c0_i32 = arith.constant 0 : i32
    %c0_i32_0 = arith.constant 0 : i32
    %c0_i32_1 = arith.constant 0 : i32
    %c0_i32_2 = arith.constant 0 : i32
    return %c0_i32, %c0_i32_0, %c0_i32_1 : i32, i32, i32
  }
  func.func @transform_4(%arg0: i32) -> (i32, i32) {
    %c0_i32 = arith.constant 0 : i32
    %c0_i32_0 = arith.constant 0 : i32
    %c0_i32_1 = arith.constant 0 : i32
    return %c0_i32, %c0_i32_0 : i32, i32
  }
  func.func @transform_5(%arg0: i32) -> (i32, i32) {
    %c0_i32 = arith.constant 0 : i32
    %c0_i32_0 = arith.constant 0 : i32
    %c0_i32_1 = arith.constant 0 : i32
    return %c0_i32, %c0_i32_0 : i32, i32
  }
  func.func @transform_6(%arg0: i32) -> (i32, i32) {
    %c0_i32 = arith.constant 0 : i32
    %c0_i32_0 = arith.constant 0 : i32
    %c0_i32_1 = arith.constant 0 : i32
    return %c0_i32, %c0_i32_0 : i32, i32
  }
  func.func @transform_7(%arg0: i32) -> (i32, i32, i32, i32) {
    %c0_i32 = arith.constant 0 : i32
    %c0_i32_0 = arith.constant 0 : i32
    %c0_i32_1 = arith.constant 0 : i32
    %c0_i32_2 = arith.constant 0 : i32
    return %arg0, %c0_i32, %c0_i32_0, %c0_i32_1 : i32, i32, i32, i32
  }
}

</mosaic_0001>

<bundles_post_ra>
// kernel: identity_block3_pallas.1
= control target key start
LH: loop header
LB: loop body
LE: loop exit
PB: predicated region body
PF: predicated region fallthrough
CT: control target
= control target key end

     0   :  { %s6168_s24 = smov 0   ;;  %s7467_s0 = inlined_call_operand.vmem [shape: bf16[2,16,16,128], index: 0, kind: input, shape index: {}]   ;;  %s7468_s1 = inlined_call_operand.vmem [shape: bf16[128,128], index: 1, kind: input, shape index: {}]   ;;  %s7469_s2 = inlined_call_operand.vmem [shape: f32[1,128], index: 2, kind: input, shape index: {}]   ;;  %s7470_s3 = inlined_call_operand.vmem [shape: bf16[3,384,128], index: 3, kind: input, shape index: {}]   ;;  %s7471_s4 = inlined_call_operand.vmem [shape: f32[1,128], index: 4, kind: input, shape index: {}]   ;;  %s7472_s5 = inlined_call_operand.vmem [shape: bf16[128,128], index: 5, kind: input, shape index: {}]   ;;  %s7473_s6 = inlined_call_operand.vmem [shape: f32[1,128], index: 6, kind: input, shape index: {}]   ;;  %s7474_s7 = inlined_call_operand.vmem [shape: f32[2,16,16,128], index: 7, kind: output, shape index: {}]  }
   0x1 LB: > { %s4688_s25 = sadd.s32 4294967295, %s6125_s24   ;;  %p4692_p0 = scmp.ge.s32.totalorder %s6125_s24, 1  ;;  %s6125_s24 = sphi %s6168_s24, %s17_s24  }
   0x2   : > { %p237_p1 = scmp.lt.s32.totalorder %s6125_s24, 3 }
   0x4   : > { %p238_p2 = pnand %p4692_p0, %p237_p1 }
   0x6   : > { %241 = sbr.rel (%p238_p2) target bundleno = 1000 (0x3e8), region = 48 }
   0xb   : > { %v5833_v0 = vld [vmem:[%s7468_s1 + $0x38] sm:$0xff]   ;;  %p269_p3 = scmp.lt.s32.totalorder %s4688_s25, 1  ;;  %v5834_v1 = vld [vmem:[%s7468_s1 + $0x30] sm:$0xff]   ;;  %v5835_v2 = vld [vmem:[%s7468_s1 + $0x28] sm:$0xff]   ;;  %vm698_vm0 = vcmask 1040384   ;;  %vm701_vm2 = vcmask 1044484  }
   0xc   : > { %5568 = vmatprep.subr.bf16.mxu0 %v5833_v0  ;;  %5808 = vmatprep.subr.bf16.mxu1 %v5833_v0  ;;  %v5836_v3 = vld [vmem:[%s7468_s1 + $0x20] sm:$0xff]   ;;  %v5837_v6 = vld [vmem:[%s7468_s1 + $0x18] sm:$0xff]   ;;  %v5838_v7 = vld [vmem:[%s7468_s1 + $0x10] sm:$0xff]   ;;  %vm699_vm1 = vsmask.f32 256  ;;  %vm801_vm7 = vcmask 1043459  }
   0xd   : > { %s7502_s25 = smov (!%p269_p3, %s4688_s25), 1  ;;  %5569 = vmatpush3.bf16.msra.mxu0 %v5833_v0  ;;  %5816 = vmatpush3.bf16.msra.mxu1 %v5833_v0  ;;  %v5839_v8 = vld [vmem:[%s7468_s1 + $0x8] sm:$0xff]   ;;  %v5840_v9 = vld [vmem:[%s7468_s1] sm:$0xff]   ;;  %v5857_v14 = vld [vmem:[%s7470_s3 + $0x138] sm:$0xff]   ;;  %vm702_vm3 = vsmask.f32 4352 }
   0xe   : > { %5570 = vmatprep.subr.bf16.mxu0 %v5834_v1  ;;  %s5078_s9 = sshll.u32 %s7502_s25, 7  ;;  %5809 = vmatprep.subr.bf16.mxu1 %v5834_v1  ;;  %v5858_v15 = vld [vmem:[%s7470_s3 + $0xf8] sm:$0xff]   ;;  %vm6234_vm4 = vmand %vm698_vm0, %vm699_vm1  ;;  %v5860_v28 = vld [vmem:[%s7470_s3 + $0x130] sm:$0xff]   ;;  %vm802_vm8 = vsmask.f32 7950  ;;  %vm804_vm9 = vcmask 1047559  }
   0xf   : > { %s6191_s12 = scalar_lea.vmem %s7467_s0, %s5078_s9  ;;  %v5859_v26 = vld [vmem:[%s7470_s3 + $0x178] sm:$0xff]   ;;  %v5861_v29 = vld [vmem:[%s7470_s3 + $0xf0] sm:$0xff]   ;;  %vm703_vm5 = vmand %vm701_vm2, %vm702_vm3  ;;  %vm805_vm10 = vsmask.f32 7966  ;;  %vm1275_vm14 = vsmask.f32 7938 }
  0x10   : > { %v280_v4 = vld [vmem:[%s6191_s12] sm:$0xff]   ;;  %v282_v10 = vld [vmem:[%s6191_s12 + $0x8] sm:$0xff]   ;;  %v284_v11 = vld [vmem:[%s6191_s12 + $0x10] sm:$0xff]   ;;  %vm1405_vm15 = vsmask.f32 3328  ;;  %vm1274_vm3 = vcmask 1043456  }
  0x11   : > { %5571 = vmatpush3.bf16.msra.mxu0 %v5834_v1  ;;  %5817 = vmatpush3.bf16.msra.mxu1 %v5834_v1  ;;  %v296_v5 = vld [vmem:[%s6191_s12 + $0x40] sm:$0xff]   ;;  %v298_v12 = vld [vmem:[%s6191_s12 + $0x48] sm:$0xff]   ;;  %v300_v13 = vld [vmem:[%s6191_s12 + $0x50] sm:$0xff]   ;;  %vm1406_vm0 = vsmask.f32 7440  ;;  %s5079_s10 = sshll.u32 %s7502_s25, 8 }
  0x12   : > { %5572 = vmatprep.subr.bf16.mxu0 %v5835_v2  ;;  %5810 = vmatprep.subr.bf16.mxu1 %v5835_v2  ;;  %v286_v16 = vld [vmem:[%s6191_s12 + $0x18] sm:$0xff]   ;;  %v288_v17 = vld [vmem:[%s6191_s12 + $0x20] sm:$0xff]   ;;  %v290_v20 = vld [vmem:[%s6191_s12 + $0x28] sm:$0xff]   ;;  %vm984_vm2 = vsmask.f32 4368  ;;  %s7386_s14 = scalar_lea.vmem %s7474_s7, %s5079_s10 }
  0x13   : > { %5584 = vmatprep.mubr.bf16.mxu0 %v280_v4  ;;  %5600 = vmatprep.mubr.bf16.mxu1 %v296_v5  ;;  %v302_v18 = vld [vmem:[%s6191_s12 + $0x58] sm:$0xff]   ;;  %v304_v19 = vld [vmem:[%s6191_s12 + $0x60] sm:$0xff]   ;;  %v292_v21 = vld [vmem:[%s6191_s12 + $0x30] sm:$0xff]  }
  0x14   : > { %v306_v22 = vld [vmem:[%s6191_s12 + $0x68] sm:$0xff]   ;;  %v308_v23 = vld [vmem:[%s6191_s12 + $0x70] sm:$0xff]   ;;  %v294_v24 = vld [vmem:[%s6191_s12 + $0x38] sm:$0xff]  }
  0x15   : > { %5573 = vmatpush3.bf16.msra.mxu0 %v5835_v2  ;;  %5818 = vmatpush3.bf16.msra.mxu1 %v5835_v2  ;;  %v310_v25 = vld [vmem:[%s6191_s12 + $0x78] sm:$0xff]   ;;  %v711_v30 = vld [vmem:[#allocation2 + $0x30] sm:$0x11]  ;;  %vm6249_vm6 = vmor %vm703_vm5, %vm6234_vm4 }
  0x16   : > { %5574 = vmatprep.subr.bf16.mxu0 %v5836_v3  ;;  %5811 = vmatprep.subr.bf16.mxu1 %v5836_v3  ;;  %v5862_v31 = vld [vmem:[%s7470_s3 + $0x170] sm:$0xff]   ;;  %v712_v33 = vsel %vm6249_vm6, 0, %v711_v30  ;;  %v705_v34 = vld [vmem:[#allocation2 + $0x18] sm:$0x11]  ;;  %vm6257_vm11 = vmand %vm801_vm7, %vm802_vm8 }
  0x17   : > { %713 = vst [vmem:[#allocation2 + $0x30] sm:$0x11] %v712_v33  ;;  %v706_v35 = vsel %vm6249_vm6, 0, %v705_v34  ;;  %v5863_v37 = vld [vmem:[%s7470_s3 + $0x128] sm:$0xff]   ;;  %vm806_vm12 = vmand %vm804_vm9, %vm805_vm10  ;;  %v814_v38 = vld [vmem:[#allocation2 + $0x3c] sm:$0x88] }
  0x18   : > { %707 = vst [vmem:[#allocation2 + $0x18] sm:$0x11] %v706_v35  ;;  %v5864_v39 = vld [vmem:[%s7470_s3 + $0xe8] sm:$0xff]   ;;  %vm6269_vm13 = vmor %vm806_vm12, %vm6257_vm11  ;;  %v817_v41 = vld [vmem:[#allocation2 + $0x44] sm:$0x8] }
  0x19   : > { %5575 = vmatpush3.bf16.msra.mxu0 %v5836_v3  ;;  %5819 = vmatpush3.bf16.msra.mxu1 %v5836_v3  ;;  %v5865_v42 = vld [vmem:[%s7470_s3 + $0x168] sm:$0xff]   ;;  %v815_v43 = vsel %vm6269_vm13, 0, %v814_v38  ;;  %v818_v44 = vsel %vm6257_vm11, 0, %v817_v41  ;;  %v5866_v49 = vld [vmem:[%s7470_s3 + $0x120] sm:$0xff]   ;;  %v714_v50 = vld [vmem:[#allocation2 + $0x38] sm:$0x1] }
  0x1a   : > { %5576 = vmatprep.subr.bf16.mxu0 %v5837_v6  ;;  %5812 = vmatprep.subr.bf16.mxu1 %v5837_v6  ;;  %816 = vst [vmem:[#allocation2 + $0x3c] sm:$0x88] %v815_v43  ;;  %819 = vst [vmem:[#allocation2 + $0x44] sm:$0x8] %v818_v44  ;;  %v808_v45 = vld [vmem:[#allocation2 + $0x24] sm:$0x88] }
  0x1b   : > { %v811_v46 = vld [vmem:[#allocation2 + $0x2c] sm:$0x8]  ;;  %v809_v47 = vsel %vm6269_vm13, 0, %v808_v45  ;;  %v715_v51 = vsel %vm6234_vm4, 0, %v714_v50  ;;  %v5867_v52 = vld [vmem:[%s7470_s3 + $0xe0] sm:$0xff]   ;;  %v5869_v60 = vld [vmem:[%s7470_s3 + $0x118] sm:$0xff]  }
  0x1c   : > { %v812_v48 = vsel %vm6257_vm11, 0, %v811_v46  ;;  %810 = vst [vmem:[#allocation2 + $0x24] sm:$0x88] %v809_v47  ;;  %716 = vst [vmem:[#allocation2 + $0x38] sm:$0x1] %v715_v51  ;;  %v5868_v59 = vld [vmem:[%s7470_s3 + $0x160] sm:$0xff]  }
  0x1d   : > { %5577 = vmatpush3.bf16.msra.mxu0 %v5837_v6  ;;  %5820 = vmatpush3.bf16.msra.mxu1 %v5837_v6  ;;  %813 = vst [vmem:[#allocation2 + $0x2c] sm:$0x8] %v812_v48  ;;  %v708_v53 = vld [vmem:[#allocation2 + $0x20] sm:$0x1]  ;;  %v717_v57 = vld [vmem:[#allocation2 + $0x48] sm:$0x11]  ;;  %vm6491_vm5 = vmor %vm1405_vm15, %vm1406_vm0 }
  0x1e   : > { %5578 = vmatprep.subr.bf16.mxu0 %v5838_v7  ;;  %5813 = vmatprep.subr.bf16.mxu1 %v5838_v7  ;;  %v723_v54 = vld [vmem:[#allocation2 + $0x60] sm:$0x11]  ;;  %v709_v55 = vsel %vm6234_vm4, 0, %v708_v53  ;;  %v718_v58 = vsel %vm6249_vm6, 0, %v717_v57  ;;  %v829_v61 = vld [vmem:[#allocation2 + $0x74] sm:$0x8]  ;;  %vm6510_vm7 = vmand %vm1274_vm3, %vm1405_vm15 }
  0x1f   : > { %v724_v56 = vsel %vm6249_vm6, 0, %v723_v54  ;;  %710 = vst [vmem:[#allocation2 + $0x20] sm:$0x1] %v709_v55  ;;  %719 = vst [vmem:[#allocation2 + $0x48] sm:$0x11] %v718_v58  ;;  %v5870_v62 = vld [vmem:[%s7470_s3 + $0xd8] sm:$0xff]  }
  0x20   : > { %725 = vst [vmem:[#allocation2 + $0x60] sm:$0x11] %v724_v56  ;;  %v830_v63 = vsel %vm6257_vm11, 0, %v829_v61  ;;  %v5871_v0 = vld [vmem:[%s7470_s3 + $0x158] sm:$0xff]   ;;  %v826_v1 = vld [vmem:[#allocation2 + $0x6c] sm:$0x88] }
  0x21   : > { %5579 = vmatpush3.bf16.msra.mxu0 %v5838_v7  ;;  %5821 = vmatpush3.bf16.msra.mxu1 %v5838_v7  ;;  %831 = vst [vmem:[#allocation2 + $0x74] sm:$0x8] %v830_v63  ;;  %v5872_v2 = vld [vmem:[%s7470_s3 + $0x110] sm:$0xff]   ;;  %v827_v3 = vsel %vm6269_vm13, 0, %v826_v1  ;;  %v823_v5 = vld [vmem:[#allocation2 + $0x5c] sm:$0x8] }
  0x22   : > { %5580 = vmatprep.subr.bf16.mxu0 %v5839_v8  ;;  %5814 = vmatprep.subr.bf16.mxu1 %v5839_v8  ;;  %v5873_v4 = vld [vmem:[%s7470_s3 + $0xd0] sm:$0xff]   ;;  %828 = vst [vmem:[#allocation2 + $0x6c] sm:$0x88] %v827_v3  ;;  %v824_v7 = vsel %vm6257_vm11, 0, %v823_v5  ;;  %v5880_v30 = vld [vmem:[%s7470_s3 + $0x140] sm:$0xff]   ;;  %v6384_v57 = vld [vmem:[%s7470_s3 + $0xb8] sm:$0xff]  }
  0x23   : > { %v820_v6 = vld [vmem:[#allocation2 + $0x54] sm:$0x88]  ;;  %825 = vst [vmem:[#allocation2 + $0x5c] sm:$0x8] %v824_v7  ;;  %v732_v34 = vld [vmem:[#allocation2 + $0x80] sm:$0x1] }
  0x24   : > { %v832_v35 = vld [vmem:[#allocation2 + $0x84] sm:$0x88]  ;;  %v853_v41 = vld [vmem:[#allocation2 + $0xd4] sm:$0x8]  ;;  %v747_v44 = vld [vmem:[#allocation2 + $0xc0] sm:$0x11] }
  0x25   : > { %5581 = vmatpush3.bf16.msra.mxu0 %v5839_v8  ;;  %5822 = vmatpush3.bf16.msra.mxu1 %v5839_v8  ;;  %v5874_v8 = vld [vmem:[%s7470_s3 + $0x150] sm:$0xff]   ;;  %v833_v38 = vsel %vm6269_vm13, 0, %v832_v35  ;;  %v854_v43 = vsel %vm6257_vm11, 0, %v853_v41  ;;  %v741_v45 = vld [vmem:[#allocation2 + $0xa8] sm:$0x11]  ;;  %v748_v46 = vsel %vm6249_vm6, 0, %v747_v44 }
  0x26   : > { %5582 = vmatprep.subr.bf16.mxu0 %v5840_v9  ;;  %5815 = vmatprep.subr.bf16.mxu1 %v5840_v9  ;;  %834 = vst [vmem:[#allocation2 + $0x84] sm:$0x88] %v833_v38  ;;  %855 = vst [vmem:[#allocation2 + $0xd4] sm:$0x8] %v854_v43  ;;  %v742_v47 = vsel %vm6249_vm6, 0, %v741_v45  ;;  %v5911_v43 = vld [vmem:[%s7470_s3 + $0x78] sm:$0xff]  }
  0x27   : > { %v750_v48 = vld [vmem:[#allocation2 + $0xc8] sm:$0x1]  ;;  %749 = vst [vmem:[#allocation2 + $0xc0] sm:$0x11] %v748_v46  ;;  %743 = vst [vmem:[#allocation2 + $0xa8] sm:$0x11] %v742_v47 }
  0x28   : > { %v751_v50 = vsel %vm6234_vm4, 0, %v750_v48  ;;  %v844_v54 = vld [vmem:[#allocation2 + $0xb4] sm:$0x88]  ;;  %v865_v56 = vld [vmem:[#allocation2 + $0x104] sm:$0x8] }
  0x29   : > { %5583 = vmatpush3.bf16.msra.mxu0 %v5840_v9  ;;  %5823 = vmatpush3.bf16.msra.mxu1 %v5840_v9  ;;  %v726_v9 = vld [vmem:[#allocation2 + $0x68] sm:$0x1]  ;;  %752 = vst [vmem:[#allocation2 + $0xc8] sm:$0x1] %v751_v50  ;;  %v845_v55 = vsel %vm6269_vm13, 0, %v844_v54 }
  0x2a   : > { %5136 = vmatprep.subr.bf16.mxu1 %v5857_v14  ;;  %5616 = vmatprep.subr.bf16.mxu0 %v5859_v26  ;;  %v735_v14 = vld [vmem:[#allocation2 + $0x90] sm:$0x11]  ;;  %846 = vst [vmem:[#allocation2 + $0xb4] sm:$0x88] %v845_v55  ;;  %v762_v63 = vld [vmem:[#allocation2 + $0xf8] sm:$0x1] }
  0x2b   : > { %v759_v58 = vld [vmem:[#allocation2 + $0xf0] sm:$0x11]  ;;  %v763_v1 = vsel %vm6234_vm4, 0, %v762_v63  ;;  %v859_v3 = vld [vmem:[#allocation2 + $0xec] sm:$0x8] }
  0x2c   : > { %5585 = vmatmul.mubr.bf16.vlgmr.msra.gmra.mxu0 %v282_v10  ;;  %5601 = vmatmul.mubr.bf16.vlgmr.msra.gmra.mxu1 %v298_v12  ;;  %v821_v10 = vsel %vm6269_vm13, 0, %v820_v6  ;;  %v720_v12 = vld [vmem:[#allocation2 + $0x50] sm:$0x1]  ;;  %v760_v61 = vsel %vm6249_vm6, 0, %v759_v58  ;;  %764 = vst [vmem:[#allocation2 + $0xf8] sm:$0x1] %v763_v1 }
  0x2d   : > { %5588 = vmatprep.mubr.bf16.mxu0 %v284_v11  ;;  %5604 = vmatprep.mubr.bf16.mxu1 %v300_v13  ;;  %v727_v11 = vsel %vm6234_vm4, 0, %v726_v9  ;;  %822 = vst [vmem:[#allocation2 + $0x54] sm:$0x88] %v821_v10  ;;  %v721_v13 = vsel %vm6234_vm4, 0, %v720_v12  ;;  %761 = vst [vmem:[#allocation2 + $0xf0] sm:$0x11] %v760_v61 }
  0x2e   : > { %5137 = vmatpush3.bf16.msra.mxu1 %v5858_v15  ;;  %5617 = vmatpush3.bf16.msra.mxu0 %v5859_v26  ;;  %728 = vst [vmem:[#allocation2 + $0x68] sm:$0x1] %v727_v11  ;;  %722 = vst [vmem:[#allocation2 + $0x50] sm:$0x1] %v721_v13  ;;  %v729_v15 = vld [vmem:[#allocation2 + $0x78] sm:$0x11] }
  0x2f   : > { %5138 = vmatprep.subr.bf16.mxu1 %v5860_v28  ;;  %5618 = vmatprep.subr.bf16.mxu0 %v5862_v31  ;;  %v756_v5 = vld [vmem:[#allocation2 + $0xe0] sm:$0x1]  ;;  %v856_v6 = vld [vmem:[#allocation2 + $0xe4] sm:$0x88]  ;;  %v871_v7 = vld [vmem:[#allocation2 + $0x11c] sm:$0x8] }
  0x30   : > { %v857_v9 = vsel %vm6269_vm13, 0, %v856_v6  ;;  %v877_v10 = vld [vmem:[#allocation2 + $0x134] sm:$0x8]  ;;  %v872_v12 = vsel %vm6257_vm11, 0, %v871_v7  ;;  %v771_v13 = vld [vmem:[#allocation2 + $0x120] sm:$0x11] }
  0x31   : > { %858 = vst [vmem:[#allocation2 + $0xe4] sm:$0x88] %v857_v9  ;;  %v878_v11 = vsel %vm6257_vm11, 0, %v877_v10  ;;  %873 = vst [vmem:[#allocation2 + $0x11c] sm:$0x8] %v872_v12 }
  0x32   : > { %5139 = vmatpush3.bf16.msra.mxu1 %v5861_v29  ;;  %5619 = vmatpush3.bf16.msra.mxu0 %v5862_v31  ;;  %v5879_v29 = vld [vmem:[%s7470_s3 + $0xc0] sm:$0xff]   ;;  %v835_v31 = vld [vmem:[#allocation2 + $0x8c] sm:$0x8]  ;;  %879 = vst [vmem:[#allocation2 + $0x134] sm:$0x8] %v878_v11 }
  0x33   : > { %5140 = vmatprep.subr.bf16.mxu1 %v5863_v37  ;;  %5620 = vmatprep.subr.bf16.mxu0 %v5865_v42  ;;  %v836_v33 = vsel %vm6257_vm11, 0, %v835_v31  ;;  %v733_v37 = vsel %vm6234_vm4, 0, %v732_v34  ;;  %v786_v31 = vld [vmem:[#allocation2 + $0x158] sm:$0x1]  ;;  %v883_v38 = vld [vmem:[#allocation2 + $0x14c] sm:$0x8] }
  0x34   : > { %5589 = vmatmul.mubr.bf16.gmra.mxu0 %v286_v16  ;;  %5605 = vmatmul.mubr.bf16.gmra.mxu1 %v302_v18  ;;  %v841_v16 = vld [vmem:[#allocation2 + $0xa4] sm:$0x8]  ;;  %v730_v18 = vsel %vm6249_vm6, 0, %v729_v15  ;;  %837 = vst [vmem:[#allocation2 + $0x8c] sm:$0x8] %v836_v33  ;;  %v772_v15 = vsel %vm6249_vm6, 0, %v771_v13 }
  0x35   : > { %5592 = vmatprep.mubr.bf16.mxu0 %v288_v17  ;;  %5608 = vmatprep.mubr.bf16.mxu1 %v304_v19  ;;  %v736_v17 = vsel %vm6249_vm6, 0, %v735_v14  ;;  %v842_v19 = vsel %vm6257_vm11, 0, %v841_v16  ;;  %731 = vst [vmem:[#allocation2 + $0x78] sm:$0x11] %v730_v18  ;;  %734 = vst [vmem:[#allocation2 + $0x80] sm:$0x1] %v733_v37 }
  0x36   : > { %5141 = vmatpush3.bf16.msra.mxu1 %v5864_v39  ;;  %5621 = vmatpush3.bf16.msra.mxu0 %v5865_v42  ;;  %737 = vst [vmem:[#allocation2 + $0x90] sm:$0x11] %v736_v17  ;;  %843 = vst [vmem:[#allocation2 + $0xa4] sm:$0x8] %v842_v19  ;;  %v847_v39 = vld [vmem:[#allocation2 + $0xbc] sm:$0x8] }
  0x37   : > { %5142 = vmatprep.subr.bf16.mxu1 %v5866_v49  ;;  %5622 = vmatprep.subr.bf16.mxu0 %v5868_v59  ;;  %v848_v42 = vsel %vm6257_vm11, 0, %v847_v39  ;;  %v850_v49 = vld [vmem:[#allocation2 + $0xcc] sm:$0x88]  ;;  %v765_v14 = vld [vmem:[#allocation2 + $0x108] sm:$0x11]  ;;  %v787_v35 = vsel %vm6234_vm4, 0, %v786_v31 }
  0x38   : > { %849 = vst [vmem:[#allocation2 + $0xbc] sm:$0x8] %v848_v42  ;;  %v851_v51 = vsel %vm6269_vm13, 0, %v850_v49  ;;  %v766_v16 = vsel %vm6249_vm6, 0, %v765_v14  ;;  %773 = vst [vmem:[#allocation2 + $0x120] sm:$0x11] %v772_v15 }
  0x39   : > { %852 = vst [vmem:[#allocation2 + $0xcc] sm:$0x88] %v851_v51  ;;  %767 = vst [vmem:[#allocation2 + $0x108] sm:$0x11] %v766_v16  ;;  %v774_v17 = vld [vmem:[#allocation2 + $0x128] sm:$0x1] }
  0x3a   : > { %5143 = vmatpush3.bf16.msra.mxu1 %v5867_v52  ;;  %5623 = vmatpush3.bf16.msra.mxu0 %v5868_v59  ;;  %v744_v52 = vld [vmem:[#allocation2 + $0xb0] sm:$0x1]  ;;  %v753_v59 = vld [vmem:[#allocation2 + $0xd8] sm:$0x11]  ;;  %v874_v18 = vld [vmem:[#allocation2 + $0x12c] sm:$0x88] }
  0x3b   : > { %5144 = vmatprep.subr.bf16.mxu1 %v5869_v60  ;;  %5624 = vmatprep.subr.bf16.mxu0 %v5871_v0  ;;  %v745_v53 = vsel %vm6234_vm4, 0, %v744_v52  ;;  %v866_v60 = vsel %vm6257_vm11, 0, %v865_v56  ;;  %v775_v19 = vsel %vm6234_vm4, 0, %v774_v17  ;;  %v886_v33 = vld [vmem:[#allocation2 + $0x15c] sm:$0x88]  ;;  %v884_v39 = vsel %vm6257_vm11, 0, %v883_v38 }
  0x3c   : > { %5593 = vmatmul.mubr.bf16.gmra.mxu0 %v290_v20  ;;  %5609 = vmatmul.mubr.bf16.gmra.mxu1 %v306_v22  ;;  %v5875_v20 = vld [vmem:[%s7470_s3 + $0x108] sm:$0xff]   ;;  %746 = vst [vmem:[#allocation2 + $0xb0] sm:$0x1] %v745_v53  ;;  %867 = vst [vmem:[#allocation2 + $0x104] sm:$0x8] %v866_v60  ;;  %v887_v37 = vsel %vm6269_vm13, 0, %v886_v33 }
  0x3d   : > { %5596 = vmatprep.mubr.bf16.mxu0 %v292_v21  ;;  %5612 = vmatprep.mubr.bf16.mxu1 %v308_v23  ;;  %v5876_v21 = vld [vmem:[%s7470_s3 + $0xc8] sm:$0xff]   ;;  %v738_v23 = vld [vmem:[#allocation2 + $0x98] sm:$0x1]  ;;  %776 = vst [vmem:[#allocation2 + $0x128] sm:$0x1] %v775_v19 }
  0x3e   : > { %5145 = vmatpush3.bf16.msra.mxu1 %v5870_v62  ;;  %5625 = vmatpush3.bf16.msra.mxu0 %v5871_v0  ;;  %v5877_v22 = vld [vmem:[%s7470_s3 + $0x148] sm:$0xff]   ;;  %v739_v26 = vsel %vm6234_vm4, 0, %v738_v23  ;;  %v754_v62 = vsel %vm6249_vm6, 0, %v753_v59  ;;  %v862_v0 = vld [vmem:[#allocation2 + $0xfc] sm:$0x88] }
  0x3f   : > { %5146 = vmatprep.subr.bf16.mxu1 %v5872_v2  ;;  %5626 = vmatprep.subr.bf16.mxu0 %v5874_v8  ;;  %740 = vst [vmem:[#allocation2 + $0x98] sm:$0x1] %v739_v26  ;;  %755 = vst [vmem:[#allocation2 + $0xd8] sm:$0x11] %v754_v62  ;;  %v863_v2 = vsel %vm6269_vm13, 0, %v862_v0  ;;  %v6127_v62 = vmov 0  }
  0x40   : > { %864 = vst [vmem:[#allocation2 + $0xfc] sm:$0x88] %v863_v2  ;;  %v868_v23 = vld [vmem:[#allocation2 + $0x114] sm:$0x88]  ;;  %v783_v26 = vld [vmem:[#allocation2 + $0x150] sm:$0x11] }
  0x41   : > { %788 = vst [vmem:[#allocation2 + $0x158] sm:$0x1] %v787_v35  ;;  %888 = vst [vmem:[#allocation2 + $0x15c] sm:$0x88] %v887_v37  ;;  %v780_v41 = vld [vmem:[#allocation2 + $0x140] sm:$0x1] }
  0x42   : > { %5147 = vmatpush3.bf16.msra.mxu1 %v5873_v4  ;;  %5627 = vmatpush3.bf16.msra.mxu0 %v5874_v8  ;;  %v860_v4 = vsel %vm6257_vm11, 0, %v859_v3  ;;  %v757_v8 = vsel %vm6234_vm4, 0, %v756_v5  ;;  %885 = vst [vmem:[#allocation2 + $0x14c] sm:$0x8] %v884_v39  ;;  %v880_v42 = vld [vmem:[#allocation2 + $0x144] sm:$0x88] }
  0x43   : > { %5148 = vmatprep.subr.bf16.mxu1 %v5875_v20  ;;  %5628 = vmatprep.subr.bf16.mxu0 %v5877_v22  ;;  %861 = vst [vmem:[#allocation2 + $0xec] sm:$0x8] %v860_v4  ;;  %758 = vst [vmem:[#allocation2 + $0xe0] sm:$0x1] %v757_v8  ;;  %v875_v20 = vsel %vm6269_vm13, 0, %v874_v18  ;;  %v781_v44 = vsel %vm6234_vm4, 0, %v780_v41 }
  0x44   : > { %5597 = vmatmul.mubr.bf16.gmra.mxu0 %v294_v24  ;;  %5613 = vmatmul.mubr.bf16.gmra.mxu1 %v310_v25  ;;  %v838_v24 = vld [vmem:[#allocation2 + $0x9c] sm:$0x88]  ;;  %876 = vst [vmem:[#allocation2 + $0x12c] sm:$0x88] %v875_v20  ;;  %v881_v45 = vsel %vm6269_vm13, 0, %v880_v42  ;;  %688 = vst [vmem:[#allocation2] sm:$0xff] %v6127_v62 }
  0x45   : > { %v5878_v25 = vld [vmem:[%s7470_s3 + $0x100] sm:$0xff]   ;;  %v839_v28 = vsel %vm6269_vm13, 0, %v838_v24  ;;  %v869_v24 = vsel %vm6269_vm13, 0, %v868_v23  ;;  %782 = vst [vmem:[#allocation2 + $0x140] sm:$0x1] %v781_v44 }
  0x46   : > { %5149 = vmatpush3.bf16.msra.mxu1 %v5876_v21  ;;  %5629 = vmatpush3.bf16.msra.mxu0 %v5877_v22  ;;  %840 = vst [vmem:[#allocation2 + $0x9c] sm:$0x88] %v839_v28  ;;  %v768_v21 = vld [vmem:[#allocation2 + $0x110] sm:$0x1]  ;;  %870 = vst [vmem:[#allocation2 + $0x114] sm:$0x88] %v869_v24 }
  0x47   : > { %5150 = vmatprep.subr.bf16.mxu1 %v5878_v25  ;;  %5630 = vmatprep.subr.bf16.mxu0 %v5880_v30  ;;  %v769_v22 = vsel %vm6234_vm4, 0, %v768_v21  ;;  %v889_v25 = vld [vmem:[#allocation2 + $0x164] sm:$0x8]  ;;  %882 = vst [vmem:[#allocation2 + $0x144] sm:$0x88] %v881_v45 }
  0x48   : > { %770 = vst [vmem:[#allocation2 + $0x110] sm:$0x1] %v769_v22  ;;  %v890_v28 = vsel %vm6257_vm11, 0, %v889_v25  ;;  %v901_v46 = vld [vmem:[#allocation2 + $0x194] sm:$0x8] }
  0x49   : > { %891 = vst [vmem:[#allocation2 + $0x164] sm:$0x8] %v890_v28  ;;  %v895_v47 = vld [vmem:[#allocation2 + $0x17c] sm:$0x8]  ;;  %v902_v48 = vsel %vm6257_vm11, 0, %v901_v46 }
  0x4a   : > { %5151 = vmatpush3.bf16.msra.mxu1 %v5879_v29  ;;  %5631 = vmatpush3.bf16.msra.mxu0 %v5880_v30  ;;  %v784_v29 = vsel %vm6249_vm6, 0, %v783_v26  ;;  %v777_v30 = vld [vmem:[#allocation2 + $0x138] sm:$0x11]  ;;  %v896_v49 = vsel %vm6257_vm11, 0, %v895_v47  ;;  %v795_v50 = vld [vmem:[#allocation2 + $0x180] sm:$0x11] }
  0x4b   : > { %5664 = vmatprep.subr.bf16.mxu1 %v6384_v57  ;;  %785 = vst [vmem:[#allocation2 + $0x150] sm:$0x11] %v784_v29  ;;  %v778_v34 = vsel %vm6249_vm6, 0, %v777_v30  ;;  %5272 = vmatprep.subr.bf16.mxu0 %v5911_v43  ;;  %903 = vst [vmem:[#allocation2 + $0x194] sm:$0x8] %v902_v48  ;;  %v796_v51 = vsel %vm6249_vm6, 0, %v795_v50 }
  0x4c   : > { %779 = vst [vmem:[#allocation2 + $0x138] sm:$0x11] %v778_v34  ;;  %897 = vst [vmem:[#allocation2 + $0x17c] sm:$0x8] %v896_v49  ;;  %v789_v52 = vld [vmem:[#allocation2 + $0x168] sm:$0x11] }
  0x4d   : > { %797 = vst [vmem:[#allocation2 + $0x180] sm:$0x11] %v796_v51  ;;  %v790_v53 = vsel %vm6249_vm6, 0, %v789_v52  ;;  %v798_v54 = vld [vmem:[#allocation2 + $0x188] sm:$0x1]  ;;  %vm6499_vm6 = vmor %vm699_vm1, %vm984_vm2 }
  0x4e   : > { %v898_v55 = vld [vmem:[#allocation2 + $0x18c] sm:$0x88]  ;;  %791 = vst [vmem:[#allocation2 + $0x168] sm:$0x11] %v790_v53  ;;  %v799_v56 = vsel %vm6234_vm4, 0, %v798_v54 }
  0x4f   : > { %v899_v36 = vsel %vm6269_vm13, 0, %v898_v55  ;;  %800 = vst [vmem:[#allocation2 + $0x188] sm:$0x1] %v799_v56  ;;  %v792_v58 = vld [vmem:[#allocation2 + $0x170] sm:$0x1] }
  0x50   : > { %900 = vst [vmem:[#allocation2 + $0x18c] sm:$0x88] %v899_v36  ;;  %v793_v59 = vsel %vm6234_vm4, 0, %v792_v58  ;;  %v892_v60 = vld [vmem:[#allocation2 + $0x174] sm:$0x88]  ;;  %vm6477_vm4 = vmand %vm1274_vm3, %vm1275_vm14 }
  0x51   : > { %794 = vst [vmem:[#allocation2 + $0x170] sm:$0x1] %v793_v59  ;;  %v893_v32 = vsel %vm6269_vm13, 0, %v892_v60  ;;  %v6457_v61 = vld [vmem:[%s7469_s2] ss:$0 sm:$0xff] }
  0x52   : > { %894 = vst [vmem:[#allocation2 + $0x174] sm:$0x88] %v893_v32  ;;  %689 = vst [vmem:[#allocation2 + $0x8] sm:$0xf] %v6127_v62  ;;  %v1281_v31 = vld [vmem:[#allocation2 + $0x30] sm:$0xf] }
  0x53   : > { %691 = vst [vmem:[#allocation2 + $0x14] sm:$0xf] %v6127_v62  ;;  %694 = vst [vmem:[#allocation2 + $0x1a0] sm:$0xf] %v6127_v62  ;;  %v1277_v44 = vld [vmem:[#allocation2 + $0x18] sm:$0xf] }
  0x54   : > { %696 = vst [vmem:[#allocation2 + $0x1ac] sm:$0xf] %v6127_v62 }
  0xec   : > { %v5586_v63 = vpop.f32.mrf.mxu0  ;;  %v5602_v0 = vpop.f32.mrf.mxu1 }
  0xed   : > { %v522_v27 = vadd.f32 %v5586_v63, %v6457_v61  ;;  %v586_v40 = vadd.f32 %v5602_v0, %v6457_v61 }
  0xee   : > { %v513_v1 = vpop.f32.mrf.mxu0  ;;  %v577_v4 = vpop.f32.mrf.mxu1 }
  0xef   : > { %v642_v2 = vmax.f32 %v522_v27, 0.0  ;;  %v514_v3 = vadd.f32 %v6457_v61, %v513_v1  ;;  %v658_v6 = vmax.f32 %v586_v40, 0.0  ;;  %v578_v7 = vadd.f32 %v6457_v61, %v577_v4 }
  0xf0   : > { %v5587_v5 = vpop.f32.mrf.mxu0  ;;  %v5603_v11 = vpop.f32.mrf.mxu1 }
  0xf1   : > { %v5082_v8 = vpack.c.bf16 %v642_v2, %v642_v2  ;;  %v640_v9 = vmax.f32 %v514_v3, 0.0  ;;  %v525_v10 = vadd.f32 %v5587_v5, %v6457_v61  ;;  %v6464_v13 = vpack.c.bf16 %v658_v6, %v658_v6  ;;  %v1590_v5 = vld [vmem:[#allocation2 + $0x44] sm:$0xf] }
  0xf2   : > { %v516_v12 = vpop.f32.mrf.mxu0  ;;  %v656_v14 = vmax.f32 %v578_v7, 0.0  ;;  %v6467_v15 = vadd.f32 %v5603_v11, %v6457_v61 }
  0xf3   : > { %v1003_v16 = vshrl.u32 %v5082_v8, 16  ;;  %v1006_v17 = vshll.u32 %v5082_v8, 16  ;;  %1375 = vst [vmem:[#allocation2 + $0x34] sm:$0xf] %v5082_v8  ;;  %v5080_v18 = vpack.c.bf16 %v640_v9, %v640_v9  ;;  %v643_v19 = vmax.f32 %v525_v10, 0.0 }
  0xf4   : > { %v517_v20 = vadd.f32 %v6457_v61, %v516_v12  ;;  %v5590_v21 = vpop.f32.mrf.mxu0  ;;  %v1131_v22 = vshrl.u32 %v6464_v13, 16  ;;  %v1134_v23 = vshll.u32 %v6464_v13, 16  ;;  %1391 = vst [vmem:[#allocation2 + $0xf4] sm:$0xf] %v6464_v13  ;;  %v6473_v24 = vpack.c.bf16 %v656_v14, %v656_v14  ;;  %v5940_v13 = vld [vmem:[%s7470_s3 + $0x8] sm:$0xff]  }
  0xf5   : > { %v1005_v25 = vrot.slane %v1003_v16, 7  ;;  %v1417_v26 = vrot.slane %v1003_v16, 4  ;;  %v1418_v28 = vrot.slane %v1006_v17, 5  ;;  %v987_v29 = vshrl.u32 %v5080_v18, 16  ;;  %1373 = vst [vmem:[#allocation2 + $0x1c] sm:$0xf] %v5080_v18 }
  0xf6   : > { %v990_v33 = vshll.u32 %v5080_v18, 16  ;;  %v5083_v34 = vpack.c.bf16 %v643_v19, %v643_v19  ;;  %v641_v35 = vmax.f32 %v517_v20, 0.0  ;;  %v538_v37 = vadd.f32 %v5590_v21, %v6457_v61  ;;  %v529_v38 = vpop.f32.mrf.mxu0  ;;  %1389 = vst [vmem:[#allocation2 + $0xdc] sm:$0xf] %v6473_v24 }
  0xf7   : > { %v1008_v39 = vor.u32 %v1006_v17, %v1005_v25  ;;  %v1009_v41 = vrot.slane %v1005_v25, 4  ;;  %v1419_v42 = vor.u32 %v1418_v28, %v1417_v26  ;;  %v6483_v43 = vrot.slane %v987_v29, 7 }
  0xf8   : > { %v1408_v45 = vrot.slane %v987_v29, 4  ;;  %v1409_v46 = vrot.slane %v990_v33, 5  ;;  %v1011_v47 = vshrl.u32 %v5083_v34, 16  ;;  %v1014_v48 = vshll.u32 %v5083_v34, 16  ;;  %1376 = vst [vmem:[#allocation2 + $0x40] sm:$0xf] %v5083_v34  ;;  %v5591_v49 = vpop.f32.mrf.mxu0 }
  0xf9   : > { %v1282_v50 = vsel %vm6477_vm4, %v1008_v39, %v1281_v31  ;;  %v1420_v51 = vrot.slane %v1419_v42, 4  ;;  %v992_v52 = vor.u32 %v990_v33, %v6483_v43  ;;  %v993_v53 = vrot.slane %v6483_v43, 4 }
  0xfa   : > { %1283 = vst [vmem:[#allocation2 + $0x30] sm:$0xf] %v1282_v50  ;;  %v1410_v55 = vor.u32 %v1409_v46, %v1408_v45  ;;  %v1013_v56 = vrot.slane %v1011_v47, 7  ;;  %v1421_v36 = vrot.slane %v1014_v48, 5  ;;  %v1423_v58 = vrot.slane %v1011_v47, 4  ;;  %v532_v59 = vpop.f32.mrf.mxu0 }
  0xfb   : > { %v1278_v60 = vsel %vm6477_vm4, %v992_v52, %v1277_v44  ;;  %v5081_v62 = vpack.c.bf16 %v641_v35, %v641_v35  ;;  %v646_v63 = vmax.f32 %v538_v37, 0.0  ;;  %v530_v27 = vadd.f32 %v6457_v61, %v529_v38  ;;  %v1586_v35 = vld [vmem:[#allocation2 + $0x2c] sm:$0xf]  ;;  %v1289_v38 = vld [vmem:[#allocation2 + $0x60] sm:$0xf] }
  0xfc   : > { %1279 = vst [vmem:[#allocation2 + $0x18] sm:$0xf] %v1278_v60  ;;  %v1411_v0 = vrot.slane %v1410_v55, 4  ;;  %v1016_v1 = vor.u32 %v1014_v48, %v1013_v56  ;;  %v1422_v40 = vsel %vm6491_vm5, %v1420_v51, %v1421_v36  ;;  %v1424_v2 = vor.u32 %v1423_v58, %v1421_v36  ;;  %v6506_v3 = vpop.f32.mrf.mxu0  ;;  %v1285_v48 = vld [vmem:[#allocation2 + $0x48] sm:$0xf] }
  0xfd   : > { %1589 = vst [vmem:[#allocation2 + $0x38] sm:$0xf] %v1422_v40  ;;  %v995_v6 = vshrl.u32 %v5081_v62, 16  ;;  %v998_v7 = vshll.u32 %v5081_v62, 16  ;;  %1374 = vst [vmem:[#allocation2 + $0x28] sm:$0xf] %v5081_v62  ;;  %v5086_v8 = vpack.c.bf16 %v646_v63, %v646_v63  ;;  %v541_v12 = vadd.f32 %v5591_v49, %v6457_v61 }
  0xfe   : > { %v644_v9 = vmax.f32 %v530_v27, 0.0  ;;  %v1017_v10 = vsel %vm6499_vm6, %v1009_v41, %v1016_v1  ;;  %v1425_v11 = vrot.slane %v1424_v2, 4  ;;  %v533_v14 = vadd.f32 %v6457_v61, %v532_v59  ;;  %v545_v16 = vpop.f32.mrf.mxu0 }
  0xff   : > { %1284 = vst [vmem:[#allocation2 + $0x3c] sm:$0xf] %v1017_v10  ;;  %v997_v17 = vrot.slane %v995_v6, 7  ;;  %v1412_v18 = vrot.slane %v998_v7, 5  ;;  %v1414_v19 = vrot.slane %v995_v6, 4  ;;  %v1035_v20 = vshrl.u32 %v5086_v8, 16 }
 0x100   : > { %1379 = vst [vmem:[#allocation2 + $0x64] sm:$0xf] %v5086_v8  ;;  %v1591_v21 = vsel %vm6510_vm7, %v1425_v11, %v1590_v5  ;;  %v1038_v25 = vshll.u32 %v5086_v8, 16  ;;  %v5084_v26 = vpack.c.bf16 %v644_v9, %v644_v9  ;;  %v647_v28 = vmax.f32 %v541_v12, 0.0  ;;  %v5595_v29 = vpop.f32.mrf.mxu0 }
 0x101   : > { %1592 = vst [vmem:[#allocation2 + $0x44] sm:$0xf] %v1591_v21  ;;  %v1000_v31 = vor.u32 %v998_v7, %v997_v17  ;;  %v1413_v33 = vsel %vm6491_vm5, %v1411_v0, %v1412_v18  ;;  %v1415_v34 = vor.u32 %v1414_v19, %v1412_v18  ;;  %v6522_v37 = vrot.slane %v1035_v20, 7 }
 0x102   : > { %1584 = vst [vmem:[#allocation2 + $0x20] sm:$0xf] %v1413_v33  ;;  %v1435_v39 = vrot.slane %v1035_v20, 4  ;;  %v1436_v41 = vrot.slane %v1038_v25, 5  ;;  %v1019_v42 = vshrl.u32 %v5084_v26, 16  ;;  %v1022_v43 = vshll.u32 %v5084_v26, 16  ;;  %v6530_v55 = vpop.f32.mrf.mxu0 }
 0x103   : > { %1377 = vst [vmem:[#allocation2 + $0x4c] sm:$0xf] %v5084_v26  ;;  %v1001_v44 = vsel %vm6499_vm6, %v993_v53, %v1000_v31  ;;  %v1416_v45 = vrot.slane %v1415_v34, 4  ;;  %v1040_v46 = vor.u32 %v1038_v25, %v6522_v37  ;;  %v1041_v47 = vrot.slane %v6522_v37, 4  ;;  %v6549_v20 = vld [vmem:[%s7470_s3 + $0xb0] sm:$0xff]  }
 0x104   : > { %1280 = vst [vmem:[#allocation2 + $0x24] sm:$0xf] %v1001_v44  ;;  %v1437_v49 = vor.u32 %v1436_v41, %v1435_v39  ;;  %v6528_v50 = vrot.slane %v1019_v42, 7  ;;  %v1426_v51 = vrot.slane %v1019_v42, 4  ;;  %v1427_v52 = vrot.slane %v1022_v43, 5  ;;  %v6544_v8 = vpop.f32.mrf.mxu0  ;;  %v5912_v39 = vld [vmem:[%s7470_s3 + $0x38] sm:$0xff]  }
 0x105   : > { %v1587_v56 = vsel %vm6510_vm7, %v1416_v45, %v1586_v35  ;;  %v1290_v53 = vsel %vm6477_vm4, %v1040_v46, %v1289_v38  ;;  %v5087_v36 = vpack.c.bf16 %v647_v28, %v647_v28  ;;  %v645_v58 = vmax.f32 %v533_v14, 0.0  ;;  %v1598_v14 = vld [vmem:[#allocation2 + $0x74] sm:$0xf]  ;;  %v1594_v44 = vld [vmem:[#allocation2 + $0x5c] sm:$0xf] }
 0x106   : > { %1588 = vst [vmem:[#allocation2 + $0x2c] sm:$0xf] %v1587_v56  ;;  %1291 = vst [vmem:[#allocation2 + $0x60] sm:$0xf] %v1290_v53  ;;  %v1438_v59 = vrot.slane %v1437_v49, 4  ;;  %v1024_v60 = vor.u32 %v1022_v43, %v6528_v50  ;;  %v1025_v62 = vrot.slane %v6528_v50, 4  ;;  %v1428_v63 = vor.u32 %v1427_v52, %v1426_v51  ;;  %v6553_v37 = vpop.f32.mrf.mxu0 }
 0x107   : > { %v1043_v27 = vshrl.u32 %v5087_v36, 16  ;;  %v1046_v0 = vshll.u32 %v5087_v36, 16  ;;  %1380 = vst [vmem:[#allocation2 + $0x70] sm:$0xf] %v5087_v36  ;;  %v5085_v1 = vpack.c.bf16 %v645_v58, %v645_v58  ;;  %v554_v40 = vadd.f32 %v6506_v3, %v6457_v61  ;;  %v5885_v38 = vld [vmem:[#allocation2 + $0x34] ss:$12 sps:$4 sm:$0xff]  }
 0x108   : > { %v1286_v2 = vsel %vm6477_vm4, %v1024_v60, %v1285_v48  ;;  %v1429_v5 = vrot.slane %v1428_v63, 4  ;;  %v546_v6 = vadd.f32 %v6457_v61, %v545_v16  ;;  %v557_v7 = vadd.f32 %v5595_v29, %v6457_v61  ;;  %v5883_v29 = vld [vmem:[#allocation2 + $0x1c] ss:$12 sps:$4 sm:$0xff]   ;;  %v5913_v52 = vld [vmem:[%s7470_s3 + $0x70] sm:$0xff]   ;;  %v5888_v60 = vld [vmem:[#allocation2 + $0x38] ss:$12 sps:$4 sm:$0xff]  }
 0x109   : > { %1287 = vst [vmem:[#allocation2 + $0x48] sm:$0xf] %v1286_v2  ;;  %v1045_v9 = vrot.slane %v1043_v27, 7  ;;  %v1439_v10 = vrot.slane %v1046_v0, 5  ;;  %v1441_v11 = vrot.slane %v1043_v27, 4  ;;  %v1027_v12 = vshrl.u32 %v5085_v1, 16  ;;  %2306 = vmatprep.mubr.bf16.mxu1 %v5883_v29  ;;  %v5599_v2 = vpop.f32.mrf.mxu0 }
 0x10a   : > { %1378 = vst [vmem:[#allocation2 + $0x58] sm:$0xf] %v5085_v1  ;;  %v1030_v17 = vshll.u32 %v5085_v1, 16  ;;  %v650_v18 = vmax.f32 %v554_v40, 0.0  ;;  %v648_v3 = vmax.f32 %v546_v6, 0.0  ;;  %v651_v19 = vmax.f32 %v557_v7, 0.0 }
 0x10b   : > { %v1048_v16 = vor.u32 %v1046_v0, %v1045_v9  ;;  %v1440_v21 = vsel %vm6491_vm5, %v1438_v59, %v1439_v10  ;;  %v1442_v25 = vor.u32 %v1441_v11, %v1439_v10  ;;  %v1029_v26 = vrot.slane %v1027_v12, 7  ;;  %v5881_v28 = vld [vmem:[#allocation2 + $0x18] ss:$12 sps:$4 sm:$0xff]   ;;  %v1297_v36 = vld [vmem:[#allocation2 + $0x90] sm:$0xf] }
 0x10c   : > { %1597 = vst [vmem:[#allocation2 + $0x68] sm:$0xf] %v1440_v21  ;;  %v1430_v31 = vrot.slane %v1030_v17, 5  ;;  %v1432_v33 = vrot.slane %v1027_v12, 4  ;;  %v5090_v34 = vpack.c.bf16 %v650_v18, %v650_v18  ;;  %v5088_v35 = vpack.c.bf16 %v648_v3, %v648_v3  ;;  %2307 = vmatmul.mubr.bf16.vlgmr.msra.gmra.mxu1 %v5881_v28  ;;  %v1293_v40 = vld [vmem:[#allocation2 + $0x78] sm:$0xf]  ;;  %v564_v28 = vpop.f32.mrf.mxu0 }
 0x10d   : > { %v1049_v41 = vsel %vm6499_vm6, %v1041_v47, %v1048_v16  ;;  %v1443_v42 = vrot.slane %v1442_v25, 4  ;;  %v1032_v43 = vor.u32 %v1030_v17, %v1029_v26  ;;  %v6560_v45 = vpack.c.bf16 %v651_v19, %v651_v19  ;;  %v5887_v46 = vld [vmem:[#allocation2 + $0x20] ss:$12 sps:$4 sm:$0xff]   ;;  %5665 = vmatpush3.bf16.msra.mxu1 %v6384_v57  ;;  %2314 = vmatprep.mubr.bf16.mxu1 %v5885_v38  ;;  %v5889_v29 = vld [vmem:[#allocation2 + $0x30] ss:$12 sps:$4 sm:$0xff]  }
 0x10e   : > { %1292 = vst [vmem:[#allocation2 + $0x6c] sm:$0xf] %v1049_v41  ;;  %v1431_v48 = vsel %vm6491_vm5, %v1429_v5, %v1430_v31  ;;  %v1433_v49 = vor.u32 %v1432_v33, %v1430_v31  ;;  %v1067_v50 = vshrl.u32 %v5090_v34, 16  ;;  %v1070_v51 = vshll.u32 %v5090_v34, 16  ;;  %1383 = vst [vmem:[#allocation2 + $0x94] sm:$0xf] %v5090_v34  ;;  %5632 = vmatprep.mubr.bf16.mxu0 %v5887_v46 }
 0x10f   : > { %1381 = vst [vmem:[#allocation2 + $0x7c] sm:$0xf] %v5088_v35  ;;  %v6567_v47 = vld [vmem:[%s7470_s3 + $0xa8] sm:$0xff]   ;;  %v1599_v56 = vsel %vm6510_vm7, %v1443_v42, %v1598_v14  ;;  %v1033_v53 = vsel %vm6499_vm6, %v1025_v62, %v1032_v43  ;;  %1593 = vst [vmem:[#allocation2 + $0x50] sm:$0xf] %v1431_v48  ;;  %v1051_v58 = vshrl.u32 %v5088_v35, 16  ;;  %5666 = vmatprep.subr.bf16.mxu1 %v6549_v20  ;;  %5633 = vmatmul.mubr.bf16.vlgmr.msra.gmra.mxu0 %v5888_v60 }
 0x110   : > { %v1054_v59 = vshll.u32 %v5088_v35, 16  ;;  %1384 = vst [vmem:[#allocation2 + $0xa0] sm:$0xf] %v6560_v45  ;;  %1600 = vst [vmem:[#allocation2 + $0x74] sm:$0xf] %v1599_v56  ;;  %v1434_v63 = vrot.slane %v1433_v49, 4  ;;  %5273 = vmatpush3.bf16.msra.mxu0 %v5912_v39  ;;  %v549_v34 = vadd.f32 %v6457_v61, %v6530_v55  ;;  %v570_v35 = vadd.f32 %v6544_v8, %v6457_v61  ;;  %v6629_v56 = vpop.f32.mrf.mxu1 }
 0x111   : > { %1288 = vst [vmem:[#allocation2 + $0x54] sm:$0xf] %v1033_v53  ;;  %v1069_v27 = vrot.slane %v1067_v50, 7  ;;  %v1453_v0 = vrot.slane %v1067_v50, 4  ;;  %v1454_v1 = vrot.slane %v1070_v51, 5  ;;  %v5914_v62 = vld [vmem:[%s7470_s3 + $0x30] sm:$0xff]   ;;  %5667 = vmatpush3.bf16.msra.mxu1 %v6549_v20  ;;  %5274 = vmatprep.subr.bf16.mxu0 %v5913_v52  ;;  %v562_v43 = vadd.f32 %v6457_v61, %v6553_v37 }
 0x112   : > { %v6582_v5 = vrot.slane %v1051_v58, 7  ;;  %v1444_v57 = vrot.slane %v1051_v58, 4  ;;  %v1445_v6 = vrot.slane %v1054_v59, 5  ;;  %v1075_v7 = vshrl.u32 %v6560_v45, 16  ;;  %v5920_v14 = vld [vmem:[%s7470_s3 + $0x68] sm:$0xff]   ;;  %5668 = vmatprep.subr.bf16.mxu1 %v6567_v47  ;;  %v5924_v31 = vld [vmem:[%s7470_s3 + $0xa0] sm:$0xff]  }
 0x113   : > { %v1595_v9 = vsel %vm6510_vm7, %v1434_v63, %v1594_v44  ;;  %v1072_v10 = vor.u32 %v1070_v51, %v1069_v27  ;;  %v1073_v11 = vrot.slane %v1069_v27, 4  ;;  %v1455_v12 = vor.u32 %v1454_v1, %v1453_v0  ;;  %v5921_v38 = vld [vmem:[%s7470_s3 + $0x28] sm:$0xff]   ;;  %v5922_v39 = vld [vmem:[%s7470_s3 + $0x60] sm:$0xff]  }
 0x114   : > { %1596 = vst [vmem:[#allocation2 + $0x5c] sm:$0xf] %v1595_v9  ;;  %v1056_v17 = vor.u32 %v1054_v59, %v6582_v5  ;;  %v1057_v18 = vrot.slane %v6582_v5, 4  ;;  %v1446_v3 = vor.u32 %v1445_v6, %v1444_v57  ;;  %v1077_v19 = vrot.slane %v1075_v7, 7  ;;  %2315 = vmatmul.mubr.bf16.gmra.mxu1 %v5889_v29  ;;  %5275 = vmatpush3.bf16.msra.mxu0 %v5914_v62  ;;  %v1606_v55 = vld [vmem:[#allocation2 + $0xa4] sm:$0xf] }
 0x115   : > { %v1298_v16 = vsel %vm6477_vm4, %v1072_v10, %v1297_v36  ;;  %v1456_v21 = vrot.slane %v1455_v12, 4  ;;  %v1078_v25 = vshll.u32 %v6560_v45, 16  ;;  %v1459_v26 = vrot.slane %v1075_v7, 4  ;;  %v5890_v49 = vld [vmem:[#allocation2 + $0x4c] ss:$12 sps:$4 sm:$0xff]   ;;  %5669 = vmatpush3.bf16.msra.mxu1 %v6567_v47  ;;  %5276 = vmatprep.subr.bf16.mxu0 %v5920_v14  ;;  %v5923_v53 = vld [vmem:[%s7470_s3 + $0x20] sm:$0xff]  }
 0x116   : > { %1299 = vst [vmem:[#allocation2 + $0x90] sm:$0xf] %v1298_v16  ;;  %v1294_v20 = vsel %vm6477_vm4, %v1056_v17, %v1293_v40  ;;  %v6602_v33 = vrot.slane %v1446_v3, 4  ;;  %v573_v44 = vadd.f32 %v5599_v2, %v6457_v61  ;;  %v649_v8 = vmax.f32 %v549_v34, 0.0  ;;  %5670 = vmatprep.subr.bf16.mxu1 %v5924_v31  ;;  %v6637_v47 = vld [vmem:[%s7470_s3 + $0x98] sm:$0xff]   ;;  %2322 = vmatprep.mubr.bf16.mxu1 %v5890_v49  ;;  %v6652_v12 = vld [vmem:[%s7470_s3 + $0x90] sm:$0xff]  }
 0x117   : > { %1295 = vst [vmem:[#allocation2 + $0x78] sm:$0xf] %v1294_v20  ;;  %v1080_v41 = vor.u32 %v1078_v25, %v1077_v19  ;;  %v1457_v42 = vrot.slane %v1078_v25, 5  ;;  %v654_v45 = vmax.f32 %v570_v35, 0.0  ;;  %v6618_v46 = vadd.f32 %v6457_v61, %v564_v28  ;;  %v5893_v63 = vld [vmem:[#allocation2 + $0x68] ss:$12 sps:$4 sm:$0xff]  }
 0x118   : > { %v6622_v48 = vrot.slane %v1131_v22, 7  ;;  %v652_v52 = vmax.f32 %v562_v43, 0.0  ;;  %v5089_v36 = vpack.c.bf16 %v649_v8, %v649_v8  ;;  %v655_v59 = vmax.f32 %v573_v44, 0.0  ;;  %5277 = vmatpush3.bf16.msra.mxu0 %v5921_v38  ;;  %v5930_v62 = vld [vmem:[%s7470_s3 + $0x58] sm:$0xff]   ;;  %v5895_v10 = vld [vmem:[#allocation2 + $0x48] ss:$12 sps:$4 sm:$0xff]  }
 0x119   : > { %v1081_v37 = vsel %vm6499_vm6, %v1073_v11, %v1080_v41  ;;  %v1458_v50 = vsel %vm6491_vm5, %v1456_v21, %v1457_v42  ;;  %v1460_v51 = vor.u32 %v1459_v26, %v1457_v42  ;;  %v5094_v58 = vpack.c.bf16 %v654_v45, %v654_v45  ;;  %v5896_v11 = vld [vmem:[#allocation2 + $0x64] ss:$12 sps:$4 sm:$0xff]   ;;  %5278 = vmatprep.subr.bf16.mxu0 %v5922_v39  ;;  %v1305_v17 = vld [vmem:[#allocation2 + $0xc0] sm:$0xf]  ;;  %v6658_v21 = vpop.f32.mrf.mxu1  ;;  %v5931_v39 = vld [vmem:[%s7470_s3 + $0x18] sm:$0xff]  }
 0x11a   : > { %1300 = vst [vmem:[#allocation2 + $0x9c] sm:$0xf] %v1081_v37  ;;  %1605 = vst [vmem:[#allocation2 + $0x98] sm:$0xf] %v1458_v50  ;;  %v653_v60 = vmax.f32 %v6618_v46, 0.0  ;;  %v5092_v0 = vpack.c.bf16 %v652_v52, %v652_v52  ;;  %v6643_v1 = vor.u32 %v1134_v23, %v6622_v48  ;;  %v1137_v40 = vrot.slane %v6622_v48, 4  ;;  %5671 = vmatpush3.bf16.msra.mxu1 %v5924_v31 }
 0x11b   : > { %v1461_v27 = vrot.slane %v1460_v51, 4  ;;  %v5892_v2 = vld [vmem:[#allocation2 + $0x50] ss:$12 sps:$4 sm:$0xff]   ;;  %v1059_v57 = vshrl.u32 %v5089_v36, 16  ;;  %v1062_v6 = vshll.u32 %v5089_v36, 16  ;;  %v1099_v7 = vshrl.u32 %v5094_v58, 16  ;;  %5672 = vmatprep.subr.bf16.mxu1 %v6637_v47  ;;  %v6679_v52 = vpop.f32.mrf.mxu1 }
 0x11c   : > { %1382 = vst [vmem:[#allocation2 + $0x88] sm:$0xf] %v5089_v36  ;;  %v1102_v9 = vshll.u32 %v5094_v58, 16  ;;  %1387 = vst [vmem:[#allocation2 + $0xc4] sm:$0xf] %v5094_v58  ;;  %v1083_v3 = vshrl.u32 %v5092_v0, 16  ;;  %v6656_v16 = vpack.c.bf16 %v655_v59, %v655_v59  ;;  %5636 = vmatprep.mubr.bf16.mxu0 %v5892_v2  ;;  %2323 = vmatmul.mubr.bf16.gmra.mxu1 %v5895_v10 }
 0x11d   : > { %v1607_v14 = vsel %vm6510_vm7, %v1461_v27, %v1606_v55  ;;  %v1086_v19 = vshll.u32 %v5092_v0, 16  ;;  %1385 = vst [vmem:[#allocation2 + $0xac] sm:$0xf] %v5092_v0  ;;  %v1061_v25 = vrot.slane %v1059_v57, 7  ;;  %v1448_v26 = vrot.slane %v1062_v6, 5  ;;  %5637 = vmatmul.mubr.bf16.gmra.mxu0 %v5893_v63  ;;  %2330 = vmatprep.mubr.bf16.mxu1 %v5896_v11  ;;  %v5932_v45 = vld [vmem:[%s7470_s3 + $0x50] sm:$0xff]  }
 0x11e   : > { %1608 = vst [vmem:[#allocation2 + $0xa4] sm:$0xf] %v1607_v14  ;;  %v1450_v28 = vrot.slane %v1059_v57, 4  ;;  %v6661_v29 = vrot.slane %v1099_v7, 7  ;;  %v1602_v31 = vld [vmem:[#allocation2 + $0x8c] sm:$0xf]  ;;  %5279 = vmatpush3.bf16.msra.mxu0 %v5923_v53  ;;  %5673 = vmatpush3.bf16.msra.mxu1 %v6637_v47  ;;  %v5093_v57 = vpack.c.bf16 %v653_v60, %v653_v60 }
 0x11f   : > { %v1471_v20 = vrot.slane %v1099_v7, 4  ;;  %v1472_v34 = vrot.slane %v1102_v9, 5  ;;  %v6663_v35 = vrot.slane %v1083_v3, 7  ;;  %v1462_v38 = vrot.slane %v1083_v3, 4  ;;  %1388 = vst [vmem:[#allocation2 + $0xd0] sm:$0xf] %v6656_v16  ;;  %5280 = vmatprep.subr.bf16.mxu0 %v5930_v62  ;;  %5674 = vmatprep.subr.bf16.mxu1 %v6652_v12 }
 0x120   : > { %v1064_v41 = vor.u32 %v1062_v6, %v1061_v25  ;;  %v1449_v42 = vsel %vm6491_vm5, %v6602_v33, %v1448_v26  ;;  %v1451_v43 = vor.u32 %v1450_v28, %v1448_v26  ;;  %v1104_v44 = vor.u32 %v1102_v9, %v6661_v29  ;;  %v1301_v55 = vld [vmem:[#allocation2 + $0xa8] sm:$0xf]  ;;  %v1313_v8 = vld [vmem:[#allocation2 + $0xf0] sm:$0xf]  ;;  %v5900_v7 = vld [vmem:[#allocation2 + $0x60] ss:$12 sps:$4 sm:$0xff]  }
 0x121   : > { %1601 = vst [vmem:[#allocation2 + $0x80] sm:$0xf] %v1449_v42  ;;  %v1105_v49 = vrot.slane %v6661_v29, 4  ;;  %v1473_v37 = vor.u32 %v1472_v34, %v1471_v20  ;;  %v1088_v50 = vor.u32 %v1086_v19, %v6663_v35  ;;  %v1089_v51 = vrot.slane %v6663_v35, 4  ;;  %v5933_v59 = vld [vmem:[%s7470_s3 + $0x10] sm:$0xff]   ;;  %v5963_v47 = vld [vmem:[%s7470_s3 + $0x88] sm:$0xff]  }
 0x122   : > { %v1065_v33 = vsel %vm6499_vm6, %v1057_v18, %v1064_v41  ;;  %v1452_v53 = vrot.slane %v1451_v43, 4  ;;  %v1306_v36 = vsel %vm6477_vm4, %v1104_v44, %v1305_v17  ;;  %v1463_v58 = vrot.slane %v1086_v19, 5  ;;  %5281 = vmatpush3.bf16.msra.mxu0 %v5931_v39  ;;  %v5939_v0 = vld [vmem:[%s7470_s3 + $0x48] sm:$0xff]   ;;  %v6712_v17 = vpop.f32.mrf.mxu1  ;;  %5675 = vmatpush3.bf16.msra.mxu1 %v6652_v12  ;;  %1386 = vst [vmem:[#allocation2 + $0xb8] sm:$0xf] %v5093_v57  ;;  %v5970_v19 = vld [vmem:[%s7470_s3 + $0x80] sm:$0xff]  }
 0x123   : > { %1296 = vst [vmem:[#allocation2 + $0x84] sm:$0xf] %v1065_v33  ;;  %1307 = vst [vmem:[#allocation2 + $0xc0] sm:$0xf] %v1306_v36  ;;  %v1474_v5 = vrot.slane %v1473_v37, 4  ;;  %v1302_v18 = vsel %vm6477_vm4, %v1088_v50, %v1301_v55  ;;  %v1107_v63 = vshrl.u32 %v6656_v16, 16  ;;  %v1314_v6 = vsel %vm6477_vm4, %v6643_v1, %v1313_v8  ;;  %5282 = vmatprep.subr.bf16.mxu0 %v5932_v45 }
 0x124   : > { %v1110_v27 = vshll.u32 %v6656_v16, 16  ;;  %v1603_v2 = vsel %vm6510_vm7, %v1452_v53, %v1602_v31  ;;  %1303 = vst [vmem:[#allocation2 + $0xa8] sm:$0xf] %v1302_v18  ;;  %v1464_v62 = vor.u32 %v1463_v58, %v1462_v38  ;;  %1315 = vst [vmem:[#allocation2 + $0xf0] sm:$0xf] %v1314_v6  ;;  %v1489_v14 = vrot.slane %v1131_v22, 4  ;;  %5676 = vmatprep.subr.bf16.mxu1 %v5963_v47  ;;  %v596_v44 = vpop.f32.mrf.mxu1 }
 0x125   : > { %1604 = vst [vmem:[#allocation2 + $0x8c] sm:$0xf] %v1603_v2  ;;  %v1109_v9 = vrot.slane %v1107_v63, 7  ;;  %v1477_v11 = vrot.slane %v1107_v63, 4  ;;  %v1091_v60 = vshrl.u32 %v5093_v57, 16  ;;  %v1094_v3 = vshll.u32 %v5093_v57, 16  ;;  %2331 = vmatmul.mubr.bf16.gmra.mxu1 %v5900_v7 }
 0x126   : > { %v1475_v10 = vrot.slane %v1110_v27, 5  ;;  %v1465_v46 = vrot.slane %v1464_v62, 4  ;;  %v1490_v1 = vrot.slane %v1134_v23, 5  ;;  %v1614_v26 = vld [vmem:[#allocation2 + $0xd4] sm:$0xf]  ;;  %v1115_v12 = vshrl.u32 %v6473_v24, 16  ;;  %5283 = vmatpush3.bf16.msra.mxu0 %v5933_v59  ;;  %5677 = vmatpush3.bf16.msra.mxu1 %v5963_v47 }
 0x127   : > { %v1112_v16 = vor.u32 %v1110_v27, %v1109_v9  ;;  %v1093_v23 = vrot.slane %v1091_v60, 7  ;;  %v1466_v28 = vrot.slane %v1094_v3, 5  ;;  %v1468_v29 = vrot.slane %v1091_v60, 4  ;;  %v1309_v20 = vld [vmem:[#allocation2 + $0xd8] sm:$0xf]  ;;  %5284 = vmatprep.subr.bf16.mxu0 %v5939_v0  ;;  %v5941_v34 = vld [vmem:[%s7470_s3 + $0x40] sm:$0xff]   ;;  %5678 = vmatprep.subr.bf16.mxu1 %v5970_v19  ;;  %v6761_v0 = vpop.f32.mrf.mxu1 }
 0x128   : > { %v1476_v22 = vsel %vm6491_vm5, %v1474_v5, %v1475_v10  ;;  %v1478_v25 = vor.u32 %v1477_v11, %v1475_v10  ;;  %v1491_v31 = vor.u32 %v1490_v1, %v1489_v14  ;;  %v1610_v41 = vld [vmem:[#allocation2 + $0xbc] sm:$0xf]  ;;  %v6731_v42 = vrot.slane %v1115_v12, 7  ;;  %v5899_v50 = vld [vmem:[#allocation2 + $0x98] ss:$12 sps:$4 sm:$0xff]  }
 0x129   : > { %1613 = vst [vmem:[#allocation2 + $0xc8] sm:$0xf] %v1476_v22  ;;  %v1113_v38 = vsel %vm6499_vm6, %v1105_v49, %v1112_v16  ;;  %v1118_v43 = vshll.u32 %v6473_v24, 16  ;;  %v1096_v55 = vor.u32 %v1094_v3, %v1093_v23  ;;  %v1467_v8 = vsel %vm6491_vm5, %v1465_v46, %v1466_v28  ;;  %v6738_v33 = vld [vmem:[#allocation2 + $0x7c] ss:$12 sps:$4 sm:$0xff]   ;;  %v5942_v58 = vld [vmem:[%s7470_s3] sm:$0xff]  }
 0x12a   : > { %v1479_v39 = vrot.slane %v1478_v25, 4  ;;  %1308 = vst [vmem:[#allocation2 + $0xcc] sm:$0xf] %v1113_v38  ;;  %v1469_v45 = vor.u32 %v1468_v29, %v1466_v28  ;;  %v6736_v37 = vrot.slane %v1491_v31, 4  ;;  %1609 = vst [vmem:[#allocation2 + $0xb0] sm:$0xf] %v1467_v8  ;;  %5285 = vmatpush3.bf16.msra.mxu0 %v5940_v13  ;;  %2338 = vmatprep.mubr.bf16.mxu1 %v6738_v33  ;;  %v6787_v25 = vpop.f32.mrf.mxu1 }
 0x12b   : > { %v1120_v24 = vor.u32 %v1118_v43, %v6731_v42  ;;  %v1121_v53 = vrot.slane %v6731_v42, 4  ;;  %v1480_v36 = vrot.slane %v1115_v12, 4  ;;  %v1097_v59 = vsel %vm6499_vm6, %v1089_v51, %v1096_v55  ;;  %5286 = vmatprep.subr.bf16.mxu0 %v5941_v34  ;;  %5679 = vmatpush3.bf16.msra.mxu1 %v5970_v19  ;;  %v5976_v62 = vld [vmem:[%s7470_s3 + $0x1f8] sm:$0xff]   ;;  %v1622_v23 = vld [vmem:[#allocation2 + $0x104] sm:$0xf] }
 0x12c   : > { %v1615_v49 = vsel %vm6510_vm7, %v1479_v39, %v1614_v26  ;;  %v1470_v47 = vrot.slane %v1469_v45, 4  ;;  %v1481_v5 = vrot.slane %v1118_v43, 5  ;;  %v659_v18 = vmax.f32 %v6467_v15, 0.0  ;;  %1304 = vst [vmem:[#allocation2 + $0xb4] sm:$0xf] %v1097_v59  ;;  %v6777_v7 = vld [vmem:[%s7470_s3 + $0x238] sm:$0xff]   ;;  %5408 = vmatprep.subr.bf16.mxu1 %v5976_v62 }
 0x12d   : > { %1616 = vst [vmem:[#allocation2 + $0xd4] sm:$0xf] %v1615_v49  ;;  %v1310_v63 = vsel %vm6477_vm4, %v1120_v24, %v1309_v20  ;;  %v581_v27 = vadd.f32 %v6457_v61, %v6629_v56  ;;  %v602_v35 = vadd.f32 %v6658_v21, %v6457_v61  ;;  %v594_v51 = vadd.f32 %v6457_v61, %v6679_v52  ;;  %v5898_v2 = vld [vmem:[#allocation2 + $0x80] ss:$12 sps:$4 sm:$0xff]   ;;  %v6763_v15 = vld [vmem:[#allocation2 + $0x78] ss:$12 sps:$4 sm:$0xff]   ;;  %v6802_v24 = vpop.f32.mrf.mxu1 }
 0x12e   : > { %v1611_v57 = vsel %vm6510_vm7, %v1470_v47, %v1610_v41  ;;  %1311 = vst [vmem:[#allocation2 + $0xd8] sm:$0xf] %v1310_v63  ;;  %v1482_v56 = vor.u32 %v1481_v5, %v1480_v36  ;;  %v5099_v6 = vpack.c.bf16 %v659_v18, %v659_v18  ;;  %v605_v21 = vadd.f32 %v6712_v17, %v6457_v61  ;;  %v6772_v52 = vld [vmem:[#allocation2 + $0x94] ss:$12 sps:$4 sm:$0xff]   ;;  %v6798_v55 = vld [vmem:[#allocation2 + $0x90] ss:$12 sps:$4 sm:$0xff]  }
 0x12f   : > { %1612 = vst [vmem:[#allocation2 + $0xbc] sm:$0xf] %v1611_v57  ;;  %v657_v9 = vmax.f32 %v581_v27, 0.0  ;;  %v662_v10 = vmax.f32 %v602_v35, 0.0  ;;  %v660_v11 = vmax.f32 %v594_v51, 0.0  ;;  %v6780_v14 = vadd.f32 %v6457_v61, %v596_v44  ;;  %5640 = vmatprep.mubr.bf16.mxu0 %v5898_v2  ;;  %2339 = vmatmul.mubr.bf16.gmra.mxu1 %v6763_v15 }
 0x130   : > { %v1483_v46 = vrot.slane %v1482_v56, 4  ;;  %v1139_v60 = vshrl.u32 %v5099_v6, 16  ;;  %v1142_v17 = vshll.u32 %v5099_v6, 16  ;;  %1392 = vst [vmem:[#allocation2 + $0x100] sm:$0xf] %v5099_v6  ;;  %v663_v3 = vmax.f32 %v605_v21, 0.0  ;;  %5641 = vmatmul.mubr.bf16.gmra.mxu0 %v5899_v50  ;;  %2346 = vmatprep.mubr.bf16.mxu1 %v6772_v52 }
 0x131   : > { %v5097_v1 = vpack.c.bf16 %v657_v9, %v657_v9  ;;  %v5102_v19 = vpack.c.bf16 %v662_v10, %v662_v10  ;;  %v6784_v16 = vpack.c.bf16 %v660_v11, %v660_v11  ;;  %v661_v22 = vmax.f32 %v6780_v14, 0.0  ;;  %5287 = vmatpush3.bf16.msra.mxu0 %v5942_v58  ;;  %v1321_v41 = vld [vmem:[#allocation2 + $0x120] sm:$0xf]  ;;  %v6804_v36 = vld [vmem:[#allocation2 + $0xac] ss:$12 sps:$4 sm:$0xff]   ;;  %v612_v10 = vpop.f32.mrf.mxu1 }
 0x132   : > { %v1141_v61 = vrot.slane %v1139_v60, 7  ;;  %v1493_v26 = vrot.slane %v1142_v17, 5  ;;  %v1495_v12 = vrot.slane %v1139_v60, 4  ;;  %v6789_v13 = vpack.c.bf16 %v663_v3, %v663_v3  ;;  %5712 = vmatprep.subr.bf16.mxu0 %v6777_v7  ;;  %v1618_v27 = vld [vmem:[#allocation2 + $0xec] sm:$0xf] }
 0x133   : > { %v1123_v28 = vshrl.u32 %v5097_v1, 16  ;;  %v1126_v29 = vshll.u32 %v5097_v1, 16  ;;  %1390 = vst [vmem:[#allocation2 + $0xe8] sm:$0xf] %v5097_v1  ;;  %v1163_v31 = vshrl.u32 %v5102_v19, 16  ;;  %v1166_v20 = vshll.u32 %v5102_v19, 16 }
 0x134   : > { %1395 = vst [vmem:[#allocation2 + $0x124] sm:$0xf] %v5102_v19  ;;  %1393 = vst [vmem:[#allocation2 + $0x10c] sm:$0xf] %v6784_v16  ;;  %v1144_v34 = vor.u32 %v1142_v17, %v1141_v61  ;;  %v1494_v38 = vsel %vm6491_vm5, %v6736_v37, %v1493_v26  ;;  %v1496_v39 = vor.u32 %v1495_v12, %v1493_v26  ;;  %v1147_v43 = vshrl.u32 %v6784_v16, 16 }
 0x135   : > { %1396 = vst [vmem:[#allocation2 + $0x130] sm:$0xf] %v6789_v13  ;;  %v5904_v44 = vld [vmem:[#allocation2 + $0xc8] ss:$12 sps:$4 sm:$0xff]   ;;  %1621 = vst [vmem:[#allocation2 + $0xf8] sm:$0xf] %v1494_v38  ;;  %v5101_v61 = vpack.c.bf16 %v661_v22, %v661_v22 }
 0x136   : > { %v1125_v8 = vrot.slane %v1123_v28, 7  ;;  %v1484_v45 = vrot.slane %v1126_v29, 5  ;;  %v1486_v50 = vrot.slane %v1123_v28, 4  ;;  %v6800_v49 = vrot.slane %v1163_v31, 7  ;;  %v5903_v51 = vld [vmem:[#allocation2 + $0xb0] ss:$12 sps:$4 sm:$0xff]  }
 0x137   : > { %v1145_v37 = vsel %vm6499_vm6, %v1137_v40, %v1144_v34  ;;  %v1497_v58 = vrot.slane %v1496_v39, 4  ;;  %v1507_v59 = vrot.slane %v1163_v31, 4  ;;  %v1508_v47 = vrot.slane %v1166_v20, 5  ;;  %2347 = vmatmul.mubr.bf16.gmra.mxu1 %v6798_v55  ;;  %v1317_v9 = vld [vmem:[#allocation2 + $0x108] sm:$0xf]  ;;  %5644 = vmatprep.mubr.bf16.mxu0 %v5903_v51  ;;  %v6847_v31 = vpop.f32.mrf.mxu1 }
 0x138   : > { %1316 = vst [vmem:[#allocation2 + $0xfc] sm:$0xf] %v1145_v37  ;;  %v1128_v5 = vor.u32 %v1126_v29, %v1125_v8  ;;  %v1485_v18 = vsel %vm6491_vm5, %v1483_v46, %v1484_v45  ;;  %v1487_v63 = vor.u32 %v1486_v50, %v1484_v45  ;;  %v1168_v35 = vor.u32 %v1166_v20, %v6800_v49  ;;  %v6839_v26 = vld [vmem:[%s7469_s2] ss:$0 sm:$0xff]  ;;  %v6849_v14 = vld [vmem:[#allocation2 + $0xa8] ss:$12 sps:$4 sm:$0xff]  }
 0x139   : > { %v1623_v48 = vsel %vm6510_vm7, %v1497_v58, %v1622_v23  ;;  %1617 = vst [vmem:[#allocation2 + $0xe0] sm:$0xf] %v1485_v18  ;;  %v1169_v40 = vrot.slane %v6800_v49, 4  ;;  %v1509_v2 = vor.u32 %v1508_v47, %v1507_v59  ;;  %v6817_v62 = vrot.slane %v1147_v43, 7  ;;  %2354 = vmatprep.mubr.bf16.mxu1 %v6804_v36  ;;  %5645 = vmatmul.mubr.bf16.gmra.mxu0 %v5904_v44  ;;  %v6851_v39 = vld [vmem:[#allocation2 + $0xc4] ss:$12 sps:$4 sm:$0xff]   ;;  %v625_v18 = vpop.f32.mrf.mxu1 }
 0x13a   : > { %1624 = vst [vmem:[#allocation2 + $0x104] sm:$0xf] %v1623_v48  ;;  %v1129_v57 = vsel %vm6499_vm6, %v1121_v53, %v1128_v5  ;;  %v1488_v56 = vrot.slane %v1487_v63, 4  ;;  %v1322_v6 = vsel %vm6477_vm4, %v1168_v35, %v1321_v41  ;;  %v1150_v21 = vshll.u32 %v6784_v16, 16  ;;  %1394 = vst [vmem:[#allocation2 + $0x118] sm:$0xf] %v5101_v61 }
 0x13b   : > { %1312 = vst [vmem:[#allocation2 + $0xe4] sm:$0xf] %v1129_v57  ;;  %1323 = vst [vmem:[#allocation2 + $0x120] sm:$0xf] %v1322_v6  ;;  %v1510_v11 = vrot.slane %v1509_v2, 4  ;;  %v1153_v46 = vrot.slane %v6817_v62, 4  ;;  %v618_v12 = vadd.f32 %v6839_v26, %v6761_v0  ;;  %v610_v29 = vadd.f32 %v6839_v26, %v6787_v25 }
 0x13c   : > { %v1498_v60 = vrot.slane %v1147_v43, 4  ;;  %v1171_v42 = vshrl.u32 %v6789_v13, 16  ;;  %v1619_v53 = vsel %vm6510_vm7, %v1488_v56, %v1618_v27  ;;  %v1152_v17 = vor.u32 %v1150_v21, %v6817_v62  ;;  %v1630_v44 = vld [vmem:[#allocation2 + $0x134] sm:$0xf]  ;;  %v1626_v58 = vld [vmem:[#allocation2 + $0x11c] sm:$0xf] }
 0x13d   : > { %v1499_v3 = vrot.slane %v1150_v21, 5  ;;  %v1174_v1 = vshll.u32 %v6789_v13, 16  ;;  %1620 = vst [vmem:[#allocation2 + $0xec] sm:$0xf] %v1619_v53  ;;  %v1155_v20 = vshrl.u32 %v5101_v61, 16  ;;  %v1158_v34 = vshll.u32 %v5101_v61, 16 }
 0x13e   : > { %v1173_v19 = vrot.slane %v1171_v42, 7  ;;  %v1513_v16 = vrot.slane %v1171_v42, 4  ;;  %v1318_v23 = vsel %vm6477_vm4, %v1152_v17, %v1317_v9  ;;  %v666_v38 = vmax.f32 %v618_v12, 0.0  ;;  %v6866_v56 = vld [vmem:[#allocation2 + $0xc0] ss:$12 sps:$4 sm:$0xff]  }
 0x13f   : > { %v1500_v28 = vor.u32 %v1499_v3, %v1498_v60  ;;  %v1511_v13 = vrot.slane %v1174_v1, 5  ;;  %1319 = vst [vmem:[#allocation2 + $0x108] sm:$0xf] %v1318_v23  ;;  %v664_v8 = vmax.f32 %v610_v29, 0.0  ;;  %2355 = vmatmul.mubr.bf16.gmra.mxu1 %v6849_v14  ;;  %v1157_v45 = vrot.slane %v1155_v20, 7 }
 0x140   : > { %v1176_v22 = vor.u32 %v1174_v1, %v1173_v19  ;;  %v1502_v50 = vrot.slane %v1158_v34, 5  ;;  %v1504_v49 = vrot.slane %v1155_v20, 4  ;;  %2362 = vmatprep.mubr.bf16.mxu1 %v6851_v39  ;;  %v5106_v59 = vpack.c.bf16 %v666_v38, %v666_v38  ;;  %v1329_v21 = vld [vmem:[#allocation2 + $0x150] sm:$0xf]  ;;  %v5615_v1 = vpop.f32.mrf.mxu1 }
 0x141   : > { %v1501_v0 = vrot.slane %v1500_v28, 4  ;;  %v1512_v41 = vsel %vm6491_vm5, %v1510_v11, %v1511_v13  ;;  %v1514_v43 = vor.u32 %v1513_v16, %v1511_v13  ;;  %v5104_v47 = vpack.c.bf16 %v664_v8, %v664_v8  ;;  %v5910_v48 = vld [vmem:[#allocation2 + $0xf8] ss:$12 sps:$4 sm:$0xff]  }
 0x142   : > { %v1177_v25 = vsel %vm6499_vm6, %v1169_v40, %v1176_v22  ;;  %1629 = vst [vmem:[#allocation2 + $0x128] sm:$0xf] %v1512_v41  ;;  %v621_v5 = vadd.f32 %v6839_v26, %v6802_v24  ;;  %v1160_v63 = vor.u32 %v1158_v34, %v1157_v45  ;;  %v1505_v35 = vor.u32 %v1504_v49, %v1502_v50  ;;  %v628_v8 = vpop.f32.mrf.mxu1 }
 0x143   : > { %1324 = vst [vmem:[#allocation2 + $0x12c] sm:$0xf] %v1177_v25  ;;  %v1515_v37 = vrot.slane %v1514_v43, 4  ;;  %v1503_v27 = vsel %vm6491_vm5, %v1501_v0, %v1502_v50  ;;  %v613_v51 = vadd.f32 %v6839_v26, %v612_v10  ;;  %v1195_v2 = vshrl.u32 %v5106_v59, 16  ;;  %1399 = vst [vmem:[#allocation2 + $0x154] sm:$0xf] %v5106_v59 }
 0x144   : > { %1625 = vst [vmem:[#allocation2 + $0x110] sm:$0xf] %v1503_v27  ;;  %v1198_v62 = vshll.u32 %v5106_v59, 16  ;;  %v1179_v57 = vshrl.u32 %v5104_v47, 16  ;;  %1397 = vst [vmem:[#allocation2 + $0x13c] sm:$0xf] %v5104_v47  ;;  %v1161_v24 = vsel %vm6499_vm6, %v1153_v46, %v1160_v63  ;;  %v634_v59 = vadd.f32 %v6839_v26, %v6847_v31 }
 0x145   : > { %v1631_v40 = vsel %vm6510_vm7, %v1515_v37, %v1630_v44  ;;  %v1506_v6 = vrot.slane %v1505_v35, 4  ;;  %v1182_v9 = vshll.u32 %v5104_v47, 16  ;;  %v1325_v10 = vld [vmem:[#allocation2 + $0x138] sm:$0xf]  ;;  %v667_v11 = vmax.f32 %v621_v5, 0.0 }
 0x146   : > { %1632 = vst [vmem:[#allocation2 + $0x134] sm:$0xf] %v1631_v40  ;;  %v5909_v60 = vld [vmem:[#allocation2 + $0xe0] ss:$12 sps:$4 sm:$0xff]   ;;  %1320 = vst [vmem:[#allocation2 + $0x114] sm:$0xf] %v1161_v24  ;;  %v626_v47 = vadd.f32 %v6839_v26, %v625_v18  ;;  %v637_v5 = vadd.f32 %v6839_v26, %v5615_v1 }
 0x147   : > { %v1197_v42 = vrot.slane %v1195_v2, 7  ;;  %v1525_v53 = vrot.slane %v1195_v2, 4  ;;  %v1526_v17 = vrot.slane %v1198_v62, 5  ;;  %v6870_v3 = vrot.slane %v1179_v57, 7  ;;  %5648 = vmatprep.mubr.bf16.mxu0 %v5909_v60  ;;  %v6874_v46 = vld [vmem:[#allocation2 + $0xdc] ss:$12 sps:$4 sm:$0xff]   ;;  %2363 = vmatmul.mubr.bf16.gmra.mxu1 %v6866_v56 }
 0x148   : > { %v1627_v19 = vsel %vm6510_vm7, %v1506_v6, %v1626_v58  ;;  %v1516_v16 = vrot.slane %v1179_v57, 4  ;;  %v1517_v61 = vrot.slane %v1182_v9, 5  ;;  %v5107_v12 = vpack.c.bf16 %v667_v11, %v667_v11  ;;  %5649 = vmatmul.mubr.bf16.gmra.mxu0 %v5910_v48  ;;  %2370 = vmatprep.mubr.bf16.mxu1 %v6874_v46  ;;  %v1638_v37 = vld [vmem:[#allocation2 + $0x164] sm:$0xf]  ;;  %v6893_v40 = vld [vmem:[#allocation2 + $0xf4] ss:$12 sps:$4 sm:$0xff]  }
 0x149   : > { %1628 = vst [vmem:[#allocation2 + $0x11c] sm:$0xf] %v1627_v19  ;;  %v1200_v23 = vor.u32 %v1198_v62, %v1197_v42  ;;  %v1201_v28 = vrot.slane %v1197_v42, 4  ;;  %v1527_v13 = vor.u32 %v1526_v17, %v1525_v53  ;;  %v1184_v29 = vor.u32 %v1182_v9, %v6870_v3  ;;  %v6891_v48 = vld [vmem:[#allocation2 + $0xd8] ss:$12 sps:$4 sm:$0xff]  }
 0x14a   : > { %v1185_v22 = vrot.slane %v6870_v3, 4  ;;  %v1518_v20 = vor.u32 %v1517_v61, %v1516_v16  ;;  %v1203_v34 = vshrl.u32 %v5107_v12, 16  ;;  %v1206_v38 = vshll.u32 %v5107_v12, 16  ;;  %1400 = vst [vmem:[#allocation2 + $0x160] sm:$0xf] %v5107_v12 }
 0x14b   : > { %v1330_v0 = vsel %vm6477_vm4, %v1200_v23, %v1329_v21  ;;  %v1528_v41 = vrot.slane %v1527_v13, 4  ;;  %v1326_v43 = vsel %vm6477_vm4, %v1184_v29, %v1325_v10  ;;  %v665_v44 = vmax.f32 %v613_v51, 0.0  ;;  %v1634_v17 = vld [vmem:[#allocation2 + $0x14c] sm:$0xf]  ;;  %v1337_v29 = vld [vmem:[#allocation2 + $0x180] sm:$0xf] }
 0x14c   : > { %1331 = vst [vmem:[#allocation2 + $0x150] sm:$0xf] %v1330_v0  ;;  %1327 = vst [vmem:[#allocation2 + $0x138] sm:$0xf] %v1326_v43  ;;  %v1519_v25 = vrot.slane %v1518_v20, 4  ;;  %v1205_v45 = vrot.slane %v1203_v34, 7  ;;  %v629_v51 = vadd.f32 %v6839_v26, %v628_v8 }
 0x14d   : > { %v1529_v50 = vrot.slane %v1206_v38, 5  ;;  %v1531_v49 = vrot.slane %v1203_v34, 4  ;;  %v5105_v58 = vpack.c.bf16 %v665_v44, %v665_v44  ;;  %v670_v31 = vmax.f32 %v634_v59, 0.0  ;;  %v5919_v18 = vld [vmem:[#allocation2 + $0x128] ss:$12 sps:$4 sm:$0xff]  }
 0x14e   : > { %v1208_v63 = vor.u32 %v1206_v38, %v1205_v45  ;;  %v668_v57 = vmax.f32 %v626_v47, 0.0  ;;  %v671_v21 = vmax.f32 %v637_v5, 0.0  ;;  %v669_v9 = vmax.f32 %v629_v51, 0.0  ;;  %v1333_v8 = vld [vmem:[#allocation2 + $0x168] sm:$0xf] }
 0x14f   : > { %v1530_v27 = vsel %vm6491_vm5, %v1528_v41, %v1529_v50  ;;  %v1532_v35 = vor.u32 %v1531_v49, %v1529_v50  ;;  %v1187_v2 = vshrl.u32 %v5105_v58, 16  ;;  %v1190_v62 = vshll.u32 %v5105_v58, 16  ;;  %1398 = vst [vmem:[#allocation2 + $0x148] sm:$0xf] %v5105_v58  ;;  %2371 = vmatmul.mubr.bf16.gmra.mxu1 %v6891_v48  ;;  %v6909_v5 = vld [vmem:[#allocation2 + $0xf0] ss:$12 sps:$4 sm:$0xff]  }
 0x150   : > { %1637 = vst [vmem:[#allocation2 + $0x158] sm:$0xf] %v1530_v27  ;;  %v1209_v24 = vsel %vm6499_vm6, %v1201_v28, %v1208_v63  ;;  %v5110_v60 = vpack.c.bf16 %v670_v31, %v670_v31  ;;  %v5918_v42 = vld [vmem:[#allocation2 + $0x110] ss:$12 sps:$4 sm:$0xff]   ;;  %v5108_v1 = vpack.c.bf16 %v668_v57, %v668_v57  ;;  %v5111_v19 = vpack.c.bf16 %v671_v21, %v671_v21  ;;  %v6937_v32 = vld [vmem:[#allocation2 + $0x120] ss:$12 sps:$4 sm:$0xff]  }
 0x151   : > { %v1533_v6 = vrot.slane %v1532_v35, 4  ;;  %1332 = vst [vmem:[#allocation2 + $0x15c] sm:$0xf] %v1209_v24  ;;  %v1189_v10 = vrot.slane %v1187_v2, 7  ;;  %v1520_v26 = vrot.slane %v1190_v62, 5  ;;  %v1522_v11 = vrot.slane %v1187_v2, 4  ;;  %2378 = vmatprep.mubr.bf16.mxu1 %v6893_v40  ;;  %5652 = vmatprep.mubr.bf16.mxu0 %v5918_v42 }
 0x152   : > { %v5109_v16 = vpack.c.bf16 %v669_v9, %v669_v9  ;;  %v1227_v28 = vshrl.u32 %v5110_v60, 16  ;;  %1403 = vst [vmem:[#allocation2 + $0x184] sm:$0xf] %v5110_v60  ;;  %v1230_v13 = vshll.u32 %v5110_v60, 16  ;;  %v1211_v20 = vshrl.u32 %v5108_v1, 16  ;;  %5653 = vmatmul.mubr.bf16.gmra.mxu0 %v5919_v18 }
 0x153   : > { %v1639_v53 = vsel %vm6510_vm7, %v1533_v6, %v1638_v37  ;;  %v1192_v61 = vor.u32 %v1190_v62, %v1189_v10  ;;  %v1521_v12 = vsel %vm6491_vm5, %v1519_v25, %v1520_v26  ;;  %v1523_v23 = vor.u32 %v1522_v11, %v1520_v26  ;;  %1401 = vst [vmem:[#allocation2 + $0x16c] sm:$0xf] %v5108_v1  ;;  %v6911_v35 = vld [vmem:[#allocation2 + $0x10c] ss:$12 sps:$4 sm:$0xff]  }
 0x154   : > { %1640 = vst [vmem:[#allocation2 + $0x164] sm:$0xf] %v1639_v53  ;;  %1633 = vst [vmem:[#allocation2 + $0x140] sm:$0xf] %v1521_v12  ;;  %v1214_v34 = vshll.u32 %v5108_v1, 16  ;;  %v1235_v38 = vshrl.u32 %v5111_v19, 16 }
 0x155   : > { %1404 = vst [vmem:[#allocation2 + $0x190] sm:$0xf] %v5111_v19  ;;  %1402 = vst [vmem:[#allocation2 + $0x178] sm:$0xf] %v5109_v16  ;;  %v1193_v0 = vsel %vm6499_vm6, %v1185_v22, %v1192_v61  ;;  %v1524_v41 = vrot.slane %v1523_v23, 4  ;;  %v1229_v43 = vrot.slane %v1227_v28, 7 }
 0x156   : > { %v1543_v44 = vrot.slane %v1227_v28, 4  ;;  %1328 = vst [vmem:[#allocation2 + $0x144] sm:$0xf] %v1193_v0  ;;  %v1544_v25 = vrot.slane %v1230_v13, 5  ;;  %v1213_v45 = vrot.slane %v1211_v20, 7  ;;  %v1534_v50 = vrot.slane %v1211_v20, 4 }
 0x157   : > { %v1535_v49 = vrot.slane %v1214_v34, 5  ;;  %v1635_v37 = vsel %vm6510_vm7, %v1524_v41, %v1634_v17  ;;  %v1232_v58 = vor.u32 %v1230_v13, %v1229_v43  ;;  %v1233_v59 = vrot.slane %v1229_v43, 4  ;;  %2379 = vmatmul.mubr.bf16.gmra.mxu1 %v6909_v5  ;;  %v1646_v17 = vld [vmem:[#allocation2 + $0x194] sm:$0xf]  ;;  %v6929_v20 = vld [vmem:[#allocation2 + $0x124] ss:$12 sps:$4 sm:$0xff]  }
 0x158   : > { %v1237_v47 = vrot.slane %v1235_v38, 7  ;;  %1636 = vst [vmem:[#allocation2 + $0x14c] sm:$0xf] %v1635_v37  ;;  %v1545_v3 = vor.u32 %v1544_v25, %v1543_v44  ;;  %v1216_v22 = vor.u32 %v1214_v34, %v1213_v45  ;;  %v1217_v63 = vrot.slane %v1213_v45, 4  ;;  %2386 = vmatprep.mubr.bf16.mxu1 %v6911_v35  ;;  %v6925_v12 = vld [vmem:[#allocation2 + $0x108] ss:$12 sps:$4 sm:$0xff]  }
 0x159   : > { %v1536_v27 = vor.u32 %v1535_v49, %v1534_v50  ;;  %v1338_v51 = vsel %vm6477_vm4, %v1232_v58, %v1337_v29  ;;  %v1238_v2 = vshll.u32 %v5111_v19, 16  ;;  %v1549_v62 = vrot.slane %v1235_v38, 4  ;;  %v6939_v38 = vld [vmem:[#allocation2 + $0x13c] ss:$12 sps:$4 sm:$0xff]   ;;  %v6098_v43 = vld [vmem:[#allocation2] sm:$0xff]  ;;  %v5988_v45 = vld [vmem:[%s7470_s3 + $0x230] sm:$0xff]  }
 0x15a   : > { %v1219_v31 = vshrl.u32 %v5109_v16, 16  ;;  %1339 = vst [vmem:[#allocation2 + $0x180] sm:$0xf] %v1338_v51  ;;  %v1546_v57 = vrot.slane %v1545_v3, 4  ;;  %v1334_v18 = vsel %vm6477_vm4, %v1216_v22, %v1333_v8  ;;  %v1222_v6 = vshll.u32 %v5109_v16, 16  ;;  %v5997_v49 = vld [vmem:[%s7470_s3 + $0x228] sm:$0xff]  }
 0x15b   : > { %v1537_v24 = vrot.slane %v1536_v27, 4  ;;  %1335 = vst [vmem:[#allocation2 + $0x168] sm:$0xf] %v1334_v18  ;;  %v1240_v21 = vor.u32 %v1238_v2, %v1237_v47  ;;  %v1547_v9 = vrot.slane %v1238_v2, 5  ;;  %v1642_v16 = vld [vmem:[#allocation2 + $0x17c] sm:$0xf]  ;;  %v6942_v44 = vcombine.high %v6098_v43, %v6098_v43 }
 0x15c   : > { %v1221_v10 = vrot.slane %v1219_v31, 7  ;;  %v1540_v26 = vrot.slane %v1219_v31, 4  ;;  %v1538_v11 = vrot.slane %v1222_v6, 5  ;;  %v5929_v61 = vld [vmem:[#allocation2 + $0x158] ss:$12 sps:$4 sm:$0xff]   ;;  %v6950_v25 = vcombine.low %v6098_v43, %v6098_v43  ;;  %v6009_v51 = vld [vmem:[%s7470_s3 + $0x210] sm:$0xff]  }
 0x15d   : > { %v1241_v60 = vsel %vm6499_vm6, %v1233_v59, %v1240_v21  ;;  %v1548_v42 = vsel %vm6491_vm5, %v1546_v57, %v1547_v9  ;;  %v1550_v53 = vor.u32 %v1549_v62, %v1547_v9  ;;  %v6946_v4 = vld [vmem:[#allocation2 + $0x138] ss:$12 sps:$4 sm:$0xff]   ;;  %v6948_v8 = vld [vmem:[#allocation2 + $0x154] ss:$12 sps:$4 sm:$0xff]   ;;  %v5947_v50 = vld [vmem:[#allocation2 + $0x1c] ss:$12 sps:$4 sm:$0xff]  }
 0x15e   : > { %v1224_v30 = vor.u32 %v1222_v6, %v1221_v10  ;;  %1340 = vst [vmem:[#allocation2 + $0x18c] sm:$0xf] %v1241_v60  ;;  %1645 = vst [vmem:[#allocation2 + $0x188] sm:$0xf] %v1548_v42  ;;  %v1539_v1 = vsel %vm6491_vm5, %v1537_v24, %v1538_v11  ;;  %v1541_v19 = vor.u32 %v1540_v26, %v1538_v11  ;;  %v6962_v37 = vld [vmem:[#allocation2 + $0x150] ss:$12 sps:$4 sm:$0xff]  }
 0x15f   : > { %v1551_v23 = vrot.slane %v1550_v53, 4  ;;  %1641 = vst [vmem:[#allocation2 + $0x170] sm:$0xf] %v1539_v1  ;;  %v5928_v13 = vld [vmem:[#allocation2 + $0x140] ss:$12 sps:$4 sm:$0xff]   ;;  %2387 = vmatmul.mubr.bf16.gmra.mxu1 %v6925_v12  ;;  %v6008_v22 = vld [vmem:[%s7470_s3 + $0x218] sm:$0xff]  }
 0x160   : > { %v1225_v28 = vsel %vm6499_vm6, %v1217_v63, %v1224_v30  ;;  %v1542_v29 = vrot.slane %v1541_v19, 4  ;;  %5656 = vmatprep.mubr.bf16.mxu0 %v5928_v13  ;;  %2394 = vmatprep.mubr.bf16.mxu1 %v6929_v20  ;;  %v6964_v58 = vld [vmem:[#allocation2 + $0x16c] ss:$12 sps:$4 sm:$0xff]   ;;  %v6971_v47 = vld [vmem:[#allocation2 + $0x34] ss:$12 sps:$4 sm:$0xff]  }
 0x161   : > { %1336 = vst [vmem:[#allocation2 + $0x174] sm:$0xf] %v1225_v28  ;;  %v1647_v34 = vsel %vm6510_vm7, %v1551_v23, %v1646_v17  ;;  %5657 = vmatmul.mubr.bf16.gmra.mxu0 %v5929_v61  ;;  %v5952_v59 = vld [vmem:[#allocation2 + $0x18] ss:$12 sps:$4 sm:$0xff]   ;;  %v6980_v27 = vld [vmem:[#allocation2 + $0x30] ss:$12 sps:$4 sm:$0xff]  }
 0x162   : > { %1648 = vst [vmem:[#allocation2 + $0x194] sm:$0xf] %v1647_v34  ;;  %v1643_v54 = vsel %vm6510_vm7, %v1542_v29, %v1642_v16  ;;  %v5972_v63 = vld [vmem:[#allocation2 + $0x184] ss:$12 sps:$4 sm:$0xff]   ;;  %v6099_v2 = vld [vmem:[#allocation2 + $0x4c] ss:$12 sps:$4 sm:$0xff]  }
 0x163   : > { %1644 = vst [vmem:[#allocation2 + $0x17c] sm:$0xf] %v1643_v54  ;;  %v5975_v62 = vld [vmem:[#allocation2 + $0x8] ss:$12 sps:$4 sm:$0xff]   ;;  %v6015_v18 = vld [vmem:[%s7470_s3 + $0x200] sm:$0xff]   ;;  %v5978_v21 = vld [vmem:[%s7470_s3 + $0x1b8] sm:$0xff]  }
 0x164   : > { %v6013_v57 = vld [vmem:[%s7470_s3 + $0x208] sm:$0xff]   ;;  %v6101_v6 = vld [vmem:[#allocation2 + $0x64] ss:$12 sps:$4 sm:$0xff]   ;;  %v5996_v16 = vld [vmem:[%s7470_s3 + $0x198] sm:$0xff]  }
 0x165   : > { %v5974_v31 = vld [vmem:[#allocation2 + $0x180] ss:$12 sps:$4 sm:$0xff]   ;;  %v6100_v24 = vld [vmem:[#allocation2 + $0x48] ss:$12 sps:$4 sm:$0xff]   ;;  %v5980_v26 = vld [vmem:[#allocation2 + $0x38] ss:$12 sps:$4 sm:$0xff]  }
 0x166   : > { %v5977_v9 = vld [vmem:[#allocation2 + $0x20] ss:$12 sps:$4 sm:$0xff]   ;;  %v5981_v10 = vld [vmem:[%s7470_s3 + $0x1f0] sm:$0xff]   ;;  %v5989_v28 = vld [vmem:[#allocation2 + $0x98] ss:$12 sps:$4 sm:$0xff]  }
 0x167   : > { %2395 = vmatmul.mubr.bf16.gmra.mxu1 %v6937_v32  ;;  %v5983_v11 = vld [vmem:[%s7470_s3 + $0x1b0] sm:$0xff]   ;;  %v5985_v60 = vld [vmem:[%s7470_s3 + $0x1e8] sm:$0xff]   ;;  %v5990_v30 = vld [vmem:[%s7470_s3 + $0x1e0] sm:$0xff]  }
 0x168   : > { %2402 = vmatprep.mubr.bf16.mxu1 %v6939_v38  ;;  %v6974_v3 = vld [vmem:[#allocation2 + $0x168] ss:$12 sps:$4 sm:$0xff]   ;;  %v6102_v42 = vld [vmem:[#allocation2 + $0x60] ss:$12 sps:$4 sm:$0xff]   ;;  %v5982_v17 = vld [vmem:[#allocation2 + $0x50] ss:$12 sps:$4 sm:$0xff]  }
 0x169   : > { %v5938_v0 = vld [vmem:[#allocation2 + $0x188] ss:$12 sps:$4 sm:$0xff]   ;;  %v5992_v19 = vld [vmem:[%s7470_s3 + $0x1a0] sm:$0xff]   ;;  %v5991_v29 = vld [vmem:[#allocation2 + $0xb0] ss:$12 sps:$4 sm:$0xff]  }
 0x16a   : > { %v5937_v41 = vld [vmem:[#allocation2 + $0x170] ss:$12 sps:$4 sm:$0xff]   ;;  %v5987_v53 = vld [vmem:[%s7470_s3 + $0x1a8] sm:$0xff]   ;;  %v6010_v34 = vld [vmem:[%s7470_s3 + $0x1c0] sm:$0xff]  }
 0x16b   : > { %5660 = vmatprep.mubr.bf16.mxu0 %v5937_v41  ;;  %v5984_v1 = vld [vmem:[#allocation2 + $0x68] ss:$12 sps:$4 sm:$0xff]   ;;  %v5986_v61 = vld [vmem:[#allocation2 + $0x80] ss:$12 sps:$4 sm:$0xff]   ;;  %v6000_v41 = vld [vmem:[#allocation2 + $0x110] ss:$12 sps:$4 sm:$0xff]  }
 0x16c   : > { %5661 = vmatmul.mubr.bf16.gmra.mxu0 %v5938_v0  ;;  %v5999_v23 = vld [vmem:[%s7470_s3 + $0x1d0] sm:$0xff]   ;;  %v6006_v13 = vld [vmem:[%s7470_s3 + $0x188] sm:$0xff]   ;;  %v5998_v0 = vld [vmem:[#allocation2 + $0xf8] ss:$12 sps:$4 sm:$0xff]  }
 0x16d   : > { %3028 = vmatprep.mubr.bf16.mxu0 %v6942_v44  ;;  %v5993_v54 = vld [vmem:[#allocation2 + $0xc8] ss:$12 sps:$4 sm:$0xff]  }
 0x16e   : > { %v6002_v43 = vld [vmem:[#allocation2 + $0x128] ss:$12 sps:$4 sm:$0xff]  }
 0x16f   : > { %2403 = vmatmul.mubr.bf16.gmra.mxu1 %v6946_v4 }
 0x170   : > { %2410 = vmatprep.mubr.bf16.mxu1 %v6948_v8 }
 0x174   : > { %3029 = vmatmul.mubr.bf16.vlgmr.msra.gmra.mxu0 %v6950_v25 }
 0x175   : > { %3036 = vmatprep.mubr.bf16.mxu0 %v5947_v50  ;;  %5713 = vmatpush3.bf16.msra.mxu0 %v6777_v7  ;;  %v6003_v7 = vld [vmem:[%s7470_s3 + $0x220] sm:$0xff]  }
 0x176   : > { %5714 = vmatprep.subr.bf16.mxu0 %v5988_v45 }
 0x177   : > { %2411 = vmatmul.mubr.bf16.gmra.mxu1 %v6962_v37 }
 0x178   : > { %2418 = vmatprep.mubr.bf16.mxu1 %v6964_v58 }
 0x179   : > { %5715 = vmatpush3.bf16.msra.mxu0 %v5988_v45  ;;  %v6007_v45 = vld [vmem:[#allocation2 + $0x158] ss:$12 sps:$4 sm:$0xff]  }
 0x17a   : > { %5716 = vmatprep.subr.bf16.mxu0 %v5997_v49 }
 0x17c   : > { %3037 = vmatmul.mubr.bf16.gmra.mxu0 %v5952_v59 }
 0x17d   : > { %3044 = vmatprep.mubr.bf16.mxu0 %v6971_v47  ;;  %5717 = vmatpush3.bf16.msra.mxu0 %v5997_v49  ;;  %v6016_v49 = vld [vmem:[#allocation2 + $0x48] ss:$12 sps:$4 sm:$0xff]  }
 0x17e   : > { %5718 = vmatprep.subr.bf16.mxu0 %v6003_v7 }
 0x17f   : > { %2419 = vmatmul.mubr.bf16.gmra.mxu1 %v6974_v3 }
 0x180   : > { %2426 = vmatprep.mubr.bf16.mxu1 %v5972_v63 }
 0x181   : > { %5719 = vmatpush3.bf16.msra.mxu0 %v6003_v7 }
 0x182   : > { %5720 = vmatprep.subr.bf16.mxu0 %v6008_v22 }
 0x184   : > { %3045 = vmatmul.mubr.bf16.gmra.mxu0 %v6980_v27 }
 0x185   : > { %3052 = vmatprep.mubr.bf16.mxu0 %v6099_v2  ;;  %5721 = vmatpush3.bf16.msra.mxu0 %v6008_v22 }
 0x186   : > { %5722 = vmatprep.subr.bf16.mxu0 %v6009_v51 }
 0x187   : > { %2427 = vmatmul.mubr.bf16.gmra.mxu1 %v5974_v31 }
 0x188   : > { %5680 = vmatprep.mubr.bf16.mxu1 %v5975_v62  ;;  %v6021_v62 = vld [vmem:[#allocation2 + $0x60] ss:$12 sps:$4 sm:$0xff]  }
 0x189   : > { %5723 = vmatpush3.bf16.msra.mxu0 %v6009_v51 }
 0x18a   : > { %5724 = vmatprep.subr.bf16.mxu0 %v6013_v57 }
 0x18c   : > { %3053 = vmatmul.mubr.bf16.gmra.mxu0 %v6100_v24  ;;  %v6028_v24 = vld [vmem:[#allocation2 + $0x7c] ss:$12 sps:$4 sm:$0xff]  }
 0x18d   : > { %3060 = vmatprep.mubr.bf16.mxu0 %v6101_v6  ;;  %5725 = vmatpush3.bf16.msra.mxu0 %v6013_v57 }
 0x18e   : > { %5726 = vmatprep.subr.bf16.mxu0 %v6015_v18 }
 0x18f   : > { %5681 = vmatmul.mubr.bf16.vlgmr.msra.gmra.mxu1 %v5977_v9 }
 0x190   : > { %5409 = vmatpush3.bf16.msra.mxu1 %v5978_v21  ;;  %5684 = vmatprep.mubr.bf16.mxu1 %v5980_v26 }
 0x191   : > { %5410 = vmatprep.subr.bf16.mxu1 %v5981_v10  ;;  %5727 = vmatpush3.bf16.msra.mxu0 %v6015_v18 }
 0x194   : > { %3061 = vmatmul.mubr.bf16.gmra.mxu0 %v6102_v42  ;;  %5411 = vmatpush3.bf16.msra.mxu1 %v5983_v11 }
 0x195   : > { %3068 = vmatprep.mubr.bf16.mxu0 %v6738_v33  ;;  %5412 = vmatprep.subr.bf16.mxu1 %v5985_v60  ;;  %v5994_v33 = vld [vmem:[%s7470_s3 + $0x1d8] sm:$0xff]  }
 0x196   : > { %v6026_v60 = vld [vmem:[#allocation2 + $0x78] ss:$12 sps:$4 sm:$0xff]  }
 0x197   : > { %5685 = vmatmul.mubr.bf16.gmra.mxu1 %v5982_v17  ;;  %v6033_v17 = vld [vmem:[#allocation2 + $0x94] ss:$12 sps:$4 sm:$0xff]  }
 0x198   : > { %5688 = vmatprep.mubr.bf16.mxu1 %v5984_v1  ;;  %5413 = vmatpush3.bf16.msra.mxu1 %v5987_v53 }
 0x199   : > { %5414 = vmatprep.subr.bf16.mxu1 %v5990_v30 }
 0x19c   : > { %3069 = vmatmul.mubr.bf16.gmra.mxu0 %v6763_v15  ;;  %5415 = vmatpush3.bf16.msra.mxu1 %v5992_v19  ;;  %v6001_v15 = vld [vmem:[%s7470_s3 + $0x190] sm:$0xff]  }
 0x19d   : > { %3076 = vmatprep.mubr.bf16.mxu0 %v6772_v52  ;;  %5416 = vmatprep.subr.bf16.mxu1 %v5994_v33  ;;  %v6004_v52 = vld [vmem:[%s7470_s3 + $0x1c8] sm:$0xff]  }
 0x19f   : > { %5689 = vmatmul.mubr.bf16.gmra.mxu1 %v5986_v61 }
 0x1a0   : > { %5692 = vmatprep.mubr.bf16.mxu1 %v5989_v28  ;;  %5417 = vmatpush3.bf16.msra.mxu1 %v5996_v16  ;;  %v6014_v16 = vld [vmem:[#allocation2 + $0x38] ss:$12 sps:$4 sm:$0xff]  }
 0x1a1   : > { %5418 = vmatprep.subr.bf16.mxu1 %v5999_v23  ;;  %v6031_v23 = vld [vmem:[#allocation2 + $0x90] ss:$12 sps:$4 sm:$0xff]  }
 0x1a4   : > { %3077 = vmatmul.mubr.bf16.gmra.mxu0 %v6798_v55  ;;  %5419 = vmatpush3.bf16.msra.mxu1 %v6001_v15  ;;  %v6012_v55 = vld [vmem:[%s7470_s3 + $0x180] sm:$0xff]  }
 0x1a5   : > { %3084 = vmatprep.mubr.bf16.mxu0 %v6804_v36  ;;  %5420 = vmatprep.subr.bf16.mxu1 %v6004_v52  ;;  %v5995_v36 = vld [vmem:[#allocation2 + $0xe0] ss:$12 sps:$4 sm:$0xff]  }
 0x1a6   : > { %v6038_v52 = vld [vmem:[#allocation2 + $0xac] ss:$12 sps:$4 sm:$0xff]  }
 0x1a7   : > { %5693 = vmatmul.mubr.bf16.gmra.mxu1 %v5991_v29 }
 0x1a8   : > { %5696 = vmatprep.mubr.bf16.mxu1 %v5993_v54  ;;  %5421 = vmatpush3.bf16.msra.mxu1 %v6006_v13  ;;  %v6019_v54 = vld [vmem:[#allocation2 + $0x50] ss:$12 sps:$4 sm:$0xff]  }
 0x1a9   : > { %5422 = vmatprep.subr.bf16.mxu1 %v6010_v34 }
 0x1ac   : > { %3085 = vmatmul.mubr.bf16.gmra.mxu0 %v6849_v14  ;;  %5423 = vmatpush3.bf16.msra.mxu1 %v6012_v55  ;;  %v6005_v14 = vld [vmem:[#allocation2 + $0x140] ss:$12 sps:$4 sm:$0xff]  }
 0x1ad   : > { %3092 = vmatprep.mubr.bf16.mxu0 %v6851_v39  ;;  %v6011_v39 = vld [vmem:[#allocation2 + $0x170] ss:$12 sps:$4 sm:$0xff]  }
 0x1af   : > { %5697 = vmatmul.mubr.bf16.gmra.mxu1 %v5995_v36  ;;  %v6020_v36 = vld [vmem:[#allocation2 + $0x68] ss:$12 sps:$4 sm:$0xff]  }
 0x1b0   : > { %5700 = vmatprep.mubr.bf16.mxu1 %v5998_v0 }
 0x1b4   : > { %3093 = vmatmul.mubr.bf16.gmra.mxu0 %v6866_v56  ;;  %v6018_v56 = vld [vmem:[#allocation2 + $0x4c] ss:$12 sps:$4 sm:$0xff]  }
 0x1b5   : > { %3100 = vmatprep.mubr.bf16.mxu0 %v6874_v46 }
 0x1b7   : > { %5701 = vmatmul.mubr.bf16.gmra.mxu1 %v6000_v41 }
 0x1b8   : > { %5704 = vmatprep.mubr.bf16.mxu1 %v6002_v43 }
 0x1bc   : > { %3101 = vmatmul.mubr.bf16.gmra.mxu0 %v6891_v48 }
 0x1bd   : > { %3108 = vmatprep.mubr.bf16.mxu0 %v6893_v40 }
 0x1bf   : > { %5705 = vmatmul.mubr.bf16.gmra.mxu1 %v6005_v14 }
 0x1c0   : > { %5708 = vmatprep.mubr.bf16.mxu1 %v6007_v45  ;;  %v6036_v45 = vld [vmem:[#allocation2 + $0xa8] ss:$12 sps:$4 sm:$0xff]  }
 0x1c4   : > { %3109 = vmatmul.mubr.bf16.gmra.mxu0 %v6909_v5 }
 0x1c5   : > { %3116 = vmatprep.mubr.bf16.mxu0 %v6911_v35 }
 0x1c7   : > { %5709 = vmatmul.mubr.bf16.gmra.mxu1 %v6011_v39 }
 0x1c8   : > { %3864 = vmatprep.mubr.bf16.mxu1 %v6971_v47  ;;  %v6023_v47 = vld [vmem:[#allocation2 + $0x64] ss:$12 sps:$4 sm:$0xff]  }
 0x1cc   : > { %3117 = vmatmul.mubr.bf16.gmra.mxu0 %v6925_v12  ;;  %v5152_v46 = vpop.f32.mrf.mxu1 }
 0x1cd   : > { %3124 = vmatprep.mubr.bf16.mxu0 %v6929_v20 }
 0x1ce   : > { %v5153_v48 = vpop.f32.mrf.mxu1 }
 0x1cf   : > { %3865 = vmatmul.mubr.bf16.vlgmr.msra.gmra.mxu1 %v6980_v27  ;;  %v5154_v40 = vadd.f32 %v5153_v48, %v5152_v46  ;;  %v5634_v50 = vpop.f32.mrf.mxu0  ;;  %v6043_v48 = vld [vmem:[#allocation2 + $0xc4] ss:$12 sps:$4 sm:$0xff]  }
 0x1d0   : > { %3872 = vmatprep.mubr.bf16.mxu1 %v6018_v56  ;;  %v5155_v5 = vpop.f32.mrf.mxu1 }
 0x1d1   : > { %v2469_v35 = vpop.f32.mrf.mxu0 }
 0x1d2   : > { %v7056_v59 = vadd.f32 %v5154_v40, %v2469_v35  ;;  %v5156_v12 = vpop.f32.mrf.mxu1 }
 0x1d3   : > { %v5157_v7 = vadd.f32 %v5156_v12, %v5155_v5  ;;  %v5635_v20 = vpop.f32.mrf.mxu0  ;;  %v6024_v5 = vld [vmem:[#allocation2 + $0x80] ss:$12 sps:$4 sm:$0xff]  }
 0x1d4   : > { %3125 = vmatmul.mubr.bf16.gmra.mxu0 %v6937_v32  ;;  %v5158_v22 = vpop.f32.mrf.mxu1 }
 0x1d5   : > { %3132 = vmatprep.mubr.bf16.mxu0 %v6939_v38  ;;  %v2472_v63 = vpop.f32.mrf.mxu0 }
 0x1d6   : > { %v7058_v27 = vadd.f32 %v5157_v7, %v2472_v63  ;;  %v5159_v51 = vpop.f32.mrf.mxu1  ;;  %v6041_v63 = vld [vmem:[#allocation2 + $0xc0] ss:$12 sps:$4 sm:$0xff]  }
 0x1d7   : > { %3873 = vmatmul.mubr.bf16.gmra.mxu1 %v6016_v49  ;;  %v5160_v2 = vadd.f32 %v5159_v51, %v5158_v22  ;;  %v6025_v49 = vld [vmem:[#allocation2 + $0x98] ss:$12 sps:$4 sm:$0xff]  }
 0x1d8   : > { %3880 = vmatprep.mubr.bf16.mxu1 %v6023_v47  ;;  %v5161_v32 = vpop.f32.mrf.mxu1 }
 0x1d9   : > { %v7062_v38 = vadd.f32 %v5634_v50, %v5160_v2 }
 0x1da   : > { %v5162_v31 = vpop.f32.mrf.mxu1 }
 0x1db   : > { %v5163_v18 = vadd.f32 %v5162_v31, %v5161_v32  ;;  %v6048_v32 = vld [vmem:[#allocation2 + $0xdc] ss:$12 sps:$4 sm:$0xff]  }
 0x1dc   : > { %3133 = vmatmul.mubr.bf16.gmra.mxu0 %v6946_v4  ;;  %v5164_v6 = vpop.f32.mrf.mxu1 }
 0x1dd   : > { %3140 = vmatprep.mubr.bf16.mxu0 %v6948_v8  ;;  %v5638_v57 = vpop.f32.mrf.mxu0  ;;  %v7064_v9 = vadd.f32 %v5635_v20, %v5163_v18  ;;  %v6029_v18 = vld [vmem:[#allocation2 + $0xb0] ss:$12 sps:$4 sm:$0xff]  }
 0x1de   : > { %v5165_v10 = vpop.f32.mrf.mxu1 }
 0x1df   : > { %3881 = vmatmul.mubr.bf16.gmra.mxu1 %v6021_v62  ;;  %v2485_v21 = vpop.f32.mrf.mxu0  ;;  %v5166_v26 = vadd.f32 %v5165_v10, %v5164_v6  ;;  %v6030_v6 = vld [vmem:[#allocation2 + $0xc8] ss:$12 sps:$4 sm:$0xff]  }
 0x1e0   : > { %3888 = vmatprep.mubr.bf16.mxu1 %v6028_v24  ;;  %v5167_v11 = vpop.f32.mrf.mxu1 }
 0x1e1   : > { %v5639_v4 = vpop.f32.mrf.mxu0  ;;  %v7068_v8 = vadd.f32 %v5166_v26, %v2485_v21 }
 0x1e2   : > { %v5168_v42 = vpop.f32.mrf.mxu1 }
 0x1e3   : > { %v5169_v53 = vadd.f32 %v5168_v42, %v5167_v11  ;;  %v2488_v30 = vpop.f32.mrf.mxu0  ;;  %v6046_v11 = vld [vmem:[#allocation2 + $0xd8] ss:$12 sps:$4 sm:$0xff]  }
 0x1e4   : > { %3141 = vmatmul.mubr.bf16.gmra.mxu0 %v6962_v37 }
 0x1e5   : > { %3148 = vmatprep.mubr.bf16.mxu0 %v6964_v58  ;;  %v5170_v1 = vpop.f32.mrf.mxu1  ;;  %v7070_v19 = vadd.f32 %v5169_v53, %v2488_v30  ;;  %v6053_v53 = vld [vmem:[#allocation2 + $0xf4] ss:$12 sps:$4 sm:$0xff]  }
 0x1e7   : > { %3889 = vmatmul.mubr.bf16.gmra.mxu1 %v6026_v60  ;;  %v5171_v33 = vpop.f32.mrf.mxu1 }
 0x1e8   : > { %3896 = vmatprep.mubr.bf16.mxu1 %v6033_v17  ;;  %v5172_v61 = vadd.f32 %v5171_v33, %v5170_v1  ;;  %v6034_v33 = vld [vmem:[#allocation2 + $0xe0] ss:$12 sps:$4 sm:$0xff]  }
 0x1e9   : > { %v5173_v37 = vpop.f32.mrf.mxu1 }
 0x1ea   : > { %v7073_v58 = vadd.f32 %v5638_v57, %v5172_v61 }
 0x1eb   : > { %v5174_v28 = vpop.f32.mrf.mxu1 }
 0x1ec   : > { %3149 = vmatmul.mubr.bf16.gmra.mxu0 %v6974_v3  ;;  %v5175_v15 = vadd.f32 %v5174_v28, %v5173_v37  ;;  %v6035_v37 = vld [vmem:[#allocation2 + $0xf8] ss:$12 sps:$4 sm:$0xff]  }
 0x1ed   : > { %5728 = vmatprep.mubr.bf16.mxu0 %v6014_v16 }
 0x1ee   : > { %v7075_v34 = vadd.f32 %v5639_v4, %v5175_v15 }
 0x1ef   : > { %v5176_v13 = vpop.f32.mrf.mxu1  ;;  %3897 = vmatmul.mubr.bf16.gmra.mxu1 %v6031_v23 }
 0x1f0   : > { %v5642_v29 = vpop.f32.mrf.mxu0  ;;  %3904 = vmatprep.mubr.bf16.mxu1 %v6038_v52 }
 0x1f1   : > { %v5177_v55 = vpop.f32.mrf.mxu1 }
 0x1f2   : > { %v2501_v0 = vpop.f32.mrf.mxu0  ;;  %v5178_v41 = vadd.f32 %v5177_v55, %v5176_v13  ;;  %v6051_v13 = vld [vmem:[#allocation2 + $0xf0] ss:$12 sps:$4 sm:$0xff]  }
 0x1f3   : > { %v5179_v3 = vpop.f32.mrf.mxu1 }
 0x1f4   : > { %5729 = vmatmul.mubr.bf16.vlgmr.msra.gmra.mxu0 %v6019_v54  ;;  %v5643_v43 = vpop.f32.mrf.mxu0  ;;  %v7077_v14 = vadd.f32 %v5178_v41, %v2501_v0 }
 0x1f5   : > { %5732 = vmatprep.mubr.bf16.mxu0 %v6020_v36  ;;  %v5180_v39 = vpop.f32.mrf.mxu1  ;;  %v6056_v36 = vld [vmem:[#allocation2 + $0x10c] ss:$12 sps:$4 sm:$0xff]  }
 0x1f6   : > { %v2504_v56 = vpop.f32.mrf.mxu0  ;;  %v5181_v46 = vadd.f32 %v5180_v39, %v5179_v3  ;;  %v6039_v3 = vld [vmem:[#allocation2 + $0x110] ss:$12 sps:$4 sm:$0xff]  }
 0x1f7   : > { %v5182_v40 = vpop.f32.mrf.mxu1  ;;  %3905 = vmatmul.mubr.bf16.gmra.mxu1 %v6036_v45  ;;  %v6040_v45 = vld [vmem:[#allocation2 + $0x128] ss:$12 sps:$4 sm:$0xff]  }
 0x1f8   : > { %v7079_v50 = vadd.f32 %v5181_v46, %v2504_v56  ;;  %3912 = vmatprep.mubr.bf16.mxu1 %v6043_v48 }
 0x1f9   : > { %v5183_v35 = vpop.f32.mrf.mxu1  ;;  %v5646_v12 = vpop.f32.mrf.mxu0 }
 0x1fa   : > { %v5184_v7 = vadd.f32 %v5183_v35, %v5182_v40 }
 0x1fb   : > { %v5185_v20 = vpop.f32.mrf.mxu1  ;;  %v2517_v47 = vpop.f32.mrf.mxu0 }
 0x1fc   : > { %5733 = vmatmul.mubr.bf16.gmra.mxu0 %v6024_v5  ;;  %v7081_v22 = vadd.f32 %v5642_v29, %v5184_v7  ;;  %v6054_v5 = vld [vmem:[#allocation2 + $0x108] ss:$12 sps:$4 sm:$0xff]  }
 0x1fd   : > { %5736 = vmatprep.mubr.bf16.mxu0 %v6025_v49  ;;  %v5186_v51 = vpop.f32.mrf.mxu1  ;;  %v5647_v62 = vpop.f32.mrf.mxu0 }
 0x1fe   : > { %v5187_v2 = vadd.f32 %v5186_v51, %v5185_v20  ;;  %v6045_v51 = vld [vmem:[#allocation2 + $0x158] ss:$12 sps:$4 sm:$0xff]  }
 0x1ff   : > { %v5188_v31 = vpop.f32.mrf.mxu1  ;;  %3913 = vmatmul.mubr.bf16.gmra.mxu1 %v6041_v63  ;;  %v2520_v10 = vpop.f32.mrf.mxu0 }
 0x200   : > { %v7083_v57 = vadd.f32 %v5643_v43, %v5187_v2  ;;  %3920 = vmatprep.mubr.bf16.mxu1 %v6048_v32 }
 0x201   : > { %v5189_v24 = vpop.f32.mrf.mxu1 }
 0x202   : > { %v5190_v21 = vadd.f32 %v5189_v24, %v5188_v31 }
 0x203   : > { %v5191_v26 = vpop.f32.mrf.mxu1 }
 0x204   : > { %5737 = vmatmul.mubr.bf16.gmra.mxu0 %v6029_v18  ;;  %v7085_v4 = vadd.f32 %v5190_v21, %v2517_v47  ;;  %v6044_v47 = vld [vmem:[#allocation2 + $0x140] ss:$12 sps:$4 sm:$0xff]   ;;  %v6062_v21 = vld [vmem:[#allocation2 + $0x13c] ss:$12 sps:$4 sm:$0xff]  }
 0x205   : > { %5740 = vmatprep.mubr.bf16.mxu0 %v6030_v6  ;;  %v5192_v60 = vpop.f32.mrf.mxu1  ;;  %v6057_v18 = vld [vmem:[#allocation2 + $0x120] ss:$12 sps:$4 sm:$0xff]  }
 0x206   : > { %v5193_v42 = vadd.f32 %v5192_v60, %v5191_v26  ;;  %v6049_v60 = vld [vmem:[#allocation2 + $0x170] ss:$12 sps:$4 sm:$0xff]  }
 0x207   : > { %v5194_v30 = vpop.f32.mrf.mxu1  ;;  %3921 = vmatmul.mubr.bf16.gmra.mxu1 %v6046_v11 }
 0x208   : > { %v5650_v17 = vpop.f32.mrf.mxu0  ;;  %v7087_v1 = vadd.f32 %v5193_v42, %v2520_v10  ;;  %3928 = vmatprep.mubr.bf16.mxu1 %v6053_v53  ;;  %v6050_v53 = vld [vmem:[#allocation2 + $0x188] ss:$12 sps:$4 sm:$0xff]  }
 0x209   : > { %v5195_v61 = vpop.f32.mrf.mxu1 }
 0x20a   : > { %v2533_v16 = vpop.f32.mrf.mxu0  ;;  %v5196_v23 = vadd.f32 %v5195_v61, %v5194_v30 }
 0x20b   : > { %v5197_v15 = vpop.f32.mrf.mxu1 }
 0x20c   : > { %5741 = vmatmul.mubr.bf16.gmra.mxu0 %v6034_v33  ;;  %v5651_v28 = vpop.f32.mrf.mxu0  ;;  %v7089_v52 = vadd.f32 %v5646_v12, %v5196_v23  ;;  %v6059_v12 = vld [vmem:[#allocation2 + $0x124] ss:$12 sps:$4 sm:$0xff]  }
 0x20d   : > { %5744 = vmatprep.mubr.bf16.mxu0 %v6035_v37  ;;  %v5198_v29 = vpop.f32.mrf.mxu1  ;;  %v6060_v37 = vld [vmem:[#allocation2 + $0x138] ss:$12 sps:$4 sm:$0xff]  }
 0x20e   : > { %v7091_v54 = vpop.f32.mrf.mxu0  ;;  %v5199_v55 = vadd.f32 %v5198_v29, %v5197_v15 }
 0x20f   : > { %v5200_v0 = vpop.f32.mrf.mxu1  ;;  %3929 = vmatmul.mubr.bf16.gmra.mxu1 %v6051_v13  ;;  %v6065_v13 = vld [vmem:[#allocation2 + $0x154] ss:$12 sps:$4 sm:$0xff]  }
 0x210   : > { %v7093_v41 = vadd.f32 %v5647_v62, %v5199_v55  ;;  %3936 = vmatprep.mubr.bf16.mxu1 %v6056_v36  ;;  %v6072_v55 = vld [vmem:[#allocation2 + $0x1a0] ss:$12 sps:$4 sm:$0xff]  }
 0x211   : > { %v5201_v43 = vpop.f32.mrf.mxu1 }
 0x212   : > { %v5654_v39 = vpop.f32.mrf.mxu0  ;;  %v5202_v56 = vadd.f32 %v5201_v43, %v5200_v0 }
 0x213   : > { %v5203_v46 = vpop.f32.mrf.mxu1 }
 0x214   : > { %5745 = vmatmul.mubr.bf16.gmra.mxu0 %v6039_v3  ;;  %v2549_v48 = vpop.f32.mrf.mxu0  ;;  %v7095_v40 = vadd.f32 %v5202_v56, %v2533_v16 }
 0x215   : > { %5748 = vmatprep.mubr.bf16.mxu0 %v6040_v45  ;;  %v5204_v35 = vpop.f32.mrf.mxu1  ;;  %v6073_v45 = vld [vmem:[%s7472_s5 + $0x38] sm:$0xff]  }
 0x216   : > { %v7097_v49 = vadd.f32 %v5204_v35, %v5203_v46  ;;  %v5655_v20 = vpop.f32.mrf.mxu0  ;;  %5760 = vmatprep.subr.bf16.mxu0 %v6073_v45 }
 0x217   : > { %v5206_v7 = vpop.f32.mrf.mxu1  ;;  %3937 = vmatmul.mubr.bf16.gmra.mxu1 %v6054_v5  ;;  %5761 = vmatpush3.bf16.msra.mxu0 %v6073_v45 }
 0x218   : > { %3944 = vmatprep.mubr.bf16.mxu1 %v6059_v12  ;;  %v7099_v62 = vpop.f32.mrf.mxu0  ;;  %v6068_v12 = vld [vmem:[#allocation2 + $0x16c] ss:$12 sps:$4 sm:$0xff]  }
 0x219   : > { %v5207_v63 = vpop.f32.mrf.mxu1 }
 0x21a   : > { %v5208_v2 = vadd.f32 %v5207_v63, %v5206_v7 }
 0x21b   : > { %v5209_v32 = vpop.f32.mrf.mxu1 }
 0x21c   : > { %5749 = vmatmul.mubr.bf16.gmra.mxu0 %v6044_v47  ;;  %v7101_v31 = vadd.f32 %v5650_v17, %v5208_v2 }
 0x21d   : > { %5752 = vmatprep.mubr.bf16.mxu0 %v6045_v51  ;;  %v5210_v24 = vpop.f32.mrf.mxu1 }
 0x21e   : > { %v5211_v6 = vadd.f32 %v5210_v24, %v5209_v32  ;;  %v6074_v32 = vld [vmem:[%s7472_s5 + $0x30] sm:$0xff]  }
 0x21f   : > { %v5212_v10 = vpop.f32.mrf.mxu1  ;;  %3945 = vmatmul.mubr.bf16.gmra.mxu1 %v6057_v18  ;;  %5762 = vmatprep.subr.bf16.mxu0 %v6074_v32 }
 0x220   : > { %v7105_v11 = vadd.f32 %v5651_v28, %v5211_v6  ;;  %3952 = vmatprep.mubr.bf16.mxu1 %v6062_v21  ;;  %5763 = vmatpush3.bf16.msra.mxu0 %v6074_v32  ;;  %v6077_v32 = vld [vmem:[%s7472_s5 + $0x18] sm:$0xff]  }
 0x221   : > { %v7103_v26 = vpop.f32.mrf.mxu0  ;;  %v5213_v42 = vpop.f32.mrf.mxu1 }
 0x222   : > { %v5214_v33 = vadd.f32 %v5213_v42, %v5212_v10  ;;  %v6066_v10 = vld [vmem:[#allocation2 + $0x168] ss:$12 sps:$4 sm:$0xff]  }
 0x223   : > { %v2565_v30 = vpop.f32.mrf.mxu0  ;;  %v5215_v16 = vpop.f32.mrf.mxu1 }
 0x224   : > { %5753 = vmatmul.mubr.bf16.gmra.mxu0 %v6049_v60  ;;  %v7109_v61 = vadd.f32 %v5214_v33, %v2549_v48  ;;  %v6063_v48 = vld [vmem:[#allocation2 + $0x150] ss:$12 sps:$4 sm:$0xff]   ;;  %v6075_v33 = vld [vmem:[%s7472_s5 + $0x28] sm:$0xff]  }
 0x225   : > { %5756 = vmatprep.mubr.bf16.mxu0 %v6050_v53  ;;  %v7107_v17 = vpop.f32.mrf.mxu0  ;;  %v5216_v23 = vpop.f32.mrf.mxu1  ;;  %v6071_v53 = vld [vmem:[#allocation2 + $0x184] ss:$12 sps:$4 sm:$0xff]   ;;  %5764 = vmatprep.subr.bf16.mxu0 %v6075_v33 }
 0x226   : > { %v7111_v15 = vadd.f32 %v5216_v23, %v5215_v16  ;;  %5765 = vmatpush3.bf16.msra.mxu0 %v6075_v33 }
 0x227   : > { %v7113_v28 = vpop.f32.mrf.mxu0  ;;  %v5218_v29 = vpop.f32.mrf.mxu1  ;;  %3953 = vmatmul.mubr.bf16.gmra.mxu1 %v6060_v37 }
 0x228   : > { %3960 = vmatprep.mubr.bf16.mxu1 %v6065_v13 }
 0x229   : > { %v5219_v36 = vpop.f32.mrf.mxu1 }
 0x22a   : > { %v5220_v0 = vadd.f32 %v5219_v36, %v5218_v29 }
 0x22b   : > { %v5221_v43 = vpop.f32.mrf.mxu1 }
 0x22c   : > { %v7115_v3 = vpop.f32.mrf.mxu0  ;;  %5757 = vmatmul.mubr.bf16.gmra.mxu0 %v6072_v55  ;;  %v7120_v56 = vadd.f32 %v5654_v39, %v5220_v0 }
 0x22d   : > { %v5222_v5 = vpop.f32.mrf.mxu1 }
 0x22e   : > { %v7122_v46 = vpop.f32.mrf.mxu0  ;;  %v5223_v35 = vadd.f32 %v5222_v5, %v5221_v43  ;;  %v6069_v5 = vld [vmem:[#allocation2 + $0x180] ss:$12 sps:$4 sm:$0xff]  }
 0x22f   : > { %v5224_v47 = vpop.f32.mrf.mxu1  ;;  %3961 = vmatmul.mubr.bf16.gmra.mxu1 %v6063_v48  ;;  %v6076_v48 = vld [vmem:[%s7472_s5 + $0x20] sm:$0xff]  }
 0x230   : > { %v7124_v7 = vpop.f32.mrf.mxu0  ;;  %v7126_v63 = vadd.f32 %v5655_v20, %v5223_v35  ;;  %3968 = vmatprep.mubr.bf16.mxu1 %v6068_v12  ;;  %5766 = vmatprep.subr.bf16.mxu0 %v6076_v48 }
 0x231   : > { %v5225_v2 = vpop.f32.mrf.mxu1  ;;  %5767 = vmatpush3.bf16.msra.mxu0 %v6076_v48 }
 0x232   : > { %v7128_v51 = vpop.f32.mrf.mxu0  ;;  %v5226_v39 = vadd.f32 %v5225_v2, %v5224_v47  ;;  %5768 = vmatprep.subr.bf16.mxu0 %v6077_v32 }
 0x233   : > { %v5227_v24 = vpop.f32.mrf.mxu1 }
 0x234   : > { %v5288_v18 = vpop.f32.mrf.mxu0  ;;  %v7133_v6 = vadd.f32 %v5226_v39, %v2565_v30 }
 0x235   : > { %v5228_v60 = vpop.f32.mrf.mxu1  ;;  %5769 = vmatpush3.bf16.msra.mxu0 %v6077_v32 }
 0x236   : > { %v5289_v21 = vpop.f32.mrf.mxu0  ;;  %v7135_v42 = vadd.f32 %v5228_v60, %v5227_v24 }
 0x237   : > { %v5290_v20 = vadd.f32 %v5289_v21, %v5288_v18  ;;  %v5230_v37 = vpop.f32.mrf.mxu1  ;;  %3969 = vmatmul.mubr.bf16.gmra.mxu1 %v6066_v10  ;;  %v6078_v18 = vld [vmem:[%s7472_s5 + $0x10] sm:$0xff]  }
 0x238   : > { %v5291_v16 = vpop.f32.mrf.mxu0  ;;  %3976 = vmatprep.mubr.bf16.mxu1 %v6071_v53  ;;  %5770 = vmatprep.subr.bf16.mxu0 %v6078_v18  ;;  %v6079_v53 = vld [vmem:[%s7472_s5 + $0x8] sm:$0xff]  }
 0x239   : > { %v7141_v30 = vadd.f32 %v5290_v20, %v7056_v59  ;;  %v5231_v13 = vpop.f32.mrf.mxu1  ;;  %5771 = vmatpush3.bf16.msra.mxu0 %v6078_v18 }
 0x23a   : > { %v5292_v23 = vpop.f32.mrf.mxu0  ;;  %v5232_v55 = vadd.f32 %v5231_v13, %v5230_v37  ;;  %5772 = vmatprep.subr.bf16.mxu0 %v6079_v53 }
 0x23b   : > { %v5293_v29 = vadd.f32 %v5292_v23, %v5291_v16  ;;  %v5233_v0 = vpop.f32.mrf.mxu1 }
 0x23c   : > { %v5294_v36 = vpop.f32.mrf.mxu0  ;;  %v7144_v43 = vadd.f32 %v7103_v26, %v5232_v55 }
 0x23d   : > { %v7147_v45 = vadd.f32 %v5293_v29, %v7058_v27  ;;  %v5234_v35 = vpop.f32.mrf.mxu1  ;;  %5773 = vmatpush3.bf16.msra.mxu0 %v6079_v53 }
 0x23e   : > { %v5295_v59 = vpop.f32.mrf.mxu0  ;;  %v5235_v47 = vadd.f32 %v5234_v35, %v5233_v0 }
 0x23f   : > { %v5296_v12 = vadd.f32 %v5295_v59, %v5294_v36  ;;  %v5236_v39 = vpop.f32.mrf.mxu1  ;;  %3977 = vmatmul.mubr.bf16.gmra.mxu1 %v6069_v5 }
 0x240   : > { %v5297_v2 = vpop.f32.mrf.mxu0  ;;  %v7153_v26 = vadd.f32 %v7107_v17, %v5235_v47  ;;  %3984 = vmatprep.mubr.bf16.mxu1 %v6942_v44 }
 0x241   : > { %v3039_v27 = vadd.f32 %v5296_v12, %v7062_v38  ;;  %v5237_v21 = vpop.f32.mrf.mxu1 }
 0x242   : > { %v5298_v24 = vpop.f32.mrf.mxu0  ;;  %v5238_v60 = vadd.f32 %v5237_v21, %v5236_v39 }
 0x243   : > { %v5299_v10 = vadd.f32 %v5298_v24, %v5297_v2  ;;  %v5239_v17 = vpop.f32.mrf.mxu1 }
 0x244   : > { %v5300_v20 = vpop.f32.mrf.mxu0  ;;  %v7164_v44 = vadd.f32 %v5238_v60, %v7122_v46 }
 0x245   : > { %v3042_v38 = vadd.f32 %v5299_v10, %v7064_v9  ;;  %v5240_v16 = vpop.f32.mrf.mxu1  ;;  %v6080_v9 = vld [vmem:[%s7472_s5] sm:$0xff]  }
 0x246   : > { %v5301_v33 = vpop.f32.mrf.mxu0  ;;  %v7170_v23 = vadd.f32 %v5240_v16, %v5239_v17  ;;  %5774 = vmatprep.subr.bf16.mxu0 %v6080_v9 }
 0x247   : > { %v5302_v37 = vadd.f32 %v5301_v33, %v5300_v20  ;;  %v5242_v29 = vpop.f32.mrf.mxu1  ;;  %3985 = vmatmul.mubr.bf16.gmra.mxu1 %v6950_v25  ;;  %5775 = vmatpush3.bf16.msra.mxu0 %v6080_v9 }
 0x248   : > { %v5303_v13 = vpop.f32.mrf.mxu0 }
 0x249   : > { %v3047_v46 = vadd.f32 %v5302_v37, %v7068_v8  ;;  %v5243_v36 = vpop.f32.mrf.mxu1 }
 0x24a   : > { %v5304_v55 = vpop.f32.mrf.mxu0  ;;  %v5244_v48 = vadd.f32 %v5243_v36, %v5242_v29 }
 0x24b   : > { %v5305_v0 = vadd.f32 %v5304_v55, %v5303_v13  ;;  %v5245_v5 = vpop.f32.mrf.mxu1 }
 0x24c   : > { %v5306_v59 = vpop.f32.mrf.mxu0  ;;  %v7178_v35 = vadd.f32 %v7115_v3, %v5244_v48 }
 0x24d   : > { %v3050_v25 = vadd.f32 %v5305_v0, %v7070_v19  ;;  %v5246_v8 = vpop.f32.mrf.mxu1 }
 0x24e   : > { %v5307_v12 = vpop.f32.mrf.mxu0  ;;  %v5247_v2 = vadd.f32 %v5246_v8, %v5245_v5 }
 0x24f   : > { %v5308_v47 = vadd.f32 %v5307_v12, %v5306_v59  ;;  %v5682_v32 = vpop.f32.mrf.mxu1 }
 0x250   : > { %v5309_v39 = vpop.f32.mrf.mxu0  ;;  %v7182_v18 = vadd.f32 %v7124_v7, %v5247_v2  ;;  %v7184_v24 = vadd.f32 %v5682_v32, %v3039_v27 }
 0x251   : > { %v3055_v21 = vadd.f32 %v5308_v47, %v7073_v58  ;;  %v3191_v3 = vpop.f32.mrf.mxu1 }
 0x252   : > { %v5310_v10 = vpop.f32.mrf.mxu0  ;;  %v7188_v19 = vadd.f32 %v3191_v3, %v7141_v30 }
 0x253   : > { %v5311_v60 = vadd.f32 %v5310_v10, %v5309_v39  ;;  %v5683_v17 = vpop.f32.mrf.mxu1 }
 0x254   : > { %v5312_v20 = vpop.f32.mrf.mxu0  ;;  %v7190_v53 = vadd.f32 %v5683_v17, %v3042_v38 }
 0x255   : > { %v3058_v33 = vadd.f32 %v5311_v60, %v7075_v34  ;;  %v3194_v37 = vpop.f32.mrf.mxu1 }
 0x256   : > { %v5313_v16 = vpop.f32.mrf.mxu0  ;;  %v7194_v27 = vadd.f32 %v3194_v37, %v7147_v45 }
 0x257   : > { %v5314_v7 = vadd.f32 %v5313_v16, %v5312_v20  ;;  %v5686_v58 = vpop.f32.mrf.mxu1 }
 0x258   : > { %v5315_v13 = vpop.f32.mrf.mxu0  ;;  %v7196_v29 = vadd.f32 %v5686_v58, %v3055_v21 }
 0x259   : > { %v3063_v9 = vadd.f32 %v5314_v7, %v7077_v14  ;;  %v3207_v55 = vpop.f32.mrf.mxu1 }
 0x25a   : > { %v5316_v30 = vpop.f32.mrf.mxu0  ;;  %v7199_v0 = vadd.f32 %v3207_v55, %v3047_v46 }
 0x25b   : > { %v5317_v36 = vadd.f32 %v5316_v30, %v5315_v13  ;;  %v5687_v48 = vpop.f32.mrf.mxu1 }
 0x25c   : > { %v5318_v38 = vpop.f32.mrf.mxu0  ;;  %v7201_v34 = vadd.f32 %v5687_v48, %v3058_v33 }
 0x25d   : > { %v3066_v59 = vadd.f32 %v5317_v36, %v7079_v50  ;;  %v3210_v45 = vpop.f32.mrf.mxu1 }
 0x25e   : > { %v5319_v5 = vpop.f32.mrf.mxu0  ;;  %v7204_v8 = vadd.f32 %v3210_v45, %v3050_v25 }
 0x25f   : > { %v5320_v12 = vadd.f32 %v5319_v5, %v5318_v38  ;;  %v5690_v2 = vpop.f32.mrf.mxu1 }
 0x260   : > { %v5321_v47 = vpop.f32.mrf.mxu0 }
 0x261   : > { %v3071_v14 = vadd.f32 %v5320_v12, %v7081_v22  ;;  %v3223_v32 = vpop.f32.mrf.mxu1 }
 0x262   : > { %v5322_v39 = vpop.f32.mrf.mxu0  ;;  %v7209_v10 = vadd.f32 %v3223_v32, %v3063_v9 }
 0x263   : > { %v5323_v21 = vadd.f32 %v5322_v39, %v5321_v47  ;;  %v7207_v46 = vadd.f32 %v5690_v2, %v3071_v14  ;;  %v5691_v60 = vpop.f32.mrf.mxu1 }
 0x264   : > { %v5324_v3 = vpop.f32.mrf.mxu0 }
 0x265   : > { %v3074_v50 = vadd.f32 %v5323_v21, %v7083_v57  ;;  %v3226_v17 = vpop.f32.mrf.mxu1 }
 0x266   : > { %v5325_v20 = vpop.f32.mrf.mxu0  ;;  %v7214_v16 = vadd.f32 %v3226_v17, %v3066_v59 }
 0x267   : > { %v5326_v33 = vadd.f32 %v5325_v20, %v5324_v3  ;;  %v7212_v25 = vadd.f32 %v5691_v60, %v3074_v50  ;;  %v5694_v22 = vpop.f32.mrf.mxu1 }
 0x268   : > { %v5327_v37 = vpop.f32.mrf.mxu0 }
 0x269   : > { %v3079_v7 = vadd.f32 %v5326_v33, %v7085_v4  ;;  %v3239_v58 = vpop.f32.mrf.mxu1 }
 0x26a   : > { %v5328_v13 = vpop.f32.mrf.mxu0 }
 0x26b   : > { %v5329_v30 = vadd.f32 %v5328_v13, %v5327_v37  ;;  %v7217_v9 = vadd.f32 %v3239_v58, %v3079_v7  ;;  %v5695_v36 = vpop.f32.mrf.mxu1  ;;  %v2537_v13 = vadd.f32 %v7097_v49, %v7091_v54 }
 0x26c   : > { %v5330_v55 = vpop.f32.mrf.mxu0 }
 0x26d   : > { %v3082_v57 = vadd.f32 %v5329_v30, %v7087_v1  ;;  %v3242_v48 = vpop.f32.mrf.mxu1 }
 0x26e   : > { %v5331_v38 = vpop.f32.mrf.mxu0 }
 0x26f   : > { %v5332_v5 = vadd.f32 %v5331_v38, %v5330_v55  ;;  %v7220_v45 = vadd.f32 %v3242_v48, %v3082_v57  ;;  %v5698_v12 = vpop.f32.mrf.mxu1 }
 0x270   : > { %v5333_v59 = vpop.f32.mrf.mxu0 }
 0x271   : > { %v3087_v47 = vadd.f32 %v5332_v5, %v7089_v52  ;;  %v3255_v4 = vpop.f32.mrf.mxu1 }
 0x272   : > { %v5334_v2 = vpop.f32.mrf.mxu0 }
 0x273   : > { %v5335_v14 = vadd.f32 %v5334_v2, %v5333_v59  ;;  %v7223_v39 = vadd.f32 %v5694_v22, %v3087_v47  ;;  %v5699_v21 = vpop.f32.mrf.mxu1 }
 0x274   : > { %v5336_v32 = vpop.f32.mrf.mxu0 }
 0x275   : > { %v3090_v3 = vadd.f32 %v5335_v14, %v7093_v41  ;;  %v3258_v1 = vpop.f32.mrf.mxu1 }
 0x276   : > { %v5337_v60 = vpop.f32.mrf.mxu0 }
 0x277   : > { %v5338_v50 = vadd.f32 %v5337_v60, %v5336_v32  ;;  %v7226_v20 = vadd.f32 %v5695_v36, %v3090_v3  ;;  %v5702_v33 = vpop.f32.mrf.mxu1 }
 0x278   : > { %v5339_v17 = vpop.f32.mrf.mxu0 }
 0x279   : > { %v3095_v37 = vadd.f32 %v5338_v50, %v7095_v40  ;;  %v3271_v52 = vpop.f32.mrf.mxu1 }
 0x27a   : > { %v5340_v7 = vpop.f32.mrf.mxu0 }
 0x27b   : > { %v5341_v22 = vadd.f32 %v5340_v7, %v5339_v17  ;;  %v7231_v58 = vadd.f32 %v3255_v4, %v3095_v37  ;;  %v5703_v55 = vpop.f32.mrf.mxu1 }
 0x27c   : > { %v5342_v30 = vpop.f32.mrf.mxu0 }
 0x27d   : > { %v3098_v41 = vadd.f32 %v5341_v22, %v2537_v13  ;;  %v3274_v38 = vpop.f32.mrf.mxu1 }
 0x27e   : > { %v5343_v57 = vpop.f32.mrf.mxu0 }
 0x27f   : > { %v5344_v48 = vadd.f32 %v5343_v57, %v5342_v30  ;;  %v7233_v36 = vadd.f32 %v3258_v1, %v3098_v41  ;;  %v7235_v59 = vpop.f32.mrf.mxu1 }
 0x280   : > { %v5345_v5 = vpop.f32.mrf.mxu0 }
 0x281   : > { %v3103_v40 = vadd.f32 %v5344_v48, %v7101_v31  ;;  %v3287_v2 = vpop.f32.mrf.mxu1 }
 0x282   : > { %v5346_v47 = vpop.f32.mrf.mxu0 }
 0x283   : > { %v5347_v14 = vadd.f32 %v5346_v47, %v5345_v5  ;;  %v7238_v54 = vadd.f32 %v5698_v12, %v3103_v40  ;;  %v7240_v4 = vpop.f32.mrf.mxu1  ;;  %v2553_v12 = vadd.f32 %v7111_v15, %v7099_v62 }
 0x284   : > { %v5348_v49 = vpop.f32.mrf.mxu0 }
 0x285   : > { %v3106_v32 = vadd.f32 %v5347_v14, %v7105_v11  ;;  %v3290_v60 = vpop.f32.mrf.mxu1 }
 0x286   : > { %v5349_v3 = vpop.f32.mrf.mxu0 }
 0x287   : > { %v5350_v50 = vadd.f32 %v5349_v3, %v5348_v49  ;;  %v7243_v1 = vadd.f32 %v5699_v21, %v3106_v32  ;;  %v7245_v37 = vpop.f32.mrf.mxu1 }
 0x288   : > { %v5351_v17 = vpop.f32.mrf.mxu0 }
 0x289   : > { %v3111_v31 = vadd.f32 %v5350_v50, %v7109_v61  ;;  %v3303_v13 = vpop.f32.mrf.mxu1 }
 0x28a   : > { %v5352_v7 = vpop.f32.mrf.mxu0 }
 0x28b   : > { %v5353_v22 = vadd.f32 %v5352_v7, %v5351_v17  ;;  %v7250_v30 = vadd.f32 %v3271_v52, %v3111_v31  ;;  %v7252_v11 = vpop.f32.mrf.mxu1 }
 0x28c   : > { %v5354_v41 = vpop.f32.mrf.mxu0 }
 0x28d   : > { %v3114_v57 = vadd.f32 %v5353_v22, %v2553_v12  ;;  %v3306_v21 = vpop.f32.mrf.mxu1 }
 0x28e   : > { %v5355_v48 = vpop.f32.mrf.mxu0 }
 0x28f   : > { %v5356_v5 = vadd.f32 %v5355_v48, %v5354_v41  ;;  %v7254_v40 = vadd.f32 %v3274_v38, %v3114_v57  ;;  %v7256_v14 = vpop.f32.mrf.mxu1 }
 0x290   : > { %v5357_v47 = vpop.f32.mrf.mxu0 }
 0x291   : > { %v3119_v61 = vadd.f32 %v5356_v5, %v7120_v56  ;;  %v5425_v32 = vpop.f32.mrf.mxu1 }
 0x292   : > { %v5358_v49 = vpop.f32.mrf.mxu0 }
 0x293   : > { %v5359_v62 = vadd.f32 %v5358_v49, %v5357_v47  ;;  %v7259_v15 = vadd.f32 %v5702_v33, %v3119_v61  ;;  %v7261_v3 = vpop.f32.mrf.mxu1  ;;  %v2569_v33 = vadd.f32 %v7135_v42, %v7113_v28 }
 0x294   : > { %v5360_v52 = vpop.f32.mrf.mxu0 }
 0x295   : > { %7491 = vst [vmem:[#allocation3_spill] sm:$0xff] %v7259_v15  ;;  %v3122_v50 = vadd.f32 %v5359_v62, %v7126_v63  ;;  %v7264_v31 = vpop.f32.mrf.mxu1 }
 0x296   : > { %v5361_v17 = vpop.f32.mrf.mxu0 }
 0x297   : > { %v5362_v38 = vadd.f32 %v5361_v17, %v5360_v52  ;;  %v7266_v7 = vadd.f32 %v5703_v55, %v3122_v50  ;;  %v5430_v22 = vpop.f32.mrf.mxu1 }
 0x298   : > { %v5363_v12 = vpop.f32.mrf.mxu0 }
 0x299   : > { %7492 = vst [vmem:[#allocation4_spill] sm:$0xff] %v7266_v7  ;;  %v3127_v56 = vadd.f32 %v5362_v38, %v7133_v6  ;;  %v5431_v57 = vpop.f32.mrf.mxu1 }
 0x29a   : > { %v5364_v41 = vpop.f32.mrf.mxu0 }
 0x29b   : > { %v5365_v48 = vadd.f32 %v5364_v41, %v5363_v12  ;;  %v7271_v5 = vadd.f32 %v3287_v2, %v3127_v56  ;;  %v5433_v63 = vpop.f32.mrf.mxu1 }
 0x29c   : > { %v5366_v47 = vpop.f32.mrf.mxu0 }
 0x29d   : > { %v3130_v61 = vadd.f32 %v5365_v48, %v2569_v33  ;;  %v5434_v62 = vpop.f32.mrf.mxu1 }
 0x29e   : > { %v5367_v49 = vpop.f32.mrf.mxu0 }
 0x29f   : > { %v5368_v52 = vadd.f32 %v5367_v49, %v5366_v47  ;;  %v7273_v55 = vadd.f32 %v3290_v60, %v3130_v61  ;;  %v5436_v17 = vpop.f32.mrf.mxu1 }
 0x2a0   : > { %v5369_v50 = vpop.f32.mrf.mxu0 }
 0x2a1   : > { %7493 = vst [vmem:[#allocation5_spill] sm:$0xff] %v7273_v55  ;;  %v3135_v6 = vadd.f32 %v5368_v52, %v7144_v43  ;;  %v5437_v7 = vpop.f32.mrf.mxu1 }
 0x2a2   : > { %v5370_v38 = vpop.f32.mrf.mxu0 }
 0x2a3   : > { %v5371_v15 = vadd.f32 %v5370_v38, %v5369_v50  ;;  %v7277_v28 = vadd.f32 %v7235_v59, %v3135_v6  ;;  %v5439_v2 = vpop.f32.mrf.mxu1  ;;  %v2585_v59 = vadd.f32 %v7170_v23, %v7128_v51 }
 0x2a4   : > { %v5372_v42 = vpop.f32.mrf.mxu0 }
 0x2a5   : > { %7494 = vst [vmem:[#allocation6_spill] sm:$0xff] %v7277_v28  ;;  %v3138_v12 = vadd.f32 %v5371_v15, %v7153_v26  ;;  %v5440_v41 = vpop.f32.mrf.mxu1 }
 0x2a6   : > { %v5373_v56 = vpop.f32.mrf.mxu0 }
 0x2a7   : > { %v5374_v33 = vadd.f32 %v5373_v56, %v5372_v42  ;;  %v7281_v60 = vadd.f32 %v7240_v4, %v3138_v12  ;;  %v5442_v47 = vpop.f32.mrf.mxu1 }
 0x2a8   : > { %v5375_v48 = vpop.f32.mrf.mxu0 }
 0x2a9   : > { %7495 = vst [vmem:[#allocation7_spill] sm:$0xff] %v7281_v60  ;;  %v3143_v43 = vadd.f32 %v5374_v33, %v7164_v44  ;;  %v5443_v49 = vpop.f32.mrf.mxu1  ;;  %v5432_v33 = vadd.f32 %v5431_v57, %v5430_v22 }
 0x2aa   : > { %v5376_v61 = vpop.f32.mrf.mxu0 }
 0x2ab   : > { %v5377_v52 = vadd.f32 %v5376_v61, %v5375_v48  ;;  %v7286_v50 = vadd.f32 %v3303_v13, %v3143_v43  ;;  %v5445_v26 = vpop.f32.mrf.mxu1  ;;  %v5426_v13 = vadd.f32 %v5425_v32, %v7256_v14 }
 0x2ac   : > { %v5378_v6 = vpop.f32.mrf.mxu0 }
 0x2ad   : > { %v3146_v15 = vadd.f32 %v5377_v52, %v2585_v59  ;;  %v5446_v42 = vpop.f32.mrf.mxu1  ;;  %v5435_v59 = vadd.f32 %v5434_v62, %v5433_v63 }
 0x2ae   : > { %v5379_v38 = vpop.f32.mrf.mxu0 }
 0x2af   : > { %v5380_v56 = vadd.f32 %v5379_v38, %v5378_v6  ;;  %v7288_v4 = vadd.f32 %v3306_v21, %v3146_v15  ;;  %v5448_v60 = vpop.f32.mrf.mxu1  ;;  %v5444_v38 = vadd.f32 %v5443_v49, %v5442_v47 }
 0x2b0   : > { %v5381_v12 = vpop.f32.mrf.mxu0 }
 0x2b1   : > { %v3151_v44 = vadd.f32 %v5380_v56, %v7178_v35  ;;  %v5449_v55 = vpop.f32.mrf.mxu1 }
 0x2b2   : > { %v5382_v28 = vpop.f32.mrf.mxu0 }
 0x2b3   : > { %v7292_v51 = vadd.f32 %v7245_v37, %v3151_v44  ;;  %v5383_v23 = vadd.f32 %v5382_v28, %v5381_v12  ;;  %v7295_v43 = vpop.f32.mrf.mxu1  ;;  %v5429_v37 = vadd.f32 %v7264_v31, %v7261_v3  ;;  %v5438_v31 = vadd.f32 %v5437_v7, %v5436_v17 }
 0x2b4   : > { %v5730_v48 = vpop.f32.mrf.mxu0 }
 0x2b5   : > { %v3154_v61 = vadd.f32 %v5383_v23, %v7182_v18  ;;  %v4036_v21 = vadd.f32 %v5730_v48, %v5432_v33  ;;  %v5452_v6 = vpop.f32.mrf.mxu1  ;;  %v7308_v18 = vld [vmem:[%s7471_s4] ss:$0 sm:$0xff]  ;;  %v5441_v23 = vadd.f32 %v5440_v41, %v5439_v2 }
 0x2b6   : > { %v4027_v52 = vpop.f32.mrf.mxu0 }
 0x2b7   : > { %v7299_v35 = vadd.f32 %v7252_v11, %v3154_v61  ;;  %v4028_v22 = vadd.f32 %v5426_v13, %v4027_v52  ;;  %v4156_v57 = vadd.f32 %v4036_v21, %v7184_v24  ;;  %v5454_v14 = vpop.f32.mrf.mxu1  ;;  %v5447_v13 = vadd.f32 %v5446_v42, %v5445_v26 }
 0x2b8   : > { %v5731_v28 = vpop.f32.mrf.mxu0  ;;  %v5450_v42 = vadd.f32 %v5449_v55, %v5448_v60  ;;  %v5453_v60 = vadd.f32 %v5452_v6, %v7295_v43 }
 0x2b9   : > { %v4154_v32 = vadd.f32 %v4028_v22, %v7188_v19  ;;  %v4039_v15 = vadd.f32 %v5731_v28, %v5435_v59  ;;  %v5455_v11 = vpop.f32.mrf.mxu1  ;;  %v4195_v56 = vadd.f32 %v7308_v18, %v4156_v57 }
 0x2ba   : > { %v4030_v63 = vpop.f32.mrf.mxu0  ;;  %v5456_v17 = vadd.f32 %v5455_v11, %v5454_v14 }
 0x2bb   : > { %v4031_v62 = vadd.f32 %v5429_v37, %v4030_v63  ;;  %v4157_v3 = vadd.f32 %v4039_v15, %v7190_v53  ;;  %v5457_v12 = vpop.f32.mrf.mxu1  ;;  %v4193_v44 = vadd.f32 %v7308_v18, %v4154_v32  ;;  %v4227_v21 = vmax.f32 %v4195_v56, 0.0 }
 0x2bc   : > { %v5734_v24 = vpop.f32.mrf.mxu0 }
 0x2bd   : > { %v4155_v19 = vadd.f32 %v4031_v62, %v7194_v27  ;;  %v4196_v47 = vadd.f32 %v7308_v18, %v4157_v3  ;;  %v4052_v49 = vadd.f32 %v5734_v24, %v5444_v38  ;;  %v5458_v48 = vpop.f32.mrf.mxu1  ;;  %v4225_v37 = vmax.f32 %v4193_v44, 0.0 }
 0x2be   : > { %v4043_v33 = vpop.f32.mrf.mxu0  ;;  %v5459_v3 = vadd.f32 %v5458_v48, %v5457_v12 }
 0x2bf   : > { %v4194_v61 = vadd.f32 %v7308_v18, %v4155_v19  ;;  %v4228_v59 = vmax.f32 %v4196_v47, 0.0  ;;  %v4044_v52 = vadd.f32 %v5438_v31, %v4043_v33  ;;  %v4160_v7 = vadd.f32 %v4052_v49, %v7196_v29  ;;  %v5460_v22 = vpop.f32.mrf.mxu1 }
 0x2c0   : > { %v5735_v53 = vpop.f32.mrf.mxu0 }
 0x2c1   : > { %v4226_v57 = vmax.f32 %v4194_v61, 0.0  ;;  %v4258_v27 = vpack.c.bf16 %v4228_v59, %v4227_v21  ;;  %v4158_v28 = vadd.f32 %v4044_v52, %v7199_v0  ;;  %v4055_v15 = vadd.f32 %v5735_v53, %v5447_v13  ;;  %v5461_v2 = vpop.f32.mrf.mxu1 }
 0x2c2   : > { %v4046_v32 = vpop.f32.mrf.mxu0  ;;  %v4199_v63 = vadd.f32 %v7308_v18, %v4160_v7  ;;  %v5462_v6 = vadd.f32 %v5461_v2, %v5460_v22 }
 0x2c3   : > { %v4257_v41 = vpack.c.bf16 %v4226_v57, %v4225_v37  ;;  %v4047_v26 = vadd.f32 %v5441_v23, %v4046_v32  ;;  %v4161_v62 = vadd.f32 %v4055_v15, %v7201_v34  ;;  %v5463_v56 = vpop.f32.mrf.mxu1  ;;  %v4197_v14 = vadd.f32 %v7308_v18, %v4158_v28 }
 0x2c4   : > { %v5738_v38 = vpop.f32.mrf.mxu0  ;;  %v4231_v47 = vmax.f32 %v4199_v63, 0.0 }
 0x2c5   : > { %5776 = vmatprep.mubr.bf16.mxu0 %v4257_v41  ;;  %v4159_v29 = vadd.f32 %v4047_v26, %v7204_v8  ;;  %v4068_v11 = vadd.f32 %v5738_v38, %v5456_v17  ;;  %v4200_v31 = vadd.f32 %v7308_v18, %v4161_v62  ;;  %v5464_v24 = vpop.f32.mrf.mxu1  ;;  %v4229_v23 = vmax.f32 %v4197_v14, 0.0 }
 0x2c6   : > { %v4059_v0 = vpop.f32.mrf.mxu0  ;;  %5777 = vmatmul.mubr.bf16.vlgmr.msra.gmra.mxu0 %v4258_v27  ;;  %v5465_v32 = vadd.f32 %v5464_v24, %v5463_v56 }
 0x2c7   : > { %v4060_v44 = vadd.f32 %v5450_v42, %v4059_v0  ;;  %v4198_v55 = vadd.f32 %v7308_v18, %v4159_v29  ;;  %v4164_v34 = vadd.f32 %v4068_v11, %v7207_v46  ;;  %v4232_v49 = vmax.f32 %v4200_v31, 0.0  ;;  %v5466_v8 = vpop.f32.mrf.mxu1 }
 0x2c8   : > { %v5739_v19 = vpop.f32.mrf.mxu0 }
 0x2c9   : > { %v4162_v33 = vadd.f32 %v4060_v44, %v7209_v10  ;;  %v4230_v12 = vmax.f32 %v4198_v55, 0.0  ;;  %v4071_v13 = vadd.f32 %v5739_v19, %v5459_v3  ;;  %v4203_v61 = vadd.f32 %v7308_v18, %v4164_v34  ;;  %v5467_v59 = vpop.f32.mrf.mxu1 }
 0x2ca   : > { %v4062_v48 = vpop.f32.mrf.mxu0  ;;  %v4260_v21 = vpack.c.bf16 %v4232_v49, %v4231_v47  ;;  %v5468_v17 = vadd.f32 %v5467_v59, %v5466_v8 }
 0x2cb   : > { %v4259_v52 = vpack.c.bf16 %v4230_v12, %v4229_v23  ;;  %v4063_v53 = vadd.f32 %v5453_v60, %v4062_v48  ;;  %v4165_v43 = vadd.f32 %v4071_v13, %v7212_v25  ;;  %v4201_v7 = vadd.f32 %v7308_v18, %v4162_v33  ;;  %v5469_v37 = vpop.f32.mrf.mxu1 }
 0x2cc   : > { %v5742_v46 = vpop.f32.mrf.mxu0  ;;  %v4235_v28 = vmax.f32 %v4203_v61, 0.0 }
 0x2cd   : > { %5780 = vmatprep.mubr.bf16.mxu0 %v4259_v52  ;;  %v4163_v10 = vadd.f32 %v4063_v53, %v7214_v16  ;;  %v4204_v57 = vadd.f32 %v7308_v18, %v4165_v43  ;;  %v4084_v15 = vadd.f32 %v5742_v46, %v5468_v17  ;;  %v5470_v41 = vpop.f32.mrf.mxu1  ;;  %v4233_v38 = vmax.f32 %v4201_v7, 0.0 }
 0x2ce   : > { %v4075_v27 = vpop.f32.mrf.mxu0  ;;  %5781 = vmatmul.mubr.bf16.gmra.mxu0 %v4260_v21  ;;  %v5471_v22 = vadd.f32 %v5470_v41, %v5469_v37 }
 0x2cf   : > { %v4236_v26 = vmax.f32 %v4204_v57, 0.0  ;;  %v4076_v42 = vadd.f32 %v5462_v6, %v4075_v27  ;;  %v4202_v25 = vadd.f32 %v7308_v18, %v4163_v10  ;;  %v4168_v63 = vadd.f32 %v4084_v15, %v7223_v39  ;;  %v5472_v62 = vpop.f32.mrf.mxu1 }
 0x2d0   : > { %v5743_v2 = vpop.f32.mrf.mxu0 }
 0x2d1   : > { %v4166_v16 = vadd.f32 %v4076_v42, %v7217_v9  ;;  %v4234_v29 = vmax.f32 %v4202_v25, 0.0  ;;  %v4262_v14 = vpack.c.bf16 %v4236_v26, %v4235_v28  ;;  %v4087_v11 = vadd.f32 %v5743_v2, %v5471_v22  ;;  %v5473_v0 = vpop.f32.mrf.mxu1 }
 0x2d2   : > { %v4078_v3 = vpop.f32.mrf.mxu0  ;;  %v4207_v56 = vadd.f32 %v7308_v18, %v4168_v63  ;;  %v5474_v55 = vadd.f32 %v5473_v0, %v5472_v62 }
 0x2d3   : > { %v4261_v31 = vpack.c.bf16 %v4234_v29, %v4233_v38  ;;  %v4079_v24 = vadd.f32 %v5465_v32, %v4078_v3  ;;  %v4169_v44 = vadd.f32 %v4087_v11, %v7226_v20  ;;  %v5475_v34 = vpop.f32.mrf.mxu1  ;;  %v4205_v9 = vadd.f32 %v7308_v18, %v4166_v16 }
 0x2d4   : > { %v5746_v60 = vpop.f32.mrf.mxu0  ;;  %v4239_v49 = vmax.f32 %v4207_v56, 0.0 }
 0x2d5   : > { %5784 = vmatprep.mubr.bf16.mxu0 %v4261_v31  ;;  %v4167_v39 = vadd.f32 %v4079_v24, %v7220_v45  ;;  %v4208_v19 = vadd.f32 %v7308_v18, %v4169_v44  ;;  %v5476_v8 = vpop.f32.mrf.mxu1  ;;  %v4237_v21 = vmax.f32 %v4205_v9, 0.0 }
 0x2d6   : > { %v4091_v47 = vpop.f32.mrf.mxu0  ;;  %5785 = vmatmul.mubr.bf16.gmra.mxu0 %v4262_v14  ;;  %v5477_v13 = vadd.f32 %v5476_v8, %v5475_v34 }
 0x2d7   : > { %v4240_v33 = vmax.f32 %v4208_v19, 0.0  ;;  %v4092_v23 = vadd.f32 %v5474_v55, %v4091_v47  ;;  %v4206_v12 = vadd.f32 %v7308_v18, %v4167_v39  ;;  %v5478_v48 = vpop.f32.mrf.mxu1 }
 0x2d8   : > { %v5747_v20 = vpop.f32.mrf.mxu0 }
 0x2d9   : > { %v4170_v61 = vadd.f32 %v4092_v23, %v7231_v58  ;;  %v4238_v59 = vmax.f32 %v4206_v12, 0.0  ;;  %v4264_v45 = vpack.c.bf16 %v4240_v33, %v4239_v49  ;;  %v5479_v53 = vpop.f32.mrf.mxu1  ;;  %v7496_v33 = vld [vmem:[#allocation3_spill] sm:$0xff] }
 0x2da   : > { %v4094_v52 = vpop.f32.mrf.mxu0  ;;  %v5480_v46 = vadd.f32 %v5479_v53, %v5478_v48 }
 0x2db   : > { %v4263_v43 = vpack.c.bf16 %v4238_v59, %v4237_v21  ;;  %v4095_v6 = vadd.f32 %v5477_v13, %v4094_v52  ;;  %v5481_v17 = vpop.f32.mrf.mxu1  ;;  %v4209_v57 = vadd.f32 %v7308_v18, %v4170_v61 }
 0x2dc   : > { %v5750_v7 = vpop.f32.mrf.mxu0  ;;  %v4100_v10 = vadd.f32 %v5746_v60, %v5480_v46 }
 0x2dd   : > { %5788 = vmatprep.mubr.bf16.mxu0 %v4263_v43  ;;  %v4171_v37 = vadd.f32 %v4095_v6, %v7233_v36  ;;  %v5482_v27 = vpop.f32.mrf.mxu1  ;;  %v4241_v42 = vmax.f32 %v4209_v57, 0.0 }
 0x2de   : > { %5789 = vmatmul.mubr.bf16.gmra.mxu0 %v4264_v45  ;;  %v4172_v58 = vadd.f32 %v4100_v10, %v7238_v54  ;;  %v5483_v28 = vadd.f32 %v5482_v27, %v5481_v17  ;;  %v4107_v15 = vpop.f32.mrf.mxu0  ;;  %v7497_v45 = vld [vmem:[#allocation4_spill] sm:$0xff] }
 0x2df   : > { %v4210_v32 = vadd.f32 %v7308_v18, %v4171_v37  ;;  %v5484_v41 = vpop.f32.mrf.mxu1 }
 0x2e0   : > { %v4103_v26 = vadd.f32 %v5747_v20, %v5483_v28  ;;  %v4211_v2 = vadd.f32 %v7308_v18, %v4172_v58  ;;  %v5751_v62 = vpop.f32.mrf.mxu0 }
 0x2e1   : > { %v4242_v25 = vmax.f32 %v4210_v32, 0.0  ;;  %v5485_v22 = vpop.f32.mrf.mxu1 }
 0x2e2   : > { %v4173_v36 = vadd.f32 %v4103_v26, %v7243_v1  ;;  %v5486_v38 = vadd.f32 %v5485_v22, %v5484_v41  ;;  %v4243_v11 = vmax.f32 %v4211_v2, 0.0  ;;  %v4110_v31 = vpop.f32.mrf.mxu0 }
 0x2e3   : > { %v4265_v63 = vpack.c.bf16 %v4242_v25, %v4241_v42  ;;  %v5487_v16 = vpop.f32.mrf.mxu1  ;;  %v7498_v42 = vld [vmem:[#allocation5_spill] sm:$0xff] }
 0x2e4   : > { %v4212_v29 = vadd.f32 %v7308_v18, %v4173_v36  ;;  %v4108_v54 = vadd.f32 %v5486_v38, %v4107_v15  ;;  %v5754_v19 = vpop.f32.mrf.mxu0 }
 0x2e5   : > { %5792 = vmatprep.mubr.bf16.mxu0 %v4265_v63  ;;  %v5488_v14 = vpop.f32.mrf.mxu1 }
 0x2e6   : > { %v4244_v3 = vmax.f32 %v4212_v29, 0.0  ;;  %v4174_v56 = vadd.f32 %v4108_v54, %v7250_v30  ;;  %v5489_v0 = vadd.f32 %v5488_v14, %v5487_v16  ;;  %v4123_v20 = vpop.f32.mrf.mxu0 }
 0x2e7   : > { %v5490_v24 = vpop.f32.mrf.mxu1 }
 0x2e8   : > { %v4111_v44 = vadd.f32 %v5489_v0, %v4110_v31  ;;  %v4266_v55 = vpack.c.bf16 %v4244_v3, %v4243_v11  ;;  %v4213_v39 = vadd.f32 %v7308_v18, %v4174_v56  ;;  %v5755_v43 = vpop.f32.mrf.mxu0 }
 0x2e9   : > { %v5491_v60 = vpop.f32.mrf.mxu1 }
 0x2ea   : > { %v4175_v1 = vadd.f32 %v4111_v44, %v7254_v40  ;;  %v5492_v34 = vadd.f32 %v5491_v60, %v5490_v24  ;;  %5793 = vmatmul.mubr.bf16.gmra.mxu0 %v4266_v55  ;;  %v4245_v12 = vmax.f32 %v4213_v39, 0.0  ;;  %v4126_v58 = vpop.f32.mrf.mxu0  ;;  %v7500_v55 = vld [vmem:[#allocation7_spill] sm:$0xff] }
 0x2eb   : > { %v5493_v9 = vpop.f32.mrf.mxu1 }
 0x2ec   : > { %v4116_v47 = vadd.f32 %v5750_v7, %v5492_v34  ;;  %v4214_v49 = vadd.f32 %v7308_v18, %v4175_v1  ;;  %v5758_v26 = vpop.f32.mrf.mxu0 }
 0x2ed   : > { %v5494_v8 = vpop.f32.mrf.mxu1 }
 0x2ee   : > { %v4176_v30 = vadd.f32 %v4116_v47, %v7496_v33  ;;  %v5495_v23 = vadd.f32 %v5494_v8, %v5493_v9  ;;  %v4246_v13 = vmax.f32 %v4214_v49, 0.0  ;;  %v4139_v16 = vpop.f32.mrf.mxu0 }
 0x2ef   : > { %v5496_v48 = vpop.f32.mrf.mxu1 }
 0x2f0   : > { %v4119_v61 = vadd.f32 %v5751_v62, %v5495_v23  ;;  %v4267_v21 = vpack.c.bf16 %v4246_v13, %v4245_v12  ;;  %v4215_v59 = vadd.f32 %v7308_v18, %v4176_v30  ;;  %v5759_v24 = vpop.f32.mrf.mxu0 }
 0x2f1   : > { %v5497_v40 = vpop.f32.mrf.mxu1 }
 0x2f2   : > { %v4177_v52 = vadd.f32 %v4119_v61, %v7497_v45  ;;  %v5498_v53 = vadd.f32 %v5497_v40, %v5496_v48  ;;  %5796 = vmatprep.mubr.bf16.mxu0 %v4267_v21  ;;  %v4247_v37 = vmax.f32 %v4215_v59, 0.0  ;;  %v4142_v47 = vpop.f32.mrf.mxu0 }
 0x2f3   : > { %v5499_v6 = vpop.f32.mrf.mxu1 }
 0x2f4   : > { %v4216_v46 = vadd.f32 %v7308_v18, %v4177_v52  ;;  %v4124_v7 = vadd.f32 %v5498_v53, %v4123_v20 }
 0x2f5   : > { %v5500_v17 = vpop.f32.mrf.mxu1 }
 0x2f6   : > { %v4248_v10 = vmax.f32 %v4216_v46, 0.0  ;;  %v4178_v57 = vadd.f32 %v4124_v7, %v7271_v5  ;;  %v5501_v27 = vadd.f32 %v5500_v17, %v5499_v6  ;;  %v7499_v5 = vld [vmem:[#allocation6_spill] sm:$0xff] }
 0x2f7   : > { %v5502_v28 = vpop.f32.mrf.mxu1 }
 0x2f8   : > { %v4127_v32 = vadd.f32 %v5501_v27, %v4126_v58  ;;  %v4268_v15 = vpack.c.bf16 %v4248_v10, %v4247_v37  ;;  %v4217_v2 = vadd.f32 %v7308_v18, %v4178_v57  ;;  %v6103_v58 = vld [vmem:[%s6191_s12 + $0x8] sm:$0xff]  }
 0x2f9   : > { %v5503_v41 = vpop.f32.mrf.mxu1 }
 0x2fa   : > { %v4179_v25 = vadd.f32 %v4127_v32, %v7498_v42  ;;  %v5504_v22 = vadd.f32 %v5503_v41, %v5502_v28  ;;  %5797 = vmatmul.mubr.bf16.gmra.mxu0 %v4268_v15  ;;  %v4249_v14 = vmax.f32 %v4217_v2, 0.0  ;;  %v4507_v28 = vunpack.c.l.bf16 %v6103_v58  ;;  %v6104_v15 = vld [vmem:[%s6191_s12] sm:$0xff]  }
 0x2fb   : > { %v5505_v36 = vpop.f32.mrf.mxu1  ;;  %v4505_v41 = vunpack.c.l.bf16 %v6104_v15  ;;  %v4506_v2 = vunpack.c.h.bf16 %v6104_v15 }
 0x2fc   : > { %v4132_v38 = vadd.f32 %v5754_v19, %v5504_v22  ;;  %v4218_v63 = vadd.f32 %v7308_v18, %v4179_v25  ;;  %v4508_v25 = vunpack.c.h.bf16 %v6103_v58  ;;  %v6109_v58 = vld [vmem:[%s6191_s12 + $0x38] sm:$0xff]  }
 0x2fd   : > { %v5506_v62 = vpop.f32.mrf.mxu1 }
 0x2fe   : > { %v4180_v29 = vadd.f32 %v4132_v38, %v7499_v5  ;;  %v5507_v54 = vadd.f32 %v5506_v62, %v5505_v36  ;;  %v4250_v11 = vmax.f32 %v4218_v63, 0.0 }
 0x2ff   : > { %v5508_v3 = vpop.f32.mrf.mxu1 }
 0x300   : > { %v4135_v56 = vadd.f32 %v5755_v43, %v5507_v54  ;;  %v4269_v0 = vpack.c.bf16 %v4250_v11, %v4249_v14  ;;  %v4219_v44 = vadd.f32 %v7308_v18, %v4180_v29  ;;  %v6105_v54 = vld [vmem:[%s6191_s12 + $0x18] sm:$0xff]  }
 0x301   : > { %v5509_v31 = vpop.f32.mrf.mxu1  ;;  %v4511_v14 = vunpack.c.l.bf16 %v6105_v54 }
 0x302   : > { %v4181_v60 = vadd.f32 %v4135_v56, %v7500_v55  ;;  %v5510_v1 = vadd.f32 %v5509_v31, %v5508_v3  ;;  %5800 = vmatprep.mubr.bf16.mxu0 %v4269_v0  ;;  %v4251_v49 = vmax.f32 %v4219_v44, 0.0  ;;  %v6106_v31 = vld [vmem:[%s6191_s12 + $0x10] sm:$0xff]  }
 0x303   : > { %v5511_v34 = vpop.f32.mrf.mxu1 }
 0x304   : > { %v4220_v39 = vadd.f32 %v7308_v18, %v4181_v60  ;;  %v4140_v19 = vadd.f32 %v5510_v1, %v4139_v16 }
 0x305   : > { %v5512_v9 = vpop.f32.mrf.mxu1 }
 0x306   : > { %v4252_v8 = vmax.f32 %v4220_v39, 0.0  ;;  %v4182_v33 = vadd.f32 %v4140_v19, %v7286_v50  ;;  %v5513_v30 = vadd.f32 %v5512_v9, %v5511_v34  ;;  %v4512_v34 = vunpack.c.h.bf16 %v6105_v54 }
 0x307   : > { %v5514_v23 = vpop.f32.mrf.mxu1 }
 0x308   : > { %v4143_v12 = vadd.f32 %v5513_v30, %v4142_v47  ;;  %v4270_v13 = vpack.c.bf16 %v4252_v8, %v4251_v49  ;;  %v4221_v48 = vadd.f32 %v7308_v18, %v4182_v33  ;;  %v4510_v49 = vunpack.c.h.bf16 %v6106_v31 }
 0x309   : > { %v5515_v20 = vpop.f32.mrf.mxu1 }
 0x30a   : > { %v4183_v61 = vadd.f32 %v4143_v12, %v7288_v4  ;;  %v5516_v21 = vadd.f32 %v5515_v20, %v5514_v23  ;;  %5801 = vmatmul.mubr.bf16.gmra.mxu0 %v4270_v13  ;;  %v4253_v53 = vmax.f32 %v4221_v48, 0.0  ;;  %v6107_v12 = vld [vmem:[%s6191_s12 + $0x28] sm:$0xff]  }
 0x30b   : > { %v5517_v40 = vpop.f32.mrf.mxu1  ;;  %v4515_v13 = vunpack.c.l.bf16 %v6107_v12 }
 0x30c   : > { %v4222_v59 = vadd.f32 %v7308_v18, %v4183_v61  ;;  %v4148_v45 = vadd.f32 %v5758_v26, %v5516_v21 }
 0x30d   : > { %v5518_v52 = vpop.f32.mrf.mxu1 }
 0x30e   : > { %v4254_v43 = vmax.f32 %v4222_v59, 0.0  ;;  %v4184_v50 = vadd.f32 %v4148_v45, %v7292_v51  ;;  %v5519_v6 = vadd.f32 %v5518_v52, %v5517_v40  ;;  %v7376_v51 = vld [vmem:[%s7473_s6] ss:$0 sm:$0xff] }
 0x30f   : > { %v6108_v40 = vld [vmem:[%s6191_s12 + $0x20] sm:$0xff]  }
 0x310   : > { %v4151_v46 = vadd.f32 %v5759_v24, %v5519_v6  ;;  %v4271_v7 = vpack.c.bf16 %v4254_v43, %v4253_v53  ;;  %v4223_v17 = vadd.f32 %v7308_v18, %v4184_v50  ;;  %v4509_v24 = vunpack.c.l.bf16 %v6106_v31  ;;  %v6111_v31 = vld [vmem:[%s6191_s12 + $0x48] sm:$0xff]  }
 0x311   : > { %v4513_v59 = vunpack.c.l.bf16 %v6108_v40  ;;  %v4516_v50 = vunpack.c.h.bf16 %v6107_v12 }
 0x312   : > { %v4185_v4 = vadd.f32 %v4151_v46, %v7299_v35  ;;  %5804 = vmatprep.mubr.bf16.mxu0 %v4271_v7  ;;  %v4255_v10 = vmax.f32 %v4223_v17, 0.0 }
 0x314   : > { %v4224_v37 = vadd.f32 %v7308_v18, %v4185_v4  ;;  %v4514_v4 = vunpack.c.h.bf16 %v6108_v40  ;;  %v6113_v40 = vld [vmem:[%s6191_s12 + $0x58] sm:$0xff]  }
 0x316   : > { %v4256_v57 = vmax.f32 %v4224_v37, 0.0 }
 0x318   : > { %v4272_v27 = vpack.c.bf16 %v4256_v57, %v4255_v10 }
 0x31a   : > { %5805 = vmatmul.mubr.bf16.gmra.mxu0 %v4272_v27 }
 0x386   : > { %v5778_v32 = vpop.f32.mrf.mxu0 }
 0x387   : > { %v4387_v35 = vadd.f32 %v5778_v32, %v7376_v51 }
 0x388   : > { %v4378_v26 = vpop.f32.mrf.mxu0 }
 0x389   : > { %v4539_v18 = vadd.f32 %v4507_v28, %v4387_v35  ;;  %v4379_v42 = vadd.f32 %v7376_v51, %v4378_v26  ;;  %v4519_v28 = vunpack.c.l.bf16 %v6109_v58  ;;  %v6110_v26 = vld [vmem:[%s6191_s12 + $0x30] sm:$0xff]  }
 0x38a   : > { %v5779_v22 = vpop.f32.mrf.mxu0 }
 0x38b   : > { %v4571_v36 = vmax.f32 %v4539_v18, 0.0  ;;  %v4537_v38 = vadd.f32 %v4505_v41, %v4379_v42  ;;  %v4390_v63 = vadd.f32 %v5779_v22, %v7376_v51  ;;  %v4517_v18 = vunpack.c.l.bf16 %v6110_v26 }
 0x38c   : > { %v4381_v62 = vpop.f32.mrf.mxu0 }
 0x38d   : > { %4603 = vst [vmem:[%s7386_s14 + $0x10] sm:$0xff] %v4571_v36  ;;  %v4569_v16 = vmax.f32 %v4537_v38, 0.0  ;;  %v4540_v5 = vadd.f32 %v4508_v25, %v4390_v63  ;;  %v4382_v29 = vadd.f32 %v7376_v51, %v4381_v62  ;;  %v4520_v36 = vunpack.c.h.bf16 %v6109_v58 }
 0x38e   : > { %v5782_v11 = vpop.f32.mrf.mxu0 }
 0x38f   : > { %4601 = vst [vmem:[%s7386_s14] sm:$0xff] %v4569_v16  ;;  %v4572_v3 = vmax.f32 %v4540_v5, 0.0  ;;  %v4538_v56 = vadd.f32 %v4506_v2, %v4382_v29  ;;  %v4403_v0 = vadd.f32 %v5782_v11, %v7376_v51  ;;  %v4518_v5 = vunpack.c.h.bf16 %v6110_v26  ;;  %v6115_v26 = vld [vmem:[%s6191_s12 + $0x68] sm:$0xff]  }
 0x390   : > { %v4394_v44 = vpop.f32.mrf.mxu0 }
 0x391   : > { %4604 = vst [vmem:[%s7386_s14 + $0x18] sm:$0xff] %v4572_v3  ;;  %v4570_v55 = vmax.f32 %v4538_v56, 0.0  ;;  %v4543_v60 = vadd.f32 %v4511_v14, %v4403_v0  ;;  %v4395_v1 = vadd.f32 %v7376_v51, %v4394_v44 }
 0x392   : > { %v5783_v39 = vpop.f32.mrf.mxu0 }
 0x393   : > { %4602 = vst [vmem:[%s7386_s14 + $0x8] sm:$0xff] %v4570_v55  ;;  %v4575_v19 = vmax.f32 %v4543_v60, 0.0  ;;  %v4541_v9 = vadd.f32 %v4509_v24, %v4395_v1  ;;  %v4406_v47 = vadd.f32 %v5783_v39, %v7376_v51  ;;  %v4523_v24 = vunpack.c.l.bf16 %v6111_v31  ;;  %v6112_v55 = vld [vmem:[%s6191_s12 + $0x40] sm:$0xff]  }
 0x394   : > { %v4397_v8 = vpop.f32.mrf.mxu0  ;;  %v4521_v60 = vunpack.c.l.bf16 %v6112_v55 }
 0x395   : > { %4607 = vst [vmem:[%s7386_s14 + $0x30] sm:$0xff] %v4575_v19  ;;  %v4573_v33 = vmax.f32 %v4541_v9, 0.0  ;;  %v4544_v30 = vadd.f32 %v4512_v34, %v4406_v47  ;;  %v4398_v23 = vadd.f32 %v7376_v51, %v4397_v8  ;;  %v4524_v9 = vunpack.c.h.bf16 %v6111_v31 }
 0x396   : > { %v5786_v20 = vpop.f32.mrf.mxu0 }
 0x397   : > { %4605 = vst [vmem:[%s7386_s14 + $0x20] sm:$0xff] %v4573_v33  ;;  %v4576_v48 = vmax.f32 %v4544_v30, 0.0  ;;  %v4542_v61 = vadd.f32 %v4510_v49, %v4398_v23  ;;  %v4419_v21 = vadd.f32 %v5786_v20, %v7376_v51  ;;  %v4522_v49 = vunpack.c.h.bf16 %v6112_v55  ;;  %v6117_v55 = vld [vmem:[%s6191_s12 + $0x78] sm:$0xff]  }
 0x398   : > { %v4410_v45 = vpop.f32.mrf.mxu0 }
 0x399   : > { %4608 = vst [vmem:[%s7386_s14 + $0x38] sm:$0xff] %v4576_v48  ;;  %v4574_v52 = vmax.f32 %v4542_v61, 0.0  ;;  %v4547_v53 = vadd.f32 %v4515_v13, %v4419_v21  ;;  %v4411_v43 = vadd.f32 %v7376_v51, %v4410_v45 }
 0x39a   : > { %v5787_v6 = vpop.f32.mrf.mxu0 }
 0x39b   : > { %4606 = vst [vmem:[%s7386_s14 + $0x28] sm:$0xff] %v4574_v52  ;;  %v4579_v46 = vmax.f32 %v4547_v53, 0.0  ;;  %v4545_v7 = vadd.f32 %v4513_v59, %v4411_v43  ;;  %v4422_v17 = vadd.f32 %v5787_v6, %v7376_v51  ;;  %v4527_v59 = vunpack.c.l.bf16 %v6113_v40  ;;  %v6114_v53 = vld [vmem:[%s6191_s12 + $0x50] sm:$0xff]  }
 0x39c   : > { %v4413_v37 = vpop.f32.mrf.mxu0  ;;  %v4525_v43 = vunpack.c.l.bf16 %v6114_v53 }
 0x39d   : > { %4611 = vst [vmem:[%s7386_s14 + $0x50] sm:$0xff] %v4579_v46  ;;  %v4577_v10 = vmax.f32 %v4545_v7, 0.0  ;;  %v4548_v57 = vadd.f32 %v4516_v50, %v4422_v17  ;;  %v4414_v27 = vadd.f32 %v7376_v51, %v4413_v37  ;;  %v4528_v7 = vunpack.c.h.bf16 %v6113_v40 }
 0x39e   : > { %v5790_v32 = vpop.f32.mrf.mxu0 }
 0x39f   : > { %4609 = vst [vmem:[%s7386_s14 + $0x40] sm:$0xff] %v4577_v10  ;;  %v4580_v15 = vmax.f32 %v4548_v57, 0.0  ;;  %v4546_v41 = vadd.f32 %v4514_v4, %v4414_v27  ;;  %v4435_v35 = vadd.f32 %v5790_v32, %v7376_v51  ;;  %v4526_v57 = vunpack.c.h.bf16 %v6114_v53 }
 0x3a0   : > { %v4426_v42 = vpop.f32.mrf.mxu0 }
 0x3a1   : > { %4612 = vst [vmem:[%s7386_s14 + $0x58] sm:$0xff] %v4580_v15  ;;  %v4578_v25 = vmax.f32 %v4546_v41, 0.0  ;;  %v4551_v22 = vadd.f32 %v4519_v28, %v4435_v35  ;;  %v4427_v2 = vadd.f32 %v7376_v51, %v4426_v42 }
 0x3a2   : > { %v5791_v38 = vpop.f32.mrf.mxu0 }
 0x3a3   : > { %4610 = vst [vmem:[%s7386_s14 + $0x48] sm:$0xff] %v4578_v25  ;;  %v4583_v63 = vmax.f32 %v4551_v22, 0.0  ;;  %v4549_v62 = vadd.f32 %v4517_v18, %v4427_v2  ;;  %v4438_v16 = vadd.f32 %v5791_v38, %v7376_v51  ;;  %v4531_v18 = vunpack.c.l.bf16 %v6115_v26  ;;  %v6116_v22 = vld [vmem:[%s6191_s12 + $0x60] sm:$0xff]  }
 0x3a4   : > { %v4429_v29 = vpop.f32.mrf.mxu0  ;;  %v4529_v2 = vunpack.c.l.bf16 %v6116_v22 }
 0x3a5   : > { %4615 = vst [vmem:[%s7386_s14 + $0x70] sm:$0xff] %v4583_v63  ;;  %v4581_v54 = vmax.f32 %v4549_v62, 0.0  ;;  %v4552_v14 = vadd.f32 %v4520_v36, %v4438_v16  ;;  %v4430_v11 = vadd.f32 %v7376_v51, %v4429_v29  ;;  %v4532_v62 = vunpack.c.h.bf16 %v6115_v26 }
 0x3a7   : > { %4613 = vst [vmem:[%s7386_s14 + $0x60] sm:$0xff] %v4581_v54  ;;  %v4584_v3 = vmax.f32 %v4552_v14, 0.0  ;;  %v4550_v56 = vadd.f32 %v4518_v5, %v4430_v11  ;;  %v4530_v14 = vunpack.c.h.bf16 %v6116_v22 }
 0x3a9   : > { %4616 = vst [vmem:[%s7386_s14 + $0x78] sm:$0xff] %v4584_v3  ;;  %v4582_v0 = vmax.f32 %v4550_v56, 0.0 }
 0x3aa   : > { %v5794_v44 = vpop.f32.mrf.mxu0 }
 0x3ab   : > { %4614 = vst [vmem:[%s7386_s14 + $0x68] sm:$0xff] %v4582_v0  ;;  %v4451_v1 = vadd.f32 %v5794_v44, %v7376_v51 }
 0x3ac   : > { %v4442_v34 = vpop.f32.mrf.mxu0 }
 0x3ad   : > { %v4555_v39 = vadd.f32 %v4523_v24, %v4451_v1  ;;  %v4443_v19 = vadd.f32 %v7376_v51, %v4442_v34 }
 0x3ae   : > { %v5795_v47 = vpop.f32.mrf.mxu0 }
 0x3af   : > { %v4587_v8 = vmax.f32 %v4555_v39, 0.0  ;;  %v4553_v33 = vadd.f32 %v4521_v60, %v4443_v19  ;;  %v4454_v30 = vadd.f32 %v5795_v47, %v7376_v51  ;;  %v4535_v60 = vunpack.c.l.bf16 %v6117_v55  ;;  %v6118_v39 = vld [vmem:[%s6191_s12 + $0x70] sm:$0xff]  }
 0x3b0   : > { %v4445_v23 = vpop.f32.mrf.mxu0  ;;  %v4533_v19 = vunpack.c.l.bf16 %v6118_v39 }
 0x3b1   : > { %4619 = vst [vmem:[%s7386_s14 + $0x90] sm:$0xff] %v4587_v8  ;;  %v4585_v12 = vmax.f32 %v4553_v33, 0.0  ;;  %v4556_v13 = vadd.f32 %v4524_v9, %v4454_v30  ;;  %v4446_v20 = vadd.f32 %v7376_v51, %v4445_v23  ;;  %v4536_v8 = vunpack.c.h.bf16 %v6117_v55 }
 0x3b3   : > { %4617 = vst [vmem:[%s7386_s14 + $0x80] sm:$0xff] %v4585_v12  ;;  %v4588_v48 = vmax.f32 %v4556_v13, 0.0  ;;  %v4554_v61 = vadd.f32 %v4522_v49, %v4446_v20  ;;  %v4534_v13 = vunpack.c.h.bf16 %v6118_v39 }
 0x3b5   : > { %4620 = vst [vmem:[%s7386_s14 + $0x98] sm:$0xff] %v4588_v48  ;;  %v4586_v21 = vmax.f32 %v4554_v61, 0.0 }
 0x3b7   : > { %4618 = vst [vmem:[%s7386_s14 + $0x88] sm:$0xff] %v4586_v21 }
 0x3ba   : > { %v5798_v45 = vpop.f32.mrf.mxu0 }
 0x3bb   : > { %v4467_v52 = vadd.f32 %v5798_v45, %v7376_v51 }
 0x3bc   : > { %v4458_v50 = vpop.f32.mrf.mxu0 }
 0x3bd   : > { %v4559_v6 = vadd.f32 %v4527_v59, %v4467_v52  ;;  %v4459_v46 = vadd.f32 %v7376_v51, %v4458_v50 }
 0x3be   : > { %v5799_v17 = vpop.f32.mrf.mxu0 }
 0x3bf   : > { %v4591_v4 = vmax.f32 %v4559_v6, 0.0  ;;  %v4557_v37 = vadd.f32 %v4525_v43, %v4459_v46  ;;  %v4470_v10 = vadd.f32 %v5799_v17, %v7376_v51 }
 0x3c0   : > { %v4461_v27 = vpop.f32.mrf.mxu0 }
 0x3c1   : > { %4623 = vst [vmem:[%s7386_s14 + $0xb0] sm:$0xff] %v4591_v4  ;;  %v4589_v58 = vmax.f32 %v4557_v37, 0.0  ;;  %v4560_v28 = vadd.f32 %v4528_v7, %v4470_v10  ;;  %v4462_v32 = vadd.f32 %v7376_v51, %v4461_v27 }
 0x3c3   : > { %4621 = vst [vmem:[%s7386_s14 + $0xa0] sm:$0xff] %v4589_v58  ;;  %v4592_v15 = vmax.f32 %v4560_v28, 0.0  ;;  %v4558_v41 = vadd.f32 %v4526_v57, %v4462_v32 }
 0x3c5   : > { %4624 = vst [vmem:[%s7386_s14 + $0xb8] sm:$0xff] %v4592_v15  ;;  %v4590_v35 = vmax.f32 %v4558_v41, 0.0 }
 0x3c7   : > { %4622 = vst [vmem:[%s7386_s14 + $0xa8] sm:$0xff] %v4590_v35 }
 0x3ca   : > { %v5802_v42 = vpop.f32.mrf.mxu0 }
 0x3cb   : > { %v4483_v25 = vadd.f32 %v5802_v42, %v7376_v51 }
 0x3cc   : > { %v4474_v36 = vpop.f32.mrf.mxu0 }
 0x3cd   : > { %v4563_v38 = vadd.f32 %v4531_v18, %v4483_v25  ;;  %v4475_v63 = vadd.f32 %v7376_v51, %v4474_v36 }
 0x3ce   : > { %v5803_v16 = vpop.f32.mrf.mxu0 }
 0x3cf   : > { %v4595_v5 = vmax.f32 %v4563_v38, 0.0  ;;  %v4561_v29 = vadd.f32 %v4529_v2, %v4475_v63  ;;  %v4486_v54 = vadd.f32 %v5803_v16, %v7376_v51 }
 0x3d0   : > { %v4477_v11 = vpop.f32.mrf.mxu0 }
 0x3d1   : > { %4627 = vst [vmem:[%s7386_s14 + $0xd0] sm:$0xff] %v4595_v5  ;;  %v4593_v3 = vmax.f32 %v4561_v29, 0.0  ;;  %v4564_v56 = vadd.f32 %v4532_v62, %v4486_v54  ;;  %v4478_v0 = vadd.f32 %v7376_v51, %v4477_v11 }
 0x3d3   : > { %4625 = vst [vmem:[%s7386_s14 + $0xc0] sm:$0xff] %v4593_v3  ;;  %v4596_v31 = vmax.f32 %v4564_v56, 0.0  ;;  %v4562_v24 = vadd.f32 %v4530_v14, %v4478_v0 }
 0x3d5   : > { %4628 = vst [vmem:[%s7386_s14 + $0xd8] sm:$0xff] %v4596_v31  ;;  %v4594_v44 = vmax.f32 %v4562_v24, 0.0 }
 0x3d7   : > { %4626 = vst [vmem:[%s7386_s14 + $0xc8] sm:$0xff] %v4594_v44 }
 0x3da   : > { %v5806_v1 = vpop.f32.mrf.mxu0 }
 0x3db   : > { %v4499_v34 = vadd.f32 %v5806_v1, %v7376_v51 }
 0x3dc   : > { %v4490_v9 = vpop.f32.mrf.mxu0 }
 0x3dd   : > { %v4567_v47 = vadd.f32 %v4535_v60, %v4499_v34  ;;  %v4491_v49 = vadd.f32 %v7376_v51, %v4490_v9 }
 0x3de   : > { %v5807_v33 = vpop.f32.mrf.mxu0 }
 0x3df   : > { %v4599_v30 = vmax.f32 %v4567_v47, 0.0  ;;  %v4565_v23 = vadd.f32 %v4533_v19, %v4491_v49  ;;  %v4502_v12 = vadd.f32 %v5807_v33, %v7376_v51 }
 0x3e0   : > { %v4493_v20 = vpop.f32.mrf.mxu0 }
 0x3e1   : > { %4631 = vst [vmem:[%s7386_s14 + $0xf0] sm:$0xff] %v4599_v30  ;;  %v4597_v48 = vmax.f32 %v4565_v23, 0.0  ;;  %v4568_v61 = vadd.f32 %v4536_v8, %v4502_v12  ;;  %v4494_v21 = vadd.f32 %v7376_v51, %v4493_v20 }
 0x3e3   : > { %4629 = vst [vmem:[%s7386_s14 + $0xe0] sm:$0xff] %v4597_v48  ;;  %v4600_v40 = vmax.f32 %v4568_v61, 0.0  ;;  %v4566_v59 = vadd.f32 %v4534_v13, %v4494_v21 }
 0x3e5   : > { %4632 = vst [vmem:[%s7386_s14 + $0xf8] sm:$0xff] %v4600_v40  ;;  %v4598_v45 = vmax.f32 %v4566_v59, 0.0 }
 0x3e7   : > { %4630 = vst [vmem:[%s7386_s14 + $0xe8] sm:$0xff] %v4598_v45 }
 0x3e8 PF: > { %s17_s24 = sadd.s32 1, %s6125_s24  }
 0x3e9   : > { %p14_p4 = scmp.ge.s32.totalorder %s17_s24, 4  }
 0x3eb   :  { %16 = sbr.rel (!%p14_p4) target bundleno = 1 (0x1), region = 83 }

</bundles_post_ra>
